<compile_context>
chip_gen: v6e
topology: v6e:2x2x1
jax: 0.10.0
libtpu: 0.0.40
codegen_flags: <defaults>
</compile_context>

<pallas_src>
import functools

import jax
import jax.numpy as jnp
from jax.experimental import pallas as pl
from jax.experimental.pallas import tpu as pltpu


def _round_up(v, m):
    return ((v + m - 1) // m) * m


def _largest_tile(n_pad, target):
    """Largest multiple of 128 that is <= target and divides n_pad."""
    t = min(target, n_pad)
    t -= t % 128
    t = max(t, 128)
    while n_pad % t:
        t -= 128
    return t


def _choose_tiling(n, tile_target):
    # Pad N to a lane/MXU-friendly size: 128 for tiny graphs, else a multiple of 256
    # (full contraction depth of the v6e/v7x 2x256^2 MXU).
    n_pad = 128 if n <= 128 else _round_up(n, 256)
    tk = _largest_tile(n_pad, tile_target)
    tm = tk
    # Keep >= 2 row tiles so the "parallel" row axis can shard across both v7x TCs.
    if n_pad // tm < 2 and n_pad > 128:
        tm = _largest_tile(n_pad, n_pad // 2)
    return n_pad, tm, tk


def _vmem_limit_bytes(tm, tk, fin_p, hidden_p, fout_p):
    """Rough double-buffered working-set estimate for both passes, with headroom."""
    bf, f4 = 2, 4
    pass1 = (2 * tm * tk * bf                     # A tiles
             + 2 * tk * fin_p * bf                # X neighbor rows
             + 2 * tm * fin_p * bf                # X self rows
             + 2 * tm * f4                        # inv_deg
             + 2 * 2 * fin_p * hidden_p * bf      # wl1, wr1
             + 2 * hidden_p * f4                  # b1
             + 2 * 2 * hidden_p * fout_p * bf     # wl2, wr2
             + 2 * fout_p * f4                    # b2
             + 2 * tm * fout_p * (bf + f4)        # p2 / skip2 outputs
             + tm * fin_p * f4)                   # acc scratch
    pass2 = (2 * tm * tk * bf + 2 * tk * fout_p * bf + 2 * tm * fout_p * f4
             + 2 * tm * f4 + 2 * tm * fout_p * f4 + tm * fout_p * f4)
    need = max(pass1, pass2)
    # Raise above v5e's 16 MiB scoped default, stay well under v7x's 64 MiB physical VMEM.
    return int(min(max(2 * need, 32 << 20), 56 << 20))


# ---------------------------------------------------------------------------
# Kernel 1: layer-1 aggregation (tiled A01 @ X, f32 accumulator); on the last K
# tile: f32 mean-normalize by inv_deg, fused layer-1 projection + ReLU, and the
# (reassociated) layer-2 projections so pass 2 aggregates at the output width.
# ---------------------------------------------------------------------------
def layer1_kernel(a_ref, xk_ref, xi_ref, invdeg_ref, wl1_ref, wr1_ref, b1_ref,
                  wl2_ref, wr2_ref, b2_ref, p2_ref, skip2_ref, acc_ref):
    k = pl.program_id(1)

    @pl.when(k == 0)
    def _():
        acc_ref[...] = jnp.zeros_like(acc_ref)

    # Partial neighbor sum: acc += A01[i-tile, k-tile] @ X[k-tile]   (bf16 MXU, f32 acc)
    acc_ref[...] += jnp.dot(a_ref[...], xk_ref[...],
                            preferred_element_type=jnp.float32)

    # NOTE: p2/skip2 blocks are only written on k==last and rely on Pallas writing the
    # resident output block back when the i block changes (standard revisiting semantics).
    @pl.when(k == pl.num_programs(1) - 1)
    def _():
        # f32 per-row mean normalization applied once, after the full sum.
        agg = (acc_ref[...] * invdeg_ref[...]).astype(jnp.bfloat16)
        # Fused projection: neighbor path + (root + parallel Linear) path, f32 accum.
        h = (jnp.dot(agg, wl1_ref[...], preferred_element_type=jnp.float32)
             + jnp.dot(xi_ref[...], wr1_ref[...], preferred_element_type=jnp.float32)
             + b1_ref[...])
        h = jnp.maximum(h, 0.0).astype(jnp.bfloat16)          # ReLU
        # Layer-2 projections (project BEFORE aggregating: fout_p <= hidden work in pass 2).
        p2_ref[...] = jnp.dot(
            h, wl2_ref[...], preferred_element_type=jnp.float32).astype(p2_ref.dtype)
        skip2_ref[...] = (jnp.dot(h, wr2_ref[...],
                                  preferred_element_type=jnp.float32)
                          + b2_ref[...]).astype(skip2_ref.dtype)


# ---------------------------------------------------------------------------
# Kernel 2: layer-2 aggregation over the already-projected features, f32 mean
# normalization, plus the fused root/skip term.
# ---------------------------------------------------------------------------
def layer2_kernel(a_ref, p2_ref, skip2_ref, invdeg_ref, o_ref, acc_ref):
    k = pl.program_id(1)

    @pl.when(k == 0)
    def _():
        acc_ref[...] = jnp.zeros_like(acc_ref)

    acc_ref[...] += jnp.dot(a_ref[...], p2_ref[...],
                            preferred_element_type=jnp.float32)

    @pl.when(k == pl.num_programs(1) - 1)
    def _():
        o_ref[...] = (acc_ref[...] * invdeg_ref[...]
                      + skip2_ref[...]).astype(o_ref.dtype)


@functools.partial(jax.jit, static_argnames=("tile_target",))
def gnn_forward(x, edge_index, params, *, tile_target=512):
    """Dense-adjacency (tiled) Pallas implementation of the 2-layer GNN forward."""
    n, fin = x.shape
    hidden = params["conv1_wl"].shape[0]
    fout = params["conv2_wl"].shape[0]

    n_pad, tm, tk = _choose_tiling(n, tile_target)
    assert n_pad % tm == 0 and n_pad % tk == 0
    fin_p = _round_up(fin, 128)      # lane-dense X tiles
    hidden_p = _round_up(hidden, 128)  # lane-dense h / layer-2 contraction
    fout_p = _round_up(fout, 128)    # lane-dense outputs (unmasked stores)

    # ---- glue: raw 0/1 adjacency built directly at padded size, single bf16 cast ----
    src = edge_index[0].astype(jnp.int32)
    dst = edge_index[1].astype(jnp.int32)
    adj = jnp.zeros((n_pad, n_pad), jnp.float32).at[dst, src].add(1.0)
    deg = jnp.sum(adj, axis=1, keepdims=True)                 # (n_pad, 1) f32
    inv_deg = 1.0 / jnp.maximum(deg, 1.0)                     # f32; pad rows -> 1.0
    a_p = adj.astype(jnp.bfloat16)                            # small integer counts: exact

    x_p = jnp.pad(x, ((0, n_pad - n), (0, fin_p - fin))).astype(jnp.bfloat16)

    # ---- weight fusion & padding (PyTorch (out,in) -> (in,out), hidden padded) ----
    wl1 = jnp.zeros((fin_p, hidden_p), jnp.float32).at[:fin, :hidden].set(
        params["conv1_wl"].T).astype(jnp.bfloat16)                        # neighbor path
    wr1 = jnp.zeros((fin_p, hidden_p), jnp.float32).at[:fin, :hidden].set(
        (params["conv1_wr"] + params["lin1_w"]).T).astype(jnp.bfloat16)   # root + skip fused
    b1 = jnp.zeros((1, hidden_p), jnp.float32).at[0, :hidden].set(
        params["conv1_b"] + params["lin1_b"])

    wl2 = jnp.zeros((hidden_p, fout_p), jnp.float32).at[:hidden, :fout].set(
        params["conv2_wl"].T).astype(jnp.bfloat16)
    wr2 = jnp.zeros((hidden_p, fout_p), jnp.float32).at[:hidden, :fout].set(
        (params["conv2_wr"] + params["lin2_w"]).T).astype(jnp.bfloat16)
    b2 = jnp.zeros((1, fout_p), jnp.float32).at[0, :fout].set(
        params["conv2_b"] + params["lin2_b"])

    ni, nk = n_pad // tm, n_pad // tk
    vmem_limit = _vmem_limit_bytes(tm, tk, fin_p, hidden_p, fout_p)

    # ---- pass 1: layer-1 aggregation + fused projections ----
    cost1 = pl.CostEstimate(
        flops=int(2 * n_pad * n_pad * fin_p + 4 * n_pad * fin_p * hidden_p
                  + 4 * n_pad * hidden_p * fout_p),
        transcendentals=0,
        bytes_accessed=int(2 * n_pad * n_pad + 2 * (ni + 1) * n_pad * fin_p
                           + 6 * n_pad * fout_p + 4 * n_pad),
    )
    p2, skip2 = pl.pallas_call(
        layer1_kernel,
        out_shape=(jax.ShapeDtypeStruct((n_pad, fout_p), jnp.bfloat16),
                   jax.ShapeDtypeStruct((n_pad, fout_p), jnp.float32)),
        grid_spec=pltpu.PrefetchScalarGridSpec(
            num_scalar_prefetch=0,
            grid=(ni, nk),
            in_specs=[
                pl.BlockSpec((tm, tk), lambda i, k: (i, k)),               # A tile (0/1)
                pl.BlockSpec((tk, fin_p), lambda i, k: (k, 0)),            # X rows (neighbors)
                pl.BlockSpec((tm, fin_p), lambda i, k: (i, 0)),            # X rows (self)
                pl.BlockSpec((tm, 1), lambda i, k: (i, 0)),                # inv_deg (f32)
                pl.BlockSpec((fin_p, hidden_p), lambda i, k: (0, 0)),      # Wl1
                pl.BlockSpec((fin_p, hidden_p), lambda i, k: (0, 0)),      # Wr1 (+lin1 fused)
                pl.BlockSpec((1, hidden_p), lambda i, k: (0, 0)),          # b1 fused
                pl.BlockSpec((hidden_p, fout_p), lambda i, k: (0, 0)),     # Wl2
                pl.BlockSpec((hidden_p, fout_p), lambda i, k: (0, 0)),     # Wr2 (+lin2 fused)
                pl.BlockSpec((1, fout_p), lambda i, k: (0, 0)),            # b2 fused
            ],
            out_specs=[
                pl.BlockSpec((tm, fout_p), lambda i, k: (i, 0)),           # p2
                pl.BlockSpec((tm, fout_p), lambda i, k: (i, 0)),           # skip2
            ],
            scratch_shapes=[pltpu.VMEM((tm, fin_p), jnp.float32)],
        ),
        compiler_params=pltpu.CompilerParams(
            dimension_semantics=("parallel", "arbitrary"),
            vmem_limit_bytes=vmem_limit),
        cost_estimate=cost1,
    )(a_p, x_p, x_p, inv_deg, wl1, wr1, b1, wl2, wr2, b2)

    # ---- pass 2: layer-2 aggregation + mean-normalize + skip ----
    cost2 = pl.CostEstimate(
        flops=int(2 * n_pad * n_pad * fout_p + 2 * n_pad * fout_p),
        transcendentals=0,
        bytes_accessed=int(2 * n_pad * n_pad + 2 * ni * n_pad * fout_p
                           + 8 * n_pad * fout_p + 4 * n_pad),
    )
    out = pl.pallas_call(
        layer2_kernel,
        out_shape=jax.ShapeDtypeStruct((n_pad, fout_p), jnp.float32),
        grid_spec=pltpu.PrefetchScalarGridSpec(
            num_scalar_prefetch=0,
            grid=(ni, nk),
            in_specs=[
                pl.BlockSpec((tm, tk), lambda i, k: (i, k)),               # A tile (0/1)
                pl.BlockSpec((tk, fout_p), lambda i, k: (k, 0)),           # p2 rows
                pl.BlockSpec((tm, fout_p), lambda i, k: (i, 0)),           # skip2 rows
                pl.BlockSpec((tm, 1), lambda i, k: (i, 0)),                # inv_deg (f32)
            ],
            out_specs=pl.BlockSpec((tm, fout_p), lambda i, k: (i, 0)),
            scratch_shapes=[pltpu.VMEM((tm, fout_p), jnp.float32)],
        ),
        compiler_params=pltpu.CompilerParams(
            dimension_semantics=("parallel", "arbitrary"),
            vmem_limit_bytes=vmem_limit),
        cost_estimate=cost2,
    )(a_p, p2, skip2, inv_deg)

    return out[:n, :fout]


def gnn_reference(x, edge_index, params):
    """Pure-JAX f32 reference for correctness checking."""
    n = x.shape[0]
    adj = jnp.zeros((n, n), jnp.float32).at[edge_index[1], edge_index[0]].add(1.0)
    deg = jnp.sum(adj, axis=1, keepdims=True)
    a_mean = adj / jnp.maximum(deg, 1.0)

    def conv(h, wl, wr, b):
        return (a_mean @ h) @ wl.T + h @ wr.T + b

    def lin(h, w, b):
        return h @ w.T + b

    h = conv(x, params["conv1_wl"], params["conv1_wr"], params["conv1_b"]) \
        + lin(x, params["lin1_w"], params["lin1_b"])
    h = jnp.maximum(h, 0.0)
    return conv(h, params["conv2_wl"], params["conv2_wr"], params["conv2_b"]) \
        + lin(h, params["lin2_w"], params["lin2_b"])


def init_params(key, in_ch, hidden_ch, out_ch):
    ks = jax.random.split(key, 8)
    s = 0.1
    return {
        # SAGEConv layer 1: neighbor weight W_l, root weight W_r, bias (PyTorch (out,in))
        "conv1_wl": s * jax.random.normal(ks[0], (hidden_ch, in_ch), jnp.float32),
        "conv1_wr": s * jax.random.normal(ks[1], (hidden_ch, in_ch), jnp.float32),
        "conv1_b":  s * jax.random.normal(ks[2], (hidden_ch,), jnp.float32),
        # Linear skip 1
        "lin1_w":   s * jax.random.normal(ks[3], (hidden_ch, in_ch), jnp.float32),
        "lin1_b":   s * jax.random.normal(ks[4], (hidden_ch,), jnp.float32),
        # SAGEConv layer 2
        "conv2_wl": s * jax.random.normal(ks[5], (out_ch, hidden_ch), jnp.float32),
        "conv2_wr": s * jax.random.normal(ks[6], (out_ch, hidden_ch), jnp.float32),
        "conv2_b":  jnp.zeros((out_ch,), jnp.float32),
        # Linear skip 2
        "lin2_w":   s * jax.random.normal(ks[7], (out_ch, hidden_ch), jnp.float32),
        "lin2_b":   jnp.zeros((out_ch,), jnp.float32),
    }


if __name__ == "__main__":
    # Small but grid-exercising sizes: N pads to 512 -> tm=256 (2 row tiles), tk=512.
    N, IN_CH, HIDDEN_CH, OUT_CH = 300, 8, 32, 16

    key = jax.random.PRNGKey(0)
    k_x, k_p = jax.random.split(key)

    x = jax.random.normal(k_x, (N, IN_CH), jnp.float32)

    # Deterministic edge list: directed ring + chord edges, shape (2, E): row0=src, row1=dst.
    ring_src = jnp.arange(N, dtype=jnp.int32)
    ring_dst = (ring_src + 1) % N
    chord_src = jnp.arange(0, N, 3, dtype=jnp.int32)
    chord_dst = (chord_src * 7 + 3) % N
    edge_index = jnp.stack([jnp.concatenate([ring_src, chord_src]),
                            jnp.concatenate([ring_dst, chord_dst])], axis=0)

    params = init_params(k_p, IN_CH, HIDDEN_CH, OUT_CH)

    out = gnn_forward(x, edge_index, params)
    out = jax.block_until_ready(out)

    ref = gnn_reference(x, edge_index, params)
    assert out.shape == (N, OUT_CH)
    max_err = float(jnp.max(jnp.abs(out - ref)))
    # bf16 MXU operands (X, weights) vs f32 reference -> loose-but-meaningful tolerance.
    assert jnp.allclose(out, ref, atol=5e-2, rtol=5e-2), \
        f"Pallas output mismatch vs reference (max abs err {max_err})"

    print("KERNEL_OK")
</pallas_src>

<mosaic_0001>
module attributes {stable_mosaic.version = 11 : i64} {
  func.func private @main(%arg0: i32) attributes {dimension_semantics = [#tpu.dimension_semantics<core_parallel>], iteration_bounds = array<i64: 2>, tpu.core_type = #tpu.core_type<sc_scalar_subcore>, window_params = []} {
    return
  }
}

module attributes {stable_mosaic.version = 11 : i64} {
  func.func private @main(%arg0: i32) attributes {dimension_semantics = [#tpu.dimension_semantics<core_parallel>], iteration_bounds = array<i64: 2>, tpu.core_type = #tpu.core_type<sc_scalar_subcore>, window_params = []} {
    return
  }
}

module attributes {stable_mosaic.version = 11 : i64} {
  func.func @layer1_kernel(%arg0: i32, %arg1: i32, %arg2: memref<256x512xbf16, #tpu.memory_space<vmem>>, %arg3: memref<512x128xbf16, #tpu.memory_space<vmem>>, %arg4: memref<256x128xbf16, #tpu.memory_space<vmem>>, %arg5: memref<256x1xf32, #tpu.memory_space<vmem>>, %arg6: memref<128x128xbf16, #tpu.memory_space<vmem>>, %arg7: memref<128x128xbf16, #tpu.memory_space<vmem>>, %arg8: memref<1x128xf32, #tpu.memory_space<vmem>>, %arg9: memref<128x128xbf16, #tpu.memory_space<vmem>>, %arg10: memref<128x128xbf16, #tpu.memory_space<vmem>>, %arg11: memref<1x128xf32, #tpu.memory_space<vmem>>, %arg12: memref<256x128xbf16, #tpu.memory_space<vmem>>, %arg13: memref<256x128xf32, #tpu.memory_space<vmem>>, %arg14: memref<256x128xf32, #tpu.memory_space<vmem>>) attributes {dimension_semantics = [#tpu.dimension_semantics<parallel>, #tpu.dimension_semantics<arbitrary>], iteration_bounds = array<i64: 2, 1>, scalar_prefetch = 0 : i64, scratch_operands = 1 : i64, tpu.core_type = #tpu.core_type<tc>, window_params = [{transform_indices = @transform_0, window_bounds = array<i64: 256, 512>}, {transform_indices = @transform_1, window_bounds = array<i64: 512, 128>}, {transform_indices = @transform_2, window_bounds = array<i64: 256, 128>}, {transform_indices = @transform_3, window_bounds = array<i64: 256, 1>}, {pipeline_mode = #tpu.pipeline_mode<synchronous>, transform_indices = @transform_4, window_bounds = array<i64: 128, 128>}, {pipeline_mode = #tpu.pipeline_mode<synchronous>, transform_indices = @transform_5, window_bounds = array<i64: 128, 128>}, {pipeline_mode = #tpu.pipeline_mode<synchronous>, transform_indices = @transform_6, window_bounds = array<i64: 1, 128>}, {pipeline_mode = #tpu.pipeline_mode<synchronous>, transform_indices = @transform_7, window_bounds = array<i64: 128, 128>}, {pipeline_mode = #tpu.pipeline_mode<synchronous>, transform_indices = @transform_8, window_bounds = array<i64: 128, 128>}, {pipeline_mode = #tpu.pipeline_mode<synchronous>, transform_indices = @transform_9, window_bounds = array<i64: 1, 128>}, {transform_indices = @transform_10, window_bounds = array<i64: 256, 128>}, {transform_indices = @transform_11, window_bounds = array<i64: 256, 128>}]} {
    %c0_i32 = arith.constant 0 : i32
    %0 = arith.cmpi eq, %arg1, %c0_i32 : i32
    %1 = arith.extui %0 : i1 to i32
    %c0_i32_0 = arith.constant 0 : i32
    %2 = arith.cmpi ne, %1, %c0_i32_0 : i32
    scf.if %2 {
      %cst_10 = arith.constant 0.000000e+00 : f32
      %12 = vector.broadcast %cst_10 : f32 to vector<256x128xf32>
      %c0_11 = arith.constant 0 : index
      %c0_12 = arith.constant 0 : index
      %13 = vector.load %arg14[%c0_11, %c0_12] : memref<256x128xf32, #tpu.memory_space<vmem>>, vector<256x128xf32>
      tpu.vector_store %arg14[%c0_11, %c0_12], %12 {strides = array<i32>} : memref<256x128xf32, #tpu.memory_space<vmem>>, vector<256x128xf32>,
    } else {
    }
    %c0 = arith.constant 0 : index
    %c0_1 = arith.constant 0 : index
    %3 = vector.load %arg14[%c0, %c0_1] : memref<256x128xf32, #tpu.memory_space<vmem>>, vector<256x128xf32>
    %c0_2 = arith.constant 0 : index
    %c0_3 = arith.constant 0 : index
    %4 = vector.load %arg2[%c0_2, %c0_3] : memref<256x512xbf16, #tpu.memory_space<vmem>>, vector<256x512xbf16>
    %c0_4 = arith.constant 0 : index
    %c0_5 = arith.constant 0 : index
    %5 = vector.load %arg3[%c0_4, %c0_5] : memref<512x128xbf16, #tpu.memory_space<vmem>>, vector<512x128xbf16>
    %cst = arith.constant dense<0.000000e+00> : vector<256x128xf32>
    %6 = tpu.matmul %4, %5, %cst {dimension_numbers = #tpu.dot_dimension_numbers<[1], [0], [0], [1], [0, 0, 1, 1], [], []>} : vector<256x512xbf16>, vector<512x128xbf16>, vector<256x128xf32> -> vector<256x128xf32>
    %7 = arith.addf %3, %6 : vector<256x128xf32>
    %c0_6 = arith.constant 0 : index
    %c0_7 = arith.constant 0 : index
    %8 = vector.load %arg14[%c0_6, %c0_7] : memref<256x128xf32, #tpu.memory_space<vmem>>, vector<256x128xf32>
    tpu.vector_store %arg14[%c0_6, %c0_7], %7 {strides = array<i32>} : memref<256x128xf32, #tpu.memory_space<vmem>>, vector<256x128xf32>,
    %c0_i32_8 = arith.constant 0 : i32
    %9 = arith.cmpi eq, %arg1, %c0_i32_8 : i32
    %10 = arith.extui %9 : i1 to i32
    %c0_i32_9 = arith.constant 0 : i32
    %11 = arith.cmpi ne, %10, %c0_i32_9 : i32
    scf.if %11 {
      %c0_10 = arith.constant 0 : index
      %c0_11 = arith.constant 0 : index
      %12 = vector.load %arg14[%c0_10, %c0_11] : memref<256x128xf32, #tpu.memory_space<vmem>>, vector<256x128xf32>
      %c0_12 = arith.constant 0 : index
      %c0_13 = arith.constant 0 : index
      %13 = vector.load %arg5[%c0_12, %c0_13] : memref<256x1xf32, #tpu.memory_space<vmem>>, vector<256x1xf32>
      %14 = vector.broadcast %13 : vector<256x1xf32> to vector<256x128xf32>
      %15 = arith.mulf %12, %14 : vector<256x128xf32>
      %16 = arith.truncf %15 : vector<256x128xf32> to vector<256x128xbf16>
      %c0_14 = arith.constant 0 : index
      %c0_15 = arith.constant 0 : index
      %17 = vector.load %arg6[%c0_14, %c0_15] : memref<128x128xbf16, #tpu.memory_space<vmem>>, vector<128x128xbf16>
      %cst_16 = arith.constant dense<0.000000e+00> : vector<256x128xf32>
      %18 = tpu.matmul %16, %17, %cst_16 {dimension_numbers = #tpu.dot_dimension_numbers<[1], [0], [0], [1], [0, 0, 1, 1], [], []>} : vector<256x128xbf16>, vector<128x128xbf16>, vector<256x128xf32> -> vector<256x128xf32>
      %c0_17 = arith.constant 0 : index
      %c0_18 = arith.constant 0 : index
      %19 = vector.load %arg4[%c0_17, %c0_18] : memref<256x128xbf16, #tpu.memory_space<vmem>>, vector<256x128xbf16>
      %c0_19 = arith.constant 0 : index
      %c0_20 = arith.constant 0 : index
      %20 = vector.load %arg7[%c0_19, %c0_20] : memref<128x128xbf16, #tpu.memory_space<vmem>>, vector<128x128xbf16>
      %cst_21 = arith.constant dense<0.000000e+00> : vector<256x128xf32>
      %21 = tpu.matmul %19, %20, %cst_21 {dimension_numbers = #tpu.dot_dimension_numbers<[1], [0], [0], [1], [0, 0, 1, 1], [], []>} : vector<256x128xbf16>, vector<128x128xbf16>, vector<256x128xf32> -> vector<256x128xf32>
      %22 = arith.addf %18, %21 : vector<256x128xf32>
      %c0_22 = arith.constant 0 : index
      %c0_23 = arith.constant 0 : index
      %23 = vector.load %arg8[%c0_22, %c0_23] : memref<1x128xf32, #tpu.memory_space<vmem>>, vector<1x128xf32>
      %24 = vector.broadcast %23 : vector<1x128xf32> to vector<256x128xf32>
      %25 = arith.addf %22, %24 : vector<256x128xf32>
      %cst_24 = arith.constant 0.000000e+00 : f32
      %26 = vector.broadcast %cst_24 : f32 to vector<256x128xf32>
      %27 = arith.maximumf %25, %26 : vector<256x128xf32>
      %28 = arith.truncf %27 : vector<256x128xf32> to vector<256x128xbf16>
      %c0_25 = arith.constant 0 : index
      %c0_26 = arith.constant 0 : index
      %29 = vector.load %arg9[%c0_25, %c0_26] : memref<128x128xbf16, #tpu.memory_space<vmem>>, vector<128x128xbf16>
      %cst_27 = arith.constant dense<0.000000e+00> : vector<256x128xf32>
      %30 = tpu.matmul %28, %29, %cst_27 {dimension_numbers = #tpu.dot_dimension_numbers<[1], [0], [0], [1], [0, 0, 1, 1], [], []>} : vector<256x128xbf16>, vector<128x128xbf16>, vector<256x128xf32> -> vector<256x128xf32>
      %31 = arith.truncf %30 : vector<256x128xf32> to vector<256x128xbf16>
      %c0_28 = arith.constant 0 : index
      %c0_29 = arith.constant 0 : index
      %32 = vector.load %arg12[%c0_28, %c0_29] : memref<256x128xbf16, #tpu.memory_space<vmem>>, vector<256x128xbf16>
      tpu.vector_store %arg12[%c0_28, %c0_29], %31 {strides = array<i32>} : memref<256x128xbf16, #tpu.memory_space<vmem>>, vector<256x128xbf16>,
      %c0_30 = arith.constant 0 : index
      %c0_31 = arith.constant 0 : index
      %33 = vector.load %arg10[%c0_30, %c0_31] : memref<128x128xbf16, #tpu.memory_space<vmem>>, vector<128x128xbf16>
      %cst_32 = arith.constant dense<0.000000e+00> : vector<256x128xf32>
      %34 = tpu.matmul %28, %33, %cst_32 {dimension_numbers = #tpu.dot_dimension_numbers<[1], [0], [0], [1], [0, 0, 1, 1], [], []>} : vector<256x128xbf16>, vector<128x128xbf16>, vector<256x128xf32> -> vector<256x128xf32>
      %c0_33 = arith.constant 0 : index
      %c0_34 = arith.constant 0 : index
      %35 = vector.load %arg11[%c0_33, %c0_34] : memref<1x128xf32, #tpu.memory_space<vmem>>, vector<1x128xf32>
      %36 = vector.broadcast %35 : vector<1x128xf32> to vector<256x128xf32>
      %37 = arith.addf %34, %36 : vector<256x128xf32>
      %c0_35 = arith.constant 0 : index
      %c0_36 = arith.constant 0 : index
      %38 = vector.load %arg13[%c0_35, %c0_36] : memref<256x128xf32, #tpu.memory_space<vmem>>, vector<256x128xf32>
      tpu.vector_store %arg13[%c0_35, %c0_36], %37 {strides = array<i32>} : memref<256x128xf32, #tpu.memory_space<vmem>>, vector<256x128xf32>,
    } else {
    }
    return
  }
  func.func @transform_0(%arg0: i32, %arg1: i32) -> (i32, i32) {
    %c0_i32 = arith.constant 0 : i32
    return %arg0, %arg1 : i32, i32
  }
  func.func @transform_1(%arg0: i32, %arg1: i32) -> (i32, i32) {
    %c0_i32 = arith.constant 0 : i32
    %c0_i32_0 = arith.constant 0 : i32
    return %arg1, %c0_i32 : i32, i32
  }
  func.func @transform_2(%arg0: i32, %arg1: i32) -> (i32, i32) {
    %c0_i32 = arith.constant 0 : i32
    %c0_i32_0 = arith.constant 0 : i32
    return %arg0, %c0_i32 : i32, i32
  }
  func.func @transform_3(%arg0: i32, %arg1: i32) -> (i32, i32) {
    %c0_i32 = arith.constant 0 : i32
    %c0_i32_0 = arith.constant 0 : i32
    return %arg0, %c0_i32 : i32, i32
  }
  func.func @transform_4(%arg0: i32, %arg1: i32) -> (i32, i32) {
    %c0_i32 = arith.constant 0 : i32
    %c0_i32_0 = arith.constant 0 : i32
    %c0_i32_1 = arith.constant 0 : i32
    return %c0_i32, %c0_i32_0 : i32, i32
  }
  func.func @transform_5(%arg0: i32, %arg1: i32) -> (i32, i32) {
    %c0_i32 = arith.constant 0 : i32
    %c0_i32_0 = arith.constant 0 : i32
    %c0_i32_1 = arith.constant 0 : i32
    return %c0_i32, %c0_i32_0 : i32, i32
  }
  func.func @transform_6(%arg0: i32, %arg1: i32) -> (i32, i32) {
    %c0_i32 = arith.constant 0 : i32
    %c0_i32_0 = arith.constant 0 : i32
    %c0_i32_1 = arith.constant 0 : i32
    return %c0_i32, %c0_i32_0 : i32, i32
  }
  func.func @transform_7(%arg0: i32, %arg1: i32) -> (i32, i32) {
    %c0_i32 = arith.constant 0 : i32
    %c0_i32_0 = arith.constant 0 : i32
    %c0_i32_1 = arith.constant 0 : i32
    return %c0_i32, %c0_i32_0 : i32, i32
  }
  func.func @transform_8(%arg0: i32, %arg1: i32) -> (i32, i32) {
    %c0_i32 = arith.constant 0 : i32
    %c0_i32_0 = arith.constant 0 : i32
    %c0_i32_1 = arith.constant 0 : i32
    return %c0_i32, %c0_i32_0 : i32, i32
  }
  func.func @transform_9(%arg0: i32, %arg1: i32) -> (i32, i32) {
    %c0_i32 = arith.constant 0 : i32
    %c0_i32_0 = arith.constant 0 : i32
    %c0_i32_1 = arith.constant 0 : i32
    return %c0_i32, %c0_i32_0 : i32, i32
  }
  func.func @transform_10(%arg0: i32, %arg1: i32) -> (i32, i32) {
    %c0_i32 = arith.constant 0 : i32
    %c0_i32_0 = arith.constant 0 : i32
    return %arg0, %c0_i32 : i32, i32
  }
  func.func @transform_11(%arg0: i32, %arg1: i32) -> (i32, i32) {
    %c0_i32 = arith.constant 0 : i32
    %c0_i32_0 = arith.constant 0 : i32
    return %arg0, %c0_i32 : i32, i32
  }
}

module attributes {stable_mosaic.version = 11 : i64} {
  func.func @layer2_kernel(%arg0: i32, %arg1: i32, %arg2: memref<256x512xbf16, #tpu.memory_space<vmem>>, %arg3: memref<512x128xbf16, #tpu.memory_space<vmem>>, %arg4: memref<256x128xf32, #tpu.memory_space<vmem>>, %arg5: memref<256x1xf32, #tpu.memory_space<vmem>>, %arg6: memref<256x128xf32, #tpu.memory_space<vmem>>, %arg7: memref<256x128xf32, #tpu.memory_space<vmem>>) attributes {dimension_semantics = [#tpu.dimension_semantics<parallel>, #tpu.dimension_semantics<arbitrary>], iteration_bounds = array<i64: 2, 1>, scalar_prefetch = 0 : i64, scratch_operands = 1 : i64, tpu.core_type = #tpu.core_type<tc>, window_params = [{transform_indices = @transform_0, window_bounds = array<i64: 256, 512>}, {transform_indices = @transform_1, window_bounds = array<i64: 512, 128>}, {transform_indices = @transform_2, window_bounds = array<i64: 256, 128>}, {transform_indices = @transform_3, window_bounds = array<i64: 256, 1>}, {transform_indices = @transform_4, window_bounds = array<i64: 256, 128>}]} {
    %c0_i32 = arith.constant 0 : i32
    %0 = arith.cmpi eq, %arg1, %c0_i32 : i32
    %1 = arith.extui %0 : i1 to i32
    %c0_i32_0 = arith.constant 0 : i32
    %2 = arith.cmpi ne, %1, %c0_i32_0 : i32
    scf.if %2 {
      %cst_10 = arith.constant 0.000000e+00 : f32
      %12 = vector.broadcast %cst_10 : f32 to vector<256x128xf32>
      %c0_11 = arith.constant 0 : index
      %c0_12 = arith.constant 0 : index
      %13 = vector.load %arg7[%c0_11, %c0_12] : memref<256x128xf32, #tpu.memory_space<vmem>>, vector<256x128xf32>
      tpu.vector_store %arg7[%c0_11, %c0_12], %12 {strides = array<i32>} : memref<256x128xf32, #tpu.memory_space<vmem>>, vector<256x128xf32>,
    } else {
    }
    %c0 = arith.constant 0 : index
    %c0_1 = arith.constant 0 : index
    %3 = vector.load %arg7[%c0, %c0_1] : memref<256x128xf32, #tpu.memory_space<vmem>>, vector<256x128xf32>
    %c0_2 = arith.constant 0 : index
    %c0_3 = arith.constant 0 : index
    %4 = vector.load %arg2[%c0_2, %c0_3] : memref<256x512xbf16, #tpu.memory_space<vmem>>, vector<256x512xbf16>
    %c0_4 = arith.constant 0 : index
    %c0_5 = arith.constant 0 : index
    %5 = vector.load %arg3[%c0_4, %c0_5] : memref<512x128xbf16, #tpu.memory_space<vmem>>, vector<512x128xbf16>
    %cst = arith.constant dense<0.000000e+00> : vector<256x128xf32>
    %6 = tpu.matmul %4, %5, %cst {dimension_numbers = #tpu.dot_dimension_numbers<[1], [0], [0], [1], [0, 0, 1, 1], [], []>} : vector<256x512xbf16>, vector<512x128xbf16>, vector<256x128xf32> -> vector<256x128xf32>
    %7 = arith.addf %3, %6 : vector<256x128xf32>
    %c0_6 = arith.constant 0 : index
    %c0_7 = arith.constant 0 : index
    %8 = vector.load %arg7[%c0_6, %c0_7] : memref<256x128xf32, #tpu.memory_space<vmem>>, vector<256x128xf32>
    tpu.vector_store %arg7[%c0_6, %c0_7], %7 {strides = array<i32>} : memref<256x128xf32, #tpu.memory_space<vmem>>, vector<256x128xf32>,
    %c0_i32_8 = arith.constant 0 : i32
    %9 = arith.cmpi eq, %arg1, %c0_i32_8 : i32
    %10 = arith.extui %9 : i1 to i32
    %c0_i32_9 = arith.constant 0 : i32
    %11 = arith.cmpi ne, %10, %c0_i32_9 : i32
    scf.if %11 {
      %c0_10 = arith.constant 0 : index
      %c0_11 = arith.constant 0 : index
      %12 = vector.load %arg7[%c0_10, %c0_11] : memref<256x128xf32, #tpu.memory_space<vmem>>, vector<256x128xf32>
      %c0_12 = arith.constant 0 : index
      %c0_13 = arith.constant 0 : index
      %13 = vector.load %arg5[%c0_12, %c0_13] : memref<256x1xf32, #tpu.memory_space<vmem>>, vector<256x1xf32>
      %14 = vector.broadcast %13 : vector<256x1xf32> to vector<256x128xf32>
      %15 = arith.mulf %12, %14 : vector<256x128xf32>
      %c0_14 = arith.constant 0 : index
      %c0_15 = arith.constant 0 : index
      %16 = vector.load %arg4[%c0_14, %c0_15] : memref<256x128xf32, #tpu.memory_space<vmem>>, vector<256x128xf32>
      %17 = arith.addf %15, %16 : vector<256x128xf32>
      %c0_16 = arith.constant 0 : index
      %c0_17 = arith.constant 0 : index
      %18 = vector.load %arg6[%c0_16, %c0_17] : memref<256x128xf32, #tpu.memory_space<vmem>>, vector<256x128xf32>
      tpu.vector_store %arg6[%c0_16, %c0_17], %17 {strides = array<i32>} : memref<256x128xf32, #tpu.memory_space<vmem>>, vector<256x128xf32>,
    } else {
    }
    return
  }
  func.func @transform_0(%arg0: i32, %arg1: i32) -> (i32, i32) {
    %c0_i32 = arith.constant 0 : i32
    return %arg0, %arg1 : i32, i32
  }
  func.func @transform_1(%arg0: i32, %arg1: i32) -> (i32, i32) {
    %c0_i32 = arith.constant 0 : i32
    %c0_i32_0 = arith.constant 0 : i32
    return %arg1, %c0_i32 : i32, i32
  }
  func.func @transform_2(%arg0: i32, %arg1: i32) -> (i32, i32) {
    %c0_i32 = arith.constant 0 : i32
    %c0_i32_0 = arith.constant 0 : i32
    return %arg0, %c0_i32 : i32, i32
  }
  func.func @transform_3(%arg0: i32, %arg1: i32) -> (i32, i32) {
    %c0_i32 = arith.constant 0 : i32
    %c0_i32_0 = arith.constant 0 : i32
    return %arg0, %c0_i32 : i32, i32
  }
  func.func @transform_4(%arg0: i32, %arg1: i32) -> (i32, i32) {
    %c0_i32 = arith.constant 0 : i32
    %c0_i32_0 = arith.constant 0 : i32
    return %arg0, %c0_i32 : i32, i32
  }
}

</mosaic_0001>

<bundles_post_ra>
// kernel: gnn_forward.3
= control target key start
LH: loop header
LB: loop body
LE: loop exit
PB: predicated region body
PF: predicated region fallthrough
CT: control target
= control target key end

     0   :  { %s2401_s15 = smov 0   ;;  %s2403_s16 = smov 0   ;;  %s2716_s0 = inlined_call_operand.vmem [shape: bf16[512,512], index: 0, kind: input, shape index: {}]   ;;  %s2717_s1 = inlined_call_operand.vmem [shape: bf16[512,128], index: 1, kind: input, shape index: {}]   ;;  %s2718_s2 = inlined_call_operand.vmem [shape: f32[512,128], index: 2, kind: input, shape index: {}]   ;;  %s2719_s3 = inlined_call_operand.vmem [shape: f32[512,1], index: 3, kind: input, shape index: {}]   ;;  %s2720_s4 = inlined_call_operand.vmem [shape: f32[512,128], index: 4, kind: output, shape index: {}]  }
   0x1   :  { %s2405_s17 = smov 0  }
   0x2 LB: > { %s26_s18 = sadd.s32 1, %s2369_s16  ;;  %p1863_p0 = scmp.ge.s32.totalorder %s2373_s17, 1  ;;  %s2373_s17 = sphi %s2405_s17, %s14_s17   ;;  %s2369_s16 = sphi %s2403_s16, %s2722_s16   ;;  %s2365_s15 = sphi %s2401_s15, %s2721_s15  }
   0x3   : > { %p28_p1 = scmp.ge.s32.totalorder %s26_s18, 2  ;;  %p216_p2 = scmp.lt.s32.totalorder %s2373_s17, 3 }
   0x5   : > { %s2724_s18 = smov (%p28_p1, %s26_s18), 0  ;;  %p217_p3 = pnand %p1863_p0, %p216_p2 }
   0x6   : > { %s1864_s29 = sshll.u32 (!%p217_p3), %s2365_s15, 5 }
   0x7   : > { %220 = sbr.rel (%p217_p3) target bundleno = 375 (0x177), region = 36  ;;  %p264_p4 = scmp.lt.s32.totalorder (!%p217_p3), %s1864_s29, 63 }
   0xc   : > { %v2223_v0 = vld [vmem:[%s2717_s1 + $0x78] sm:$0xff]   ;;  %v2375_v4 = vmov 0   ;;  %v2227_v5 = vld [vmem:[%s2717_s1 + $0x70] sm:$0xff]   ;;  %v2231_v9 = vld [vmem:[%s2717_s1 + $0x68] sm:$0xff]   ;;  %s2726_s29 = smov (!%p264_p4, %s1864_s29), 63 }
   0xd   : > { %v2224_v1 = vld [vmem:[%s2717_s1 + $0xf8] sm:$0xff]   ;;  %1972 = vmatprep.subr.bf16.mxu0 %v2223_v0  ;;  %2221 = vset.pattern.permute.xlu0 %v2375_v4  ;;  %v2228_v6 = vld [vmem:[%s2717_s1 + $0xf0] sm:$0xff]   ;;  %v2232_v10 = vld [vmem:[%s2717_s1 + $0xe8] sm:$0xff]   ;;  %s1971_s30 = sshll.u32 %s2726_s29, 4  ;;  %s2541_s21 = sshll.u32 %s2726_s29, 3 }
   0xe   : > { %v2225_v2 = vld [vmem:[%s2717_s1 + $0x38] sm:$0xff]   ;;  %2084 = vmatprep.subr.bf16.mxu1 %v2224_v1  ;;  %2222 = vset.pattern.permute.xlu1 %v2375_v4  ;;  %v2229_v7 = vld [vmem:[%s2717_s1 + $0x30] sm:$0xff]   ;;  %v2233_v11 = vld [vmem:[%s2717_s1 + $0x28] sm:$0xff]   ;;  %s2518_s12 = scalar_lea.vmem %s2716_s0, %s1971_s30  ;;  %s2548_s24 = scalar_lea.vmem %s2719_s3, %s2541_s21 }
   0xf   : > { %v2226_v3 = vld [vmem:[%s2717_s1 + $0xb8] sm:$0xff]   ;;  %1973 = vmatpush3.bf16.msra.mxu0 %v2225_v2  ;;  %v2230_v8 = vld [vmem:[%s2717_s1 + $0xb0] sm:$0xff]   ;;  %v2234_v12 = vld [vmem:[%s2717_s1 + $0xa8] sm:$0xff]   ;;  %s2635_s26 = scalar_lea.vmem %s2718_s2, %s2541_s21  ;;  %s2642_s30 = scalar_lea.vmem %s2720_s4, %s2541_s21 }
  0x10   : > { %2085 = vmatpush3.bf16.msra.mxu1 %v2226_v3  ;;  %1974 = vmatprep.subr.bf16.mxu0 %v2227_v5  ;;  %v2235_v13 = vld [vmem:[%s2717_s1 + $0x60] sm:$0xff]   ;;  %v2239_v17 = vld [vmem:[%s2717_s1 + $0x58] sm:$0xff]   ;;  %v2243_v21 = vld [vmem:[%s2717_s1 + $0x50] sm:$0xff]  }
  0x11   : > { %2086 = vmatprep.subr.bf16.mxu1 %v2228_v6  ;;  %v2236_v14 = vld [vmem:[%s2717_s1 + $0xe0] sm:$0xff]   ;;  %v2240_v18 = vld [vmem:[%s2717_s1 + $0xd8] sm:$0xff]   ;;  %v2244_v22 = vld [vmem:[%s2717_s1 + $0xd0] sm:$0xff]  }
  0x12   : > { %v2237_v15 = vld [vmem:[%s2717_s1 + $0x20] sm:$0xff]   ;;  %v2241_v19 = vld [vmem:[%s2717_s1 + $0x18] sm:$0xff]   ;;  %v2245_v23 = vld [vmem:[%s2717_s1 + $0x10] sm:$0xff]  }
  0x13   : > { %1975 = vmatpush3.bf16.msra.mxu0 %v2229_v7  ;;  %v2238_v16 = vld [vmem:[%s2717_s1 + $0xa0] sm:$0xff]   ;;  %v2242_v20 = vld [vmem:[%s2717_s1 + $0x98] sm:$0xff]   ;;  %v2246_v24 = vld [vmem:[%s2717_s1 + $0x90] sm:$0xff]  }
  0x14   : > { %2087 = vmatpush3.bf16.msra.mxu1 %v2230_v8  ;;  %1976 = vmatprep.subr.bf16.mxu0 %v2231_v9  ;;  %v2247_v25 = vld [vmem:[%s2717_s1 + $0x48] sm:$0xff]   ;;  %v2251_v29 = vld [vmem:[%s2717_s1 + $0x40] sm:$0xff]   ;;  %v1430_v52 = vld [vmem:[%s2548_s24 + $0x10] sm:$0xff] }
  0x15   : > { %2088 = vmatprep.subr.bf16.mxu1 %v2232_v10  ;;  %v2248_v26 = vld [vmem:[%s2717_s1 + $0xc8] sm:$0xff]   ;;  %v2252_v30 = vld [vmem:[%s2717_s1 + $0xc0] sm:$0xff]   ;;  %1472 = vperm.xlu1 %2222, %v1430_v52   ;;  %v1431_v54 = vld [vmem:[%s2548_s24 + $0x18] sm:$0xff] }
  0x16   : > { %v2249_v27 = vld [vmem:[%s2717_s1 + $0x8] sm:$0xff]   ;;  %v2253_v31 = vld [vmem:[%s2717_s1] sm:$0xff]   ;;  %v1434_v61 = vld [vmem:[%s2548_s24 + $0x30] sm:$0xff] }
  0x17   : > { %1977 = vmatpush3.bf16.msra.mxu0 %v2233_v11  ;;  %v2250_v28 = vld [vmem:[%s2717_s1 + $0x88] sm:$0xff]   ;;  %v2254_v32 = vld [vmem:[%s2717_s1 + $0x80] sm:$0xff]   ;;  %v1435_v62 = vld [vmem:[%s2548_s24 + $0x38] sm:$0xff] }
  0x18   : > { %2089 = vmatpush3.bf16.msra.mxu1 %v2234_v12  ;;  %1978 = vmatprep.subr.bf16.mxu0 %v2235_v13  ;;  %v2255_v33 = vld [vmem:[%s2518_s12] ss:$16 sps:$4 sm:$0xff]   ;;  %v2257_v34 = vld [vmem:[%s2518_s12 + $0x4] ss:$16 sps:$4 sm:$0xff]   ;;  %v2258_v35 = vld [vmem:[%s2518_s12 + $0x8] ss:$16 sps:$4 sm:$0xff]  }
  0x19   : > { %2090 = vmatprep.subr.bf16.mxu1 %v2236_v14  ;;  %v2260_v36 = vld [vmem:[%s2518_s12 + $0xc] ss:$16 sps:$4 sm:$0xff]   ;;  %1039 = vmatprep.mubr.bf16.mxu0 %v2257_v34  ;;  %v2261_v37 = vld [vmem:[%s2518_s12 + $0x24] ss:$16 sps:$4 sm:$0xff]   ;;  %v2265_v39 = vld [vmem:[%s2518_s12 + $0x20] ss:$16 sps:$4 sm:$0xff]  }
  0x1a   : > { %1200 = vmatprep.mubr.bf16.mxu1 %v2260_v36  ;;  %v2263_v38 = vld [vmem:[%s2518_s12 + $0x2c] ss:$16 sps:$4 sm:$0xff]   ;;  %v2266_v40 = vld [vmem:[%s2518_s12 + $0x28] ss:$16 sps:$4 sm:$0xff]   ;;  %v2267_v41 = vld [vmem:[%s2518_s12 + $0x44] ss:$16 sps:$4 sm:$0xff]   ;;  %1477 = vperm.xlu1 %2222, %v1431_v54  }
  0x1b   : > { %1979 = vmatpush3.bf16.msra.mxu0 %v2237_v15  ;;  %v2269_v42 = vld [vmem:[%s2518_s12 + $0x4c] ss:$16 sps:$4 sm:$0xff]   ;;  %v2271_v43 = vld [vmem:[%s2518_s12 + $0x40] ss:$16 sps:$4 sm:$0xff]   ;;  %v2272_v44 = vld [vmem:[%s2518_s12 + $0x48] ss:$16 sps:$4 sm:$0xff]  }
  0x1c   : > { %2091 = vmatpush3.bf16.msra.mxu1 %v2238_v16  ;;  %1980 = vmatprep.subr.bf16.mxu0 %v2239_v17  ;;  %v2273_v45 = vld [vmem:[%s2518_s12 + $0x64] ss:$16 sps:$4 sm:$0xff]   ;;  %v2275_v46 = vld [vmem:[%s2518_s12 + $0x6c] ss:$16 sps:$4 sm:$0xff]   ;;  %v2277_v47 = vld [vmem:[%s2518_s12 + $0x60] ss:$16 sps:$4 sm:$0xff]  }
  0x1d   : > { %2092 = vmatprep.subr.bf16.mxu1 %v2240_v18  ;;  %v2278_v48 = vld [vmem:[%s2518_s12 + $0x68] ss:$16 sps:$4 sm:$0xff]   ;;  %v2279_v49 = vld [vmem:[%s2518_s12 + $0x84] ss:$16 sps:$4 sm:$0xff]   ;;  %v2281_v50 = vld [vmem:[%s2518_s12 + $0x8c] ss:$16 sps:$4 sm:$0xff]  }
  0x1e   : > { %v1428_v51 = vld [vmem:[%s2548_s24] sm:$0xff]  ;;  %v1429_v53 = vld [vmem:[%s2548_s24 + $0x8] sm:$0xff]  ;;  %v1438_v5 = vld [vmem:[%s2548_s24 + $0x50] sm:$0xff] }
  0x1f   : > { %1981 = vmatpush3.bf16.msra.mxu0 %v2241_v19  ;;  %1462 = vperm.xlu0 %2221, %v1428_v51   ;;  %v2283_v55 = vld [vmem:[%s2518_s12 + $0x80] ss:$16 sps:$4 sm:$0xff]   ;;  %v2284_v57 = vld [vmem:[%s2518_s12 + $0x88] ss:$16 sps:$4 sm:$0xff]   ;;  %v2285_v58 = vld [vmem:[%s2518_s12 + $0xa4] ss:$16 sps:$4 sm:$0xff]  }
  0x20   : > { %2093 = vmatpush3.bf16.msra.mxu1 %v2242_v20  ;;  %1982 = vmatprep.subr.bf16.mxu0 %v2243_v21  ;;  %v1432_v56 = vld [vmem:[%s2548_s24 + $0x20] sm:$0xff]  ;;  %v1433_v59 = vld [vmem:[%s2548_s24 + $0x28] sm:$0xff]  ;;  %v1439_v6 = vld [vmem:[%s2548_s24 + $0x58] sm:$0xff] }
  0x21   : > { %2094 = vmatprep.subr.bf16.mxu1 %v2244_v22  ;;  %v2287_v60 = vld [vmem:[%s2518_s12 + $0xac] ss:$16 sps:$4 sm:$0xff]   ;;  %1487 = vperm.xlu1 %2222, %v1433_v59   ;;  %v2289_v63 = vld [vmem:[%s2518_s12 + $0xa0] ss:$16 sps:$4 sm:$0xff]   ;;  %v2290_v1 = vld [vmem:[%s2518_s12 + $0xa8] ss:$16 sps:$4 sm:$0xff]  }
  0x22   : > { %v1436_v0 = vld [vmem:[%s2548_s24 + $0x40] sm:$0xff]  ;;  %v1437_v3 = vld [vmem:[%s2548_s24 + $0x48] sm:$0xff]  ;;  %v1442_v13 = vld [vmem:[%s2548_s24 + $0x70] sm:$0xff] }
  0x23   : > { %1983 = vmatpush3.bf16.msra.mxu0 %v2245_v23  ;;  %1467 = vperm.xlu0 %2221, %v1429_v53   ;;  %v2291_v2 = vld [vmem:[%s2518_s12 + $0xc4] ss:$16 sps:$4 sm:$0xff]   ;;  %v2293_v4 = vld [vmem:[%s2518_s12 + $0xcc] ss:$16 sps:$4 sm:$0xff]   ;;  %v2295_v7 = vld [vmem:[%s2518_s12 + $0xc0] ss:$16 sps:$4 sm:$0xff]  }
  0x24   : > { %2095 = vmatpush3.bf16.msra.mxu1 %v2246_v24  ;;  %1984 = vmatprep.subr.bf16.mxu0 %v2247_v25  ;;  %v1440_v8 = vld [vmem:[%s2548_s24 + $0x60] sm:$0xff]  ;;  %v2296_v9 = vld [vmem:[%s2518_s12 + $0xc8] ss:$16 sps:$4 sm:$0xff]   ;;  %v2299_v12 = vld [vmem:[%s2518_s12 + $0xec] ss:$16 sps:$4 sm:$0xff]  }
  0x25   : > { %2096 = vmatprep.subr.bf16.mxu1 %v2248_v26  ;;  %1497 = vperm.xlu1 %2222, %v1435_v62   ;;  %v2297_v10 = vld [vmem:[%s2518_s12 + $0xe4] ss:$16 sps:$4 sm:$0xff]   ;;  %v1441_v11 = vld [vmem:[%s2548_s24 + $0x68] sm:$0xff]  ;;  %v1443_v14 = vld [vmem:[%s2548_s24 + $0x78] sm:$0xff] }
  0x26   : > { %v2301_v15 = vld [vmem:[%s2518_s12 + $0xe0] ss:$16 sps:$4 sm:$0xff]   ;;  %v2302_v17 = vld [vmem:[%s2518_s12 + $0xe8] ss:$16 sps:$4 sm:$0xff]   ;;  %v2303_v18 = vld [vmem:[%s2518_s12 + $0x104] ss:$16 sps:$4 sm:$0xff]  }
  0x27   : > { %1985 = vmatpush3.bf16.msra.mxu0 %v2249_v27  ;;  %1482 = vperm.xlu0 %2221, %v1432_v56   ;;  %v1444_v16 = vld [vmem:[%s2548_s24 + $0x80] sm:$0xff]  ;;  %v1445_v19 = vld [vmem:[%s2548_s24 + $0x88] sm:$0xff]  ;;  %v1446_v21 = vld [vmem:[%s2548_s24 + $0x90] sm:$0xff] }
  0x28   : > { %2097 = vmatpush3.bf16.msra.mxu1 %v2250_v28  ;;  %1986 = vmatprep.subr.bf16.mxu0 %v2251_v29  ;;  %v2305_v20 = vld [vmem:[%s2518_s12 + $0x10c] ss:$16 sps:$4 sm:$0xff]   ;;  %v2307_v23 = vld [vmem:[%s2518_s12 + $0x100] ss:$16 sps:$4 sm:$0xff]   ;;  %v2308_v25 = vld [vmem:[%s2518_s12 + $0x108] ss:$16 sps:$4 sm:$0xff]  }
  0x29   : > { %2098 = vmatprep.subr.bf16.mxu1 %v2252_v30  ;;  %1507 = vperm.xlu1 %2222, %v1437_v3   ;;  %v1447_v22 = vld [vmem:[%s2548_s24 + $0x98] sm:$0xff]  ;;  %v1448_v24 = vld [vmem:[%s2548_s24 + $0xa0] sm:$0xff]  ;;  %v1449_v27 = vld [vmem:[%s2548_s24 + $0xa8] sm:$0xff] }
  0x2a   : > { %v2309_v26 = vld [vmem:[%s2518_s12 + $0x124] ss:$16 sps:$4 sm:$0xff]   ;;  %v2311_v28 = vld [vmem:[%s2518_s12 + $0x12c] ss:$16 sps:$4 sm:$0xff]   ;;  %v2331_v51 = vld [vmem:[%s2518_s12 + $0x180] ss:$16 sps:$4 sm:$0xff]  }
  0x2b   : > { %1987 = vmatpush3.bf16.msra.mxu0 %v2253_v31  ;;  %1492 = vperm.xlu0 %2221, %v1434_v61   ;;  %v1450_v29 = vld [vmem:[%s2548_s24 + $0xb0] sm:$0xff]  ;;  %v1451_v30 = vld [vmem:[%s2548_s24 + $0xb8] sm:$0xff] }
  0x2c   : > { %2099 = vmatpush3.bf16.msra.mxu1 %v2254_v32  ;;  %v2313_v31 = vld [vmem:[%s2518_s12 + $0x120] ss:$16 sps:$4 sm:$0xff]   ;;  %v2315_v34 = vld [vmem:[%s2518_s12 + $0x144] ss:$16 sps:$4 sm:$0xff]   ;;  %v2317_v36 = vld [vmem:[%s2518_s12 + $0x14c] ss:$16 sps:$4 sm:$0xff]  }
  0x2d   : > { %1517 = vperm.xlu1 %2222, %v1439_v6   ;;  %v1452_v32 = vld [vmem:[%s2548_s24 + $0xc0] sm:$0xff]  ;;  %v2332_v52 = vld [vmem:[%s2518_s12 + $0x188] ss:$16 sps:$4 sm:$0xff]   ;;  %v2335_v54 = vld [vmem:[%s2518_s12 + $0x1ac] ss:$16 sps:$4 sm:$0xff]  }
  0x2e   : > { %1040 = vmatmul.mubr.bf16.vlgmr.msra.gmra.mxu0 %v2255_v33  ;;  %v2314_v33 = vld [vmem:[%s2518_s12 + $0x128] ss:$16 sps:$4 sm:$0xff]   ;;  %v2333_v53 = vld [vmem:[%s2518_s12 + $0x1a4] ss:$16 sps:$4 sm:$0xff]   ;;  %v2343_v59 = vld [vmem:[%s2518_s12 + $0x1c0] ss:$16 sps:$4 sm:$0xff]  }
  0x2f   : > { %1201 = vmatmul.mubr.bf16.vlgmr.msra.gmra.mxu1 %v2258_v35  ;;  %1047 = vmatprep.mubr.bf16.mxu0 %v2261_v37  ;;  %v1453_v35 = vld [vmem:[%s2548_s24 + $0xc8] sm:$0xff]  ;;  %v1454_v37 = vld [vmem:[%s2548_s24 + $0xd0] sm:$0xff] }
  0x30   : > { %1208 = vmatprep.mubr.bf16.mxu1 %v2263_v38  ;;  %1502 = vperm.xlu0 %2221, %v1436_v0   ;;  %v1455_v38 = vld [vmem:[%s2548_s24 + $0xd8] sm:$0xff]  ;;  %v2345_v61 = vld [vmem:[%s2518_s12 + $0x1e4] ss:$16 sps:$4 sm:$0xff]  }
  0x31   : > { %1527 = vperm.xlu1 %2222, %v1441_v11   ;;  %v2338_v56 = vld [vmem:[%s2518_s12 + $0x1a8] ss:$16 sps:$4 sm:$0xff]   ;;  %v2347_v62 = vld [vmem:[%s2518_s12 + $0x1ec] ss:$16 sps:$4 sm:$0xff]  }
  0x32   : > { %v2350_v0 = vld [vmem:[%s2518_s12 + $0x1e8] ss:$16 sps:$4 sm:$0xff]  }
  0x34   : > { %1512 = vperm.xlu0 %2221, %v1438_v5  }
  0x35   : > { %1537 = vperm.xlu1 %2222, %v1443_v14  }
  0x36   : > { %1048 = vmatmul.mubr.bf16.gmra.mxu0 %v2265_v39  ;;  %v2319_v39 = vld [vmem:[%s2518_s12 + $0x140] ss:$16 sps:$4 sm:$0xff]  }
  0x37   : > { %1209 = vmatmul.mubr.bf16.gmra.mxu1 %v2266_v40  ;;  %1055 = vmatprep.mubr.bf16.mxu0 %v2267_v41  ;;  %v1456_v40 = vld [vmem:[%s2548_s24 + $0xe0] sm:$0xff]  ;;  %v2320_v41 = vld [vmem:[%s2518_s12 + $0x148] ss:$16 sps:$4 sm:$0xff]  }
  0x38   : > { %1216 = vmatprep.mubr.bf16.mxu1 %v2269_v42  ;;  %1522 = vperm.xlu0 %2221, %v1440_v8   ;;  %v2321_v42 = vld [vmem:[%s2518_s12 + $0x164] ss:$16 sps:$4 sm:$0xff]  }
  0x39   : > { %1547 = vperm.xlu1 %2222, %v1445_v19  }
  0x3c   : > { %1532 = vperm.xlu0 %2221, %v1442_v13  }
  0x3d   : > { %1557 = vperm.xlu1 %2222, %v1447_v22  }
  0x3e   : > { %1056 = vmatmul.mubr.bf16.gmra.mxu0 %v2271_v43  ;;  %v1457_v43 = vld [vmem:[%s2548_s24 + $0xe8] sm:$0xff] }
  0x3f   : > { %1217 = vmatmul.mubr.bf16.gmra.mxu1 %v2272_v44  ;;  %1063 = vmatprep.mubr.bf16.mxu0 %v2273_v45  ;;  %v2323_v44 = vld [vmem:[%s2518_s12 + $0x16c] ss:$16 sps:$4 sm:$0xff]   ;;  %v1458_v45 = vld [vmem:[%s2548_s24 + $0xf0] sm:$0xff] }
  0x40   : > { %1224 = vmatprep.mubr.bf16.mxu1 %v2275_v46  ;;  %1542 = vperm.xlu0 %2221, %v1444_v16   ;;  %v1459_v46 = vld [vmem:[%s2548_s24 + $0xf8] sm:$0xff] }
  0x41   : > { %1567 = vperm.xlu1 %2222, %v1449_v27  }
  0x44   : > { %1552 = vperm.xlu0 %2221, %v1446_v21  }
  0x45   : > { %1577 = vperm.xlu1 %2222, %v1451_v30  }
  0x46   : > { %1064 = vmatmul.mubr.bf16.gmra.mxu0 %v2277_v47  ;;  %v2325_v47 = vld [vmem:[%s2518_s12 + $0x160] ss:$16 sps:$4 sm:$0xff]  }
  0x47   : > { %1225 = vmatmul.mubr.bf16.gmra.mxu1 %v2278_v48  ;;  %1071 = vmatprep.mubr.bf16.mxu0 %v2279_v49  ;;  %v2326_v48 = vld [vmem:[%s2518_s12 + $0x168] ss:$16 sps:$4 sm:$0xff]   ;;  %v2327_v49 = vld [vmem:[%s2518_s12 + $0x184] ss:$16 sps:$4 sm:$0xff]  }
  0x48   : > { %1232 = vmatprep.mubr.bf16.mxu1 %v2281_v50  ;;  %1562 = vperm.xlu0 %2221, %v1448_v24   ;;  %v2329_v50 = vld [vmem:[%s2518_s12 + $0x18c] ss:$16 sps:$4 sm:$0xff]  }
  0x49   : > { %1587 = vperm.xlu1 %2222, %v1453_v35  }
  0x4c   : > { %1572 = vperm.xlu0 %2221, %v1450_v29  }
  0x4d   : > { %1597 = vperm.xlu1 %2222, %v1455_v38  }
  0x4e   : > { %1072 = vmatmul.mubr.bf16.gmra.mxu0 %v2283_v55  ;;  %v2337_v55 = vld [vmem:[%s2518_s12 + $0x1a0] ss:$16 sps:$4 sm:$0xff]  }
  0x4f   : > { %1233 = vmatmul.mubr.bf16.gmra.mxu1 %v2284_v57  ;;  %1079 = vmatprep.mubr.bf16.mxu0 %v2285_v58  ;;  %v2339_v57 = vld [vmem:[%s2518_s12 + $0x1c4] ss:$16 sps:$4 sm:$0xff]   ;;  %v2341_v58 = vld [vmem:[%s2518_s12 + $0x1cc] ss:$16 sps:$4 sm:$0xff]  }
  0x50   : > { %1240 = vmatprep.mubr.bf16.mxu1 %v2287_v60  ;;  %1582 = vperm.xlu0 %2221, %v1452_v32   ;;  %v2344_v60 = vld [vmem:[%s2518_s12 + $0x1c8] ss:$16 sps:$4 sm:$0xff]  }
  0x51   : > { %1607 = vperm.xlu1 %2222, %v1457_v43  }
  0x54   : > { %1592 = vperm.xlu0 %2221, %v1454_v37  }
  0x55   : > { %1617 = vperm.xlu1 %2222, %v1459_v46  }
  0x56   : > { %1080 = vmatmul.mubr.bf16.gmra.mxu0 %v2289_v63  ;;  %v2349_v63 = vld [vmem:[%s2518_s12 + $0x1e0] ss:$16 sps:$4 sm:$0xff]  }
  0x57   : > { %1241 = vmatmul.mubr.bf16.gmra.mxu1 %v2290_v1  ;;  %1087 = vmatprep.mubr.bf16.mxu0 %v2291_v2 }
  0x58   : > { %1248 = vmatprep.mubr.bf16.mxu1 %v2293_v4  ;;  %1602 = vperm.xlu0 %2221, %v1456_v40  }
  0x5c   : > { %1612 = vperm.xlu0 %2221, %v1458_v45   ;;  %v1655_v45 = vld [vmem:[%s2635_s26 + $0x18] sm:$0xff] }
  0x5e   : > { %1088 = vmatmul.mubr.bf16.gmra.mxu0 %v2295_v7 }
  0x5f   : > { %1249 = vmatmul.mubr.bf16.gmra.mxu1 %v2296_v9  ;;  %1095 = vmatprep.mubr.bf16.mxu0 %v2297_v10 }
  0x60   : > { %1256 = vmatprep.mubr.bf16.mxu1 %v2299_v12  ;;  %v1652_v12 = vld [vmem:[%s2635_s26] sm:$0xff] }
  0x66   : > { %1096 = vmatmul.mubr.bf16.gmra.mxu0 %v2301_v15 }
  0x67   : > { %1257 = vmatmul.mubr.bf16.gmra.mxu1 %v2302_v17  ;;  %1103 = vmatprep.mubr.bf16.mxu0 %v2303_v18 }
  0x68   : > { %1264 = vmatprep.mubr.bf16.mxu1 %v2305_v20 }
  0x6e   : > { %1104 = vmatmul.mubr.bf16.gmra.mxu0 %v2307_v23  ;;  %v1653_v23 = vld [vmem:[%s2635_s26 + $0x8] sm:$0xff] }
  0x6f   : > { %1265 = vmatmul.mubr.bf16.gmra.mxu1 %v2308_v25  ;;  %1111 = vmatprep.mubr.bf16.mxu0 %v2309_v26 }
  0x70   : > { %1272 = vmatprep.mubr.bf16.mxu1 %v2311_v28 }
  0x76   : > { %1112 = vmatmul.mubr.bf16.gmra.mxu0 %v2313_v31 }
  0x77   : > { %1273 = vmatmul.mubr.bf16.gmra.mxu1 %v2314_v33  ;;  %1119 = vmatprep.mubr.bf16.mxu0 %v2315_v34  ;;  %v1654_v34 = vld [vmem:[%s2635_s26 + $0x10] sm:$0xff] }
  0x78   : > { %1280 = vmatprep.mubr.bf16.mxu1 %v2317_v36 }
  0x7e   : > { %1120 = vmatmul.mubr.bf16.gmra.mxu0 %v2319_v39 }
  0x7f   : > { %1281 = vmatmul.mubr.bf16.gmra.mxu1 %v2320_v41  ;;  %1127 = vmatprep.mubr.bf16.mxu0 %v2321_v42 }
  0x80   : > { %1288 = vmatprep.mubr.bf16.mxu1 %v2323_v44 }
  0x86   : > { %1128 = vmatmul.mubr.bf16.gmra.mxu0 %v2325_v47 }
  0x87   : > { %1289 = vmatmul.mubr.bf16.gmra.mxu1 %v2326_v48  ;;  %1135 = vmatprep.mubr.bf16.mxu0 %v2327_v49 }
  0x88   : > { %1296 = vmatprep.mubr.bf16.mxu1 %v2329_v50 }
  0x8e   : > { %1136 = vmatmul.mubr.bf16.gmra.mxu0 %v2331_v51 }
  0x8f   : > { %1297 = vmatmul.mubr.bf16.gmra.mxu1 %v2332_v52  ;;  %1143 = vmatprep.mubr.bf16.mxu0 %v2333_v53 }
  0x90   : > { %1304 = vmatprep.mubr.bf16.mxu1 %v2335_v54  ;;  %v1473_v29 = vpop.permute.xlu1 %1472 }
  0x95   : > { %v1478_v44 = vpop.permute.xlu1 %1477 }
  0x96   : > { %1144 = vmatmul.mubr.bf16.gmra.mxu0 %v2337_v55 }
  0x97   : > { %1305 = vmatmul.mubr.bf16.gmra.mxu1 %v2338_v56  ;;  %1151 = vmatprep.mubr.bf16.mxu0 %v2339_v57  ;;  %v1656_v56 = vld [vmem:[%s2635_s26 + $0x20] sm:$0xff] }
  0x98   : > { %1312 = vmatprep.mubr.bf16.mxu1 %v2341_v58 }
  0x9a   : > { %v1463_v6 = vpop.permute.xlu0 %1462 }
  0x9e   : > { %1152 = vmatmul.mubr.bf16.gmra.mxu0 %v2343_v59  ;;  %v1468_v19 = vpop.permute.xlu0 %1467 }
  0x9f   : > { %1313 = vmatmul.mubr.bf16.gmra.mxu1 %v2344_v60  ;;  %1159 = vmatprep.mubr.bf16.mxu0 %v2345_v61 }
  0xa0   : > { %1320 = vmatprep.mubr.bf16.mxu1 %v2347_v62 }
  0xa2   : > { %v1483_v55 = vpop.permute.xlu0 %1482 }
  0xa6   : > { %1160 = vmatmul.mubr.bf16.gmra.mxu0 %v2349_v63 }
  0xa7   : > { %1321 = vmatmul.mubr.bf16.gmra.mxu1 %v2350_v0 }
  0xee   : > { %v1988_v1 = vpop.f32.mrf.mxu0 }
  0xef   : > { %v2100_v2 = vpop.f32.mrf.mxu1 }
  0xf0   : > { %v1989_v3 = vpop.f32.mrf.mxu0 }
  0xf1   : > { %v1990_v4 = vadd.f32 %v1989_v3, %v1988_v1  ;;  %v2101_v5 = vpop.f32.mrf.mxu1  ;;  %v1657_v3 = vld [vmem:[%s2635_s26 + $0x28] sm:$0xff] }
  0xf2   : > { %v2102_v7 = vadd.f32 %v2101_v5, %v2100_v2  ;;  %v1991_v8 = vpop.f32.mrf.mxu0  ;;  %v1488_v2 = vpop.permute.xlu1 %1487 }
  0xf3   : > { %v2103_v9 = vpop.f32.mrf.mxu1 }
  0xf4   : > { %v1203_v10 = vadd.f32 %v2102_v7, %v1990_v4  ;;  %v1992_v11 = vpop.f32.mrf.mxu0 }
  0xf5   : > { %v1993_v13 = vadd.f32 %v1992_v11, %v1991_v8  ;;  %v2104_v14 = vpop.f32.mrf.mxu1 }
  0xf6   : > { %v1620_v15 = vmul.f32 %v1463_v6, %v1203_v10  ;;  %v2105_v16 = vadd.f32 %v2104_v14, %v2103_v9  ;;  %v1994_v17 = vpop.f32.mrf.mxu0  ;;  %v1658_v14 = vld [vmem:[%s2635_s26 + $0x30] sm:$0xff] }
  0xf7   : > { %v2106_v18 = vpop.f32.mrf.mxu1 }
  0xf8   : > { %v1684_v20 = vadd.f32 %v1652_v12, %v1620_v15  ;;  %v1206_v21 = vadd.f32 %v2105_v16, %v1993_v13  ;;  %v1995_v22 = vpop.f32.mrf.mxu0  ;;  %v1493_v13 = vpop.permute.xlu0 %1492 }
  0xf9   : > { %v1996_v24 = vadd.f32 %v1995_v22, %v1994_v17  ;;  %v2107_v25 = vpop.f32.mrf.mxu1 }
  0xfa   : > { %1716 = vst [vmem:[%s2642_s30] sm:$0xff] %v1684_v20  ;;  %v1621_v26 = vmul.f32 %v1468_v19, %v1206_v21  ;;  %v2108_v27 = vadd.f32 %v2107_v25, %v2106_v18  ;;  %v1997_v28 = vpop.f32.mrf.mxu0  ;;  %v1659_v25 = vld [vmem:[%s2635_s26 + $0x38] sm:$0xff] }
  0xfb   : > { %v2109_v30 = vpop.f32.mrf.mxu1 }
  0xfc   : > { %v1685_v31 = vadd.f32 %v1653_v23, %v1621_v26  ;;  %v1211_v32 = vadd.f32 %v2108_v27, %v1996_v24  ;;  %v1998_v33 = vpop.f32.mrf.mxu0  ;;  %v1498_v24 = vpop.permute.xlu1 %1497 }
  0xfd   : > { %v1999_v35 = vadd.f32 %v1998_v33, %v1997_v28  ;;  %v2110_v36 = vpop.f32.mrf.mxu1 }
  0xfe   : > { %1717 = vst [vmem:[%s2642_s30 + $0x8] sm:$0xff] %v1685_v31  ;;  %v1622_v37 = vmul.f32 %v1473_v29, %v1211_v32  ;;  %v2111_v38 = vadd.f32 %v2110_v36, %v2109_v30  ;;  %v2000_v39 = vpop.f32.mrf.mxu0  ;;  %v1660_v36 = vld [vmem:[%s2635_s26 + $0x40] sm:$0xff] }
  0xff   : > { %v2112_v40 = vpop.f32.mrf.mxu1 }
 0x100   : > { %v1686_v41 = vadd.f32 %v1654_v34, %v1622_v37  ;;  %v1214_v42 = vadd.f32 %v2111_v38, %v1999_v35  ;;  %v2001_v43 = vpop.f32.mrf.mxu0  ;;  %v1503_v35 = vpop.permute.xlu0 %1502 }
 0x101   : > { %v2002_v46 = vadd.f32 %v2001_v43, %v2000_v39  ;;  %v2113_v47 = vpop.f32.mrf.mxu1 }
 0x102   : > { %1718 = vst [vmem:[%s2642_s30 + $0x10] sm:$0xff] %v1686_v41  ;;  %v1623_v48 = vmul.f32 %v1478_v44, %v1214_v42  ;;  %v2114_v49 = vadd.f32 %v2113_v47, %v2112_v40  ;;  %v2003_v50 = vpop.f32.mrf.mxu0  ;;  %v1661_v47 = vld [vmem:[%s2635_s26 + $0x48] sm:$0xff] }
 0x103   : > { %v2115_v51 = vpop.f32.mrf.mxu1 }
 0x104   : > { %v1687_v52 = vadd.f32 %v1655_v45, %v1623_v48  ;;  %v1219_v53 = vadd.f32 %v2114_v49, %v2002_v46  ;;  %v2004_v54 = vpop.f32.mrf.mxu0  ;;  %v1508_v46 = vpop.permute.xlu1 %1507 }
 0x105   : > { %v2005_v57 = vadd.f32 %v2004_v54, %v2003_v50  ;;  %v2116_v58 = vpop.f32.mrf.mxu1 }
 0x106   : > { %1719 = vst [vmem:[%s2642_s30 + $0x18] sm:$0xff] %v1687_v52  ;;  %v1624_v59 = vmul.f32 %v1483_v55, %v1219_v53  ;;  %v2117_v60 = vadd.f32 %v2116_v58, %v2115_v51  ;;  %v2006_v61 = vpop.f32.mrf.mxu0  ;;  %v1662_v58 = vld [vmem:[%s2635_s26 + $0x50] sm:$0xff] }
 0x107   : > { %v2118_v62 = vpop.f32.mrf.mxu1 }
 0x108   : > { %v1688_v63 = vadd.f32 %v1656_v56, %v1624_v59  ;;  %v1222_v0 = vadd.f32 %v2117_v60, %v2005_v57  ;;  %v2007_v1 = vpop.f32.mrf.mxu0  ;;  %v1513_v57 = vpop.permute.xlu0 %1512 }
 0x109   : > { %v2008_v4 = vadd.f32 %v2007_v1, %v2006_v61  ;;  %v2119_v5 = vpop.f32.mrf.mxu1 }
 0x10a   : > { %1720 = vst [vmem:[%s2642_s30 + $0x20] sm:$0xff] %v1688_v63  ;;  %v1625_v6 = vmul.f32 %v1488_v2, %v1222_v0  ;;  %v2120_v7 = vadd.f32 %v2119_v5, %v2118_v62  ;;  %v2009_v8 = vpop.f32.mrf.mxu0  ;;  %v1663_v5 = vld [vmem:[%s2635_s26 + $0x58] sm:$0xff] }
 0x10b   : > { %v2121_v9 = vpop.f32.mrf.mxu1 }
 0x10c   : > { %v1689_v10 = vadd.f32 %v1657_v3, %v1625_v6  ;;  %v1227_v11 = vadd.f32 %v2120_v7, %v2008_v4  ;;  %v2010_v12 = vpop.f32.mrf.mxu0  ;;  %v1518_v4 = vpop.permute.xlu1 %1517 }
 0x10d   : > { %v2011_v15 = vadd.f32 %v2010_v12, %v2009_v8  ;;  %v2122_v16 = vpop.f32.mrf.mxu1 }
 0x10e   : > { %1721 = vst [vmem:[%s2642_s30 + $0x28] sm:$0xff] %v1689_v10  ;;  %v1626_v17 = vmul.f32 %v1493_v13, %v1227_v11  ;;  %v2123_v18 = vadd.f32 %v2122_v16, %v2121_v9  ;;  %v2012_v19 = vpop.f32.mrf.mxu0  ;;  %v1664_v16 = vld [vmem:[%s2635_s26 + $0x60] sm:$0xff] }
 0x10f   : > { %v2124_v20 = vpop.f32.mrf.mxu1 }
 0x110   : > { %v1690_v21 = vadd.f32 %v1658_v14, %v1626_v17  ;;  %v1230_v22 = vadd.f32 %v2123_v18, %v2011_v15  ;;  %v2013_v23 = vpop.f32.mrf.mxu0  ;;  %v1523_v15 = vpop.permute.xlu0 %1522 }
 0x111   : > { %v2014_v26 = vadd.f32 %v2013_v23, %v2012_v19  ;;  %v2125_v27 = vpop.f32.mrf.mxu1 }
 0x112   : > { %1722 = vst [vmem:[%s2642_s30 + $0x30] sm:$0xff] %v1690_v21  ;;  %v1627_v28 = vmul.f32 %v1498_v24, %v1230_v22  ;;  %v2126_v29 = vadd.f32 %v2125_v27, %v2124_v20  ;;  %v2015_v30 = vpop.f32.mrf.mxu0  ;;  %v1665_v27 = vld [vmem:[%s2635_s26 + $0x68] sm:$0xff] }
 0x113   : > { %v2127_v31 = vpop.f32.mrf.mxu1 }
 0x114   : > { %v1691_v32 = vadd.f32 %v1659_v25, %v1627_v28  ;;  %v1235_v33 = vadd.f32 %v2126_v29, %v2014_v26  ;;  %v2016_v34 = vpop.f32.mrf.mxu0  ;;  %v1528_v26 = vpop.permute.xlu1 %1527 }
 0x115   : > { %v2017_v37 = vadd.f32 %v2016_v34, %v2015_v30  ;;  %v2128_v38 = vpop.f32.mrf.mxu1 }
 0x116   : > { %1723 = vst [vmem:[%s2642_s30 + $0x38] sm:$0xff] %v1691_v32  ;;  %v1628_v39 = vmul.f32 %v1503_v35, %v1235_v33  ;;  %v2129_v40 = vadd.f32 %v2128_v38, %v2127_v31  ;;  %v2018_v41 = vpop.f32.mrf.mxu0  ;;  %v1666_v38 = vld [vmem:[%s2635_s26 + $0x70] sm:$0xff] }
 0x117   : > { %v2130_v42 = vpop.f32.mrf.mxu1 }
 0x118   : > { %v1692_v43 = vadd.f32 %v1660_v36, %v1628_v39  ;;  %v1238_v44 = vadd.f32 %v2129_v40, %v2017_v37  ;;  %v2019_v45 = vpop.f32.mrf.mxu0  ;;  %v1533_v37 = vpop.permute.xlu0 %1532 }
 0x119   : > { %v2020_v48 = vadd.f32 %v2019_v45, %v2018_v41  ;;  %v2131_v49 = vpop.f32.mrf.mxu1 }
 0x11a   : > { %1724 = vst [vmem:[%s2642_s30 + $0x40] sm:$0xff] %v1692_v43  ;;  %v1629_v50 = vmul.f32 %v1508_v46, %v1238_v44  ;;  %v2132_v51 = vadd.f32 %v2131_v49, %v2130_v42  ;;  %v2021_v52 = vpop.f32.mrf.mxu0  ;;  %v1667_v49 = vld [vmem:[%s2635_s26 + $0x78] sm:$0xff] }
 0x11b   : > { %v2133_v53 = vpop.f32.mrf.mxu1 }
 0x11c   : > { %v1693_v54 = vadd.f32 %v1661_v47, %v1629_v50  ;;  %v1243_v55 = vadd.f32 %v2132_v51, %v2020_v48  ;;  %v2022_v56 = vpop.f32.mrf.mxu0  ;;  %v1538_v48 = vpop.permute.xlu1 %1537 }
 0x11d   : > { %v2023_v59 = vadd.f32 %v2022_v56, %v2021_v52  ;;  %v2134_v60 = vpop.f32.mrf.mxu1 }
 0x11e   : > { %1725 = vst [vmem:[%s2642_s30 + $0x48] sm:$0xff] %v1693_v54  ;;  %v1630_v61 = vmul.f32 %v1513_v57, %v1243_v55  ;;  %v2135_v62 = vadd.f32 %v2134_v60, %v2133_v53  ;;  %v2024_v63 = vpop.f32.mrf.mxu0  ;;  %v1668_v60 = vld [vmem:[%s2635_s26 + $0x80] sm:$0xff] }
 0x11f   : > { %v2136_v0 = vpop.f32.mrf.mxu1 }
 0x120   : > { %v1694_v1 = vadd.f32 %v1662_v58, %v1630_v61  ;;  %v1246_v2 = vadd.f32 %v2135_v62, %v2023_v59  ;;  %v2025_v3 = vpop.f32.mrf.mxu0  ;;  %v1543_v59 = vpop.permute.xlu0 %1542 }
 0x121   : > { %v2026_v6 = vadd.f32 %v2025_v3, %v2024_v63  ;;  %v2137_v7 = vpop.f32.mrf.mxu1 }
 0x122   : > { %1726 = vst [vmem:[%s2642_s30 + $0x50] sm:$0xff] %v1694_v1  ;;  %v1631_v8 = vmul.f32 %v1518_v4, %v1246_v2  ;;  %v2138_v9 = vadd.f32 %v2137_v7, %v2136_v0  ;;  %v2027_v10 = vpop.f32.mrf.mxu0  ;;  %v1669_v7 = vld [vmem:[%s2635_s26 + $0x88] sm:$0xff] }
 0x123   : > { %v2139_v11 = vpop.f32.mrf.mxu1 }
 0x124   : > { %v1695_v12 = vadd.f32 %v1663_v5, %v1631_v8  ;;  %v1251_v13 = vadd.f32 %v2138_v9, %v2026_v6  ;;  %v2028_v14 = vpop.f32.mrf.mxu0  ;;  %v1548_v6 = vpop.permute.xlu1 %1547 }
 0x125   : > { %v2029_v17 = vadd.f32 %v2028_v14, %v2027_v10  ;;  %v2140_v18 = vpop.f32.mrf.mxu1 }
 0x126   : > { %1727 = vst [vmem:[%s2642_s30 + $0x58] sm:$0xff] %v1695_v12  ;;  %v1632_v19 = vmul.f32 %v1523_v15, %v1251_v13  ;;  %v2141_v20 = vadd.f32 %v2140_v18, %v2139_v11  ;;  %v2030_v21 = vpop.f32.mrf.mxu0  ;;  %v1670_v18 = vld [vmem:[%s2635_s26 + $0x90] sm:$0xff] }
 0x127   : > { %v2142_v22 = vpop.f32.mrf.mxu1 }
 0x128   : > { %v1696_v23 = vadd.f32 %v1664_v16, %v1632_v19  ;;  %v1254_v24 = vadd.f32 %v2141_v20, %v2029_v17  ;;  %v2031_v25 = vpop.f32.mrf.mxu0  ;;  %v1553_v17 = vpop.permute.xlu0 %1552 }
 0x129   : > { %v2032_v28 = vadd.f32 %v2031_v25, %v2030_v21  ;;  %v2143_v29 = vpop.f32.mrf.mxu1 }
 0x12a   : > { %1728 = vst [vmem:[%s2642_s30 + $0x60] sm:$0xff] %v1696_v23  ;;  %v1633_v30 = vmul.f32 %v1528_v26, %v1254_v24  ;;  %v2144_v31 = vadd.f32 %v2143_v29, %v2142_v22  ;;  %v2033_v32 = vpop.f32.mrf.mxu0  ;;  %v1671_v29 = vld [vmem:[%s2635_s26 + $0x98] sm:$0xff] }
 0x12b   : > { %v2145_v33 = vpop.f32.mrf.mxu1 }
 0x12c   : > { %v1697_v34 = vadd.f32 %v1665_v27, %v1633_v30  ;;  %v1259_v35 = vadd.f32 %v2144_v31, %v2032_v28  ;;  %v2034_v36 = vpop.f32.mrf.mxu0  ;;  %v1558_v28 = vpop.permute.xlu1 %1557 }
 0x12d   : > { %v2035_v39 = vadd.f32 %v2034_v36, %v2033_v32  ;;  %v2146_v40 = vpop.f32.mrf.mxu1 }
 0x12e   : > { %1729 = vst [vmem:[%s2642_s30 + $0x68] sm:$0xff] %v1697_v34  ;;  %v1634_v41 = vmul.f32 %v1533_v37, %v1259_v35  ;;  %v2147_v42 = vadd.f32 %v2146_v40, %v2145_v33  ;;  %v2036_v43 = vpop.f32.mrf.mxu0  ;;  %v1672_v40 = vld [vmem:[%s2635_s26 + $0xa0] sm:$0xff] }
 0x12f   : > { %v2148_v44 = vpop.f32.mrf.mxu1 }
 0x130   : > { %v1698_v45 = vadd.f32 %v1666_v38, %v1634_v41  ;;  %v1262_v46 = vadd.f32 %v2147_v42, %v2035_v39  ;;  %v2037_v47 = vpop.f32.mrf.mxu0  ;;  %v1563_v39 = vpop.permute.xlu0 %1562 }
 0x131   : > { %v2038_v50 = vadd.f32 %v2037_v47, %v2036_v43  ;;  %v2149_v51 = vpop.f32.mrf.mxu1 }
 0x132   : > { %1730 = vst [vmem:[%s2642_s30 + $0x70] sm:$0xff] %v1698_v45  ;;  %v1635_v52 = vmul.f32 %v1538_v48, %v1262_v46  ;;  %v2150_v53 = vadd.f32 %v2149_v51, %v2148_v44  ;;  %v2039_v54 = vpop.f32.mrf.mxu0  ;;  %v1673_v51 = vld [vmem:[%s2635_s26 + $0xa8] sm:$0xff] }
 0x133   : > { %v2151_v55 = vpop.f32.mrf.mxu1 }
 0x134   : > { %v1699_v56 = vadd.f32 %v1667_v49, %v1635_v52  ;;  %v1267_v57 = vadd.f32 %v2150_v53, %v2038_v50  ;;  %v2040_v58 = vpop.f32.mrf.mxu0  ;;  %v1568_v50 = vpop.permute.xlu1 %1567 }
 0x135   : > { %v2041_v61 = vadd.f32 %v2040_v58, %v2039_v54  ;;  %v2152_v62 = vpop.f32.mrf.mxu1 }
 0x136   : > { %1731 = vst [vmem:[%s2642_s30 + $0x78] sm:$0xff] %v1699_v56  ;;  %v1636_v63 = vmul.f32 %v1543_v59, %v1267_v57  ;;  %v2153_v0 = vadd.f32 %v2152_v62, %v2151_v55  ;;  %v2042_v1 = vpop.f32.mrf.mxu0  ;;  %v1674_v62 = vld [vmem:[%s2635_s26 + $0xb0] sm:$0xff] }
 0x137   : > { %v2154_v2 = vpop.f32.mrf.mxu1 }
 0x138   : > { %v1700_v3 = vadd.f32 %v1668_v60, %v1636_v63  ;;  %v1270_v4 = vadd.f32 %v2153_v0, %v2041_v61  ;;  %v2043_v5 = vpop.f32.mrf.mxu0  ;;  %v1573_v61 = vpop.permute.xlu0 %1572 }
 0x139   : > { %v2044_v8 = vadd.f32 %v2043_v5, %v2042_v1  ;;  %v2155_v9 = vpop.f32.mrf.mxu1 }
 0x13a   : > { %1732 = vst [vmem:[%s2642_s30 + $0x80] sm:$0xff] %v1700_v3  ;;  %v1637_v10 = vmul.f32 %v1548_v6, %v1270_v4  ;;  %v2156_v11 = vadd.f32 %v2155_v9, %v2154_v2  ;;  %v2045_v12 = vpop.f32.mrf.mxu0  ;;  %v1675_v9 = vld [vmem:[%s2635_s26 + $0xb8] sm:$0xff] }
 0x13b   : > { %v2157_v13 = vpop.f32.mrf.mxu1 }
 0x13c   : > { %v1701_v14 = vadd.f32 %v1669_v7, %v1637_v10  ;;  %v1275_v15 = vadd.f32 %v2156_v11, %v2044_v8  ;;  %v2046_v16 = vpop.f32.mrf.mxu0  ;;  %v1578_v8 = vpop.permute.xlu1 %1577 }
 0x13d   : > { %v2047_v19 = vadd.f32 %v2046_v16, %v2045_v12  ;;  %v2158_v20 = vpop.f32.mrf.mxu1 }
 0x13e   : > { %1733 = vst [vmem:[%s2642_s30 + $0x88] sm:$0xff] %v1701_v14  ;;  %v1638_v21 = vmul.f32 %v1553_v17, %v1275_v15  ;;  %v2159_v22 = vadd.f32 %v2158_v20, %v2157_v13  ;;  %v2048_v23 = vpop.f32.mrf.mxu0  ;;  %v1676_v20 = vld [vmem:[%s2635_s26 + $0xc0] sm:$0xff] }
 0x13f   : > { %v2160_v24 = vpop.f32.mrf.mxu1 }
 0x140   : > { %v1702_v25 = vadd.f32 %v1670_v18, %v1638_v21  ;;  %v1278_v26 = vadd.f32 %v2159_v22, %v2047_v19  ;;  %v2049_v27 = vpop.f32.mrf.mxu0  ;;  %v1583_v19 = vpop.permute.xlu0 %1582 }
 0x141   : > { %v2050_v30 = vadd.f32 %v2049_v27, %v2048_v23  ;;  %v2161_v31 = vpop.f32.mrf.mxu1 }
 0x142   : > { %1734 = vst [vmem:[%s2642_s30 + $0x90] sm:$0xff] %v1702_v25  ;;  %v1639_v32 = vmul.f32 %v1558_v28, %v1278_v26  ;;  %v2162_v33 = vadd.f32 %v2161_v31, %v2160_v24  ;;  %v2051_v34 = vpop.f32.mrf.mxu0  ;;  %v1677_v31 = vld [vmem:[%s2635_s26 + $0xc8] sm:$0xff] }
 0x143   : > { %v2163_v35 = vpop.f32.mrf.mxu1 }
 0x144   : > { %v1703_v36 = vadd.f32 %v1671_v29, %v1639_v32  ;;  %v1283_v37 = vadd.f32 %v2162_v33, %v2050_v30  ;;  %v2052_v38 = vpop.f32.mrf.mxu0  ;;  %v1588_v30 = vpop.permute.xlu1 %1587 }
 0x145   : > { %v2053_v41 = vadd.f32 %v2052_v38, %v2051_v34  ;;  %v2164_v42 = vpop.f32.mrf.mxu1 }
 0x146   : > { %1735 = vst [vmem:[%s2642_s30 + $0x98] sm:$0xff] %v1703_v36  ;;  %v1640_v43 = vmul.f32 %v1563_v39, %v1283_v37  ;;  %v2165_v44 = vadd.f32 %v2164_v42, %v2163_v35  ;;  %v2054_v45 = vpop.f32.mrf.mxu0  ;;  %v1678_v42 = vld [vmem:[%s2635_s26 + $0xd0] sm:$0xff] }
 0x147   : > { %v2166_v46 = vpop.f32.mrf.mxu1 }
 0x148   : > { %v1704_v47 = vadd.f32 %v1672_v40, %v1640_v43  ;;  %v1286_v48 = vadd.f32 %v2165_v44, %v2053_v41  ;;  %v2055_v49 = vpop.f32.mrf.mxu0  ;;  %v1593_v41 = vpop.permute.xlu0 %1592 }
 0x149   : > { %v2056_v52 = vadd.f32 %v2055_v49, %v2054_v45  ;;  %v2167_v53 = vpop.f32.mrf.mxu1 }
 0x14a   : > { %1736 = vst [vmem:[%s2642_s30 + $0xa0] sm:$0xff] %v1704_v47  ;;  %v1641_v54 = vmul.f32 %v1568_v50, %v1286_v48  ;;  %v2168_v55 = vadd.f32 %v2167_v53, %v2166_v46  ;;  %v2057_v56 = vpop.f32.mrf.mxu0  ;;  %v1679_v53 = vld [vmem:[%s2635_s26 + $0xd8] sm:$0xff] }
 0x14b   : > { %v2169_v57 = vpop.f32.mrf.mxu1 }
 0x14c   : > { %v1705_v58 = vadd.f32 %v1673_v51, %v1641_v54  ;;  %v1291_v59 = vadd.f32 %v2168_v55, %v2056_v52  ;;  %v2058_v60 = vpop.f32.mrf.mxu0  ;;  %v1598_v52 = vpop.permute.xlu1 %1597 }
 0x14d   : > { %v2059_v63 = vadd.f32 %v2058_v60, %v2057_v56  ;;  %v2170_v0 = vpop.f32.mrf.mxu1 }
 0x14e   : > { %1737 = vst [vmem:[%s2642_s30 + $0xa8] sm:$0xff] %v1705_v58  ;;  %v1642_v1 = vmul.f32 %v1573_v61, %v1291_v59  ;;  %v2171_v2 = vadd.f32 %v2170_v0, %v2169_v57  ;;  %v2060_v3 = vpop.f32.mrf.mxu0  ;;  %v1680_v0 = vld [vmem:[%s2635_s26 + $0xe0] sm:$0xff] }
 0x14f   : > { %v2172_v4 = vpop.f32.mrf.mxu1 }
 0x150   : > { %v1706_v5 = vadd.f32 %v1674_v62, %v1642_v1  ;;  %v1294_v6 = vadd.f32 %v2171_v2, %v2059_v63  ;;  %v2061_v7 = vpop.f32.mrf.mxu0  ;;  %v1603_v63 = vpop.permute.xlu0 %1602 }
 0x151   : > { %v2062_v10 = vadd.f32 %v2061_v7, %v2060_v3  ;;  %v2173_v11 = vpop.f32.mrf.mxu1 }
 0x152   : > { %1738 = vst [vmem:[%s2642_s30 + $0xb0] sm:$0xff] %v1706_v5  ;;  %v1643_v12 = vmul.f32 %v1578_v8, %v1294_v6  ;;  %v2174_v13 = vadd.f32 %v2173_v11, %v2172_v4  ;;  %v2063_v14 = vpop.f32.mrf.mxu0  ;;  %v1681_v11 = vld [vmem:[%s2635_s26 + $0xe8] sm:$0xff] }
 0x153   : > { %v2175_v15 = vpop.f32.mrf.mxu1 }
 0x154   : > { %v1707_v16 = vadd.f32 %v1675_v9, %v1643_v12  ;;  %v1299_v17 = vadd.f32 %v2174_v13, %v2062_v10  ;;  %v2064_v18 = vpop.f32.mrf.mxu0  ;;  %v1608_v10 = vpop.permute.xlu1 %1607 }
 0x155   : > { %v2065_v21 = vadd.f32 %v2064_v18, %v2063_v14  ;;  %v2176_v22 = vpop.f32.mrf.mxu1 }
 0x156   : > { %1739 = vst [vmem:[%s2642_s30 + $0xb8] sm:$0xff] %v1707_v16  ;;  %v1644_v23 = vmul.f32 %v1583_v19, %v1299_v17  ;;  %v2177_v24 = vadd.f32 %v2176_v22, %v2175_v15  ;;  %v2066_v25 = vpop.f32.mrf.mxu0  ;;  %v1682_v22 = vld [vmem:[%s2635_s26 + $0xf0] sm:$0xff] }
 0x157   : > { %v2178_v26 = vpop.f32.mrf.mxu1 }
 0x158   : > { %v1708_v27 = vadd.f32 %v1676_v20, %v1644_v23  ;;  %v1302_v28 = vadd.f32 %v2177_v24, %v2065_v21  ;;  %v2067_v29 = vpop.f32.mrf.mxu0  ;;  %v1613_v21 = vpop.permute.xlu0 %1612 }
 0x159   : > { %v2068_v32 = vadd.f32 %v2067_v29, %v2066_v25  ;;  %v2179_v33 = vpop.f32.mrf.mxu1  ;;  %v1618_v29 = vpop.permute.xlu1 %1617 }
 0x15a   : > { %1740 = vst [vmem:[%s2642_s30 + $0xc0] sm:$0xff] %v1708_v27  ;;  %v1645_v34 = vmul.f32 %v1588_v30, %v1302_v28  ;;  %v2180_v35 = vadd.f32 %v2179_v33, %v2178_v26  ;;  %v2069_v36 = vpop.f32.mrf.mxu0  ;;  %v1683_v30 = vld [vmem:[%s2635_s26 + $0xf8] sm:$0xff] }
 0x15b   : > { %v2181_v37 = vpop.f32.mrf.mxu1 }
 0x15c   : > { %v1709_v38 = vadd.f32 %v1677_v31, %v1645_v34  ;;  %v1307_v39 = vadd.f32 %v2180_v35, %v2068_v32  ;;  %v2070_v40 = vpop.f32.mrf.mxu0 }
 0x15d   : > { %v2071_v43 = vadd.f32 %v2070_v40, %v2069_v36  ;;  %v2182_v44 = vpop.f32.mrf.mxu1 }
 0x15e   : > { %1741 = vst [vmem:[%s2642_s30 + $0xc8] sm:$0xff] %v1709_v38  ;;  %v1646_v45 = vmul.f32 %v1593_v41, %v1307_v39  ;;  %v2183_v46 = vadd.f32 %v2182_v44, %v2181_v37  ;;  %v2072_v47 = vpop.f32.mrf.mxu0 }
 0x15f   : > { %v2184_v48 = vpop.f32.mrf.mxu1 }
 0x160   : > { %v1710_v49 = vadd.f32 %v1678_v42, %v1646_v45  ;;  %v1310_v50 = vadd.f32 %v2183_v46, %v2071_v43  ;;  %v2073_v51 = vpop.f32.mrf.mxu0 }
 0x161   : > { %v2074_v54 = vadd.f32 %v2073_v51, %v2072_v47  ;;  %v2185_v55 = vpop.f32.mrf.mxu1 }
 0x162   : > { %1742 = vst [vmem:[%s2642_s30 + $0xd0] sm:$0xff] %v1710_v49  ;;  %v1647_v56 = vmul.f32 %v1598_v52, %v1310_v50  ;;  %v2186_v57 = vadd.f32 %v2185_v55, %v2184_v48  ;;  %v2075_v58 = vpop.f32.mrf.mxu0 }
 0x163   : > { %v2187_v59 = vpop.f32.mrf.mxu1 }
 0x164   : > { %v1711_v60 = vadd.f32 %v1679_v53, %v1647_v56  ;;  %v1315_v61 = vadd.f32 %v2186_v57, %v2074_v54  ;;  %v2076_v62 = vpop.f32.mrf.mxu0 }
 0x165   : > { %v2077_v1 = vadd.f32 %v2076_v62, %v2075_v58  ;;  %v2188_v2 = vpop.f32.mrf.mxu1 }
 0x166   : > { %1743 = vst [vmem:[%s2642_s30 + $0xd8] sm:$0xff] %v1711_v60  ;;  %v1648_v3 = vmul.f32 %v1603_v63, %v1315_v61  ;;  %v2189_v4 = vadd.f32 %v2188_v2, %v2187_v59  ;;  %v2078_v5 = vpop.f32.mrf.mxu0 }
 0x167   : > { %v2190_v6 = vpop.f32.mrf.mxu1 }
 0x168   : > { %v1712_v7 = vadd.f32 %v1680_v0, %v1648_v3  ;;  %v1318_v8 = vadd.f32 %v2189_v4, %v2077_v1  ;;  %v2079_v9 = vpop.f32.mrf.mxu0 }
 0x169   : > { %v2080_v12 = vadd.f32 %v2079_v9, %v2078_v5  ;;  %v2191_v13 = vpop.f32.mrf.mxu1 }
 0x16a   : > { %1744 = vst [vmem:[%s2642_s30 + $0xe0] sm:$0xff] %v1712_v7  ;;  %v1649_v14 = vmul.f32 %v1608_v10, %v1318_v8  ;;  %v2192_v15 = vadd.f32 %v2191_v13, %v2190_v6  ;;  %v2081_v16 = vpop.f32.mrf.mxu0 }
 0x16b   : > { %v2193_v17 = vpop.f32.mrf.mxu1 }
 0x16c   : > { %v1713_v18 = vadd.f32 %v1681_v11, %v1649_v14  ;;  %v1323_v19 = vadd.f32 %v2192_v15, %v2080_v12  ;;  %v2082_v20 = vpop.f32.mrf.mxu0 }
 0x16d   : > { %v2083_v23 = vadd.f32 %v2082_v20, %v2081_v16  ;;  %v2194_v24 = vpop.f32.mrf.mxu1 }
 0x16e   : > { %1745 = vst [vmem:[%s2642_s30 + $0xe8] sm:$0xff] %v1713_v18  ;;  %v1650_v25 = vmul.f32 %v1613_v21, %v1323_v19  ;;  %v2195_v26 = vadd.f32 %v2194_v24, %v2193_v17 }
 0x170   : > { %v1714_v27 = vadd.f32 %v1682_v22, %v1650_v25  ;;  %v1326_v28 = vadd.f32 %v2195_v26, %v2083_v23 }
 0x172   : > { %1746 = vst [vmem:[%s2642_s30 + $0xf0] sm:$0xff] %v1714_v27  ;;  %v1651_v31 = vmul.f32 %v1618_v29, %v1326_v28 }
 0x174   : > { %v1715_v32 = vadd.f32 %v1683_v30, %v1651_v31 }
 0x176   : > { %1747 = vst [vmem:[%s2642_s30 + $0xf8] sm:$0xff] %v1715_v32 }
 0x177 PF: > { %s14_s17 = sadd.s32 1, %s2373_s17   ;;  %s2721_s15 = smov %s2369_s16 }
 0x178   : > { %p11_p5 = scmp.ge.s32.totalorder %s14_s17, 4   ;;  %s2722_s16 = smov %s2724_s18 }
 0x17a   :  { %13 = sbr.rel (!%p11_p5) target bundleno = 2 (0x2), region = 83 }

// kernel: gnn_forward.2
= control target key start
LH: loop header
LB: loop body
LE: loop exit
PB: predicated region body
PF: predicated region fallthrough
CT: control target
= control target key end

     0   :  { %s4454_s17 = smov 0   ;;  %s4456_s18 = smov 0   ;;  %s4948_s0 = inlined_call_operand.vmem [shape: bf16[512,512], index: 0, kind: input, shape index: {}]   ;;  %s4949_s1 = inlined_call_operand.vmem [shape: bf16[512,128], index: 1, kind: input, shape index: {}, may-alias: {1,2}]   ;;  %s4950_s2 = inlined_call_operand.vmem [shape: bf16[512,128], index: 2, kind: input, shape index: {}, may-alias: {1,2}]   ;;  %s4951_s3 = inlined_call_operand.vmem [shape: f32[512,1], index: 3, kind: input, shape index: {}]   ;;  %s4952_s4 = inlined_call_operand.vmem [shape: bf16[128,128], index: 4, kind: input, shape index: {}]   ;;  %s4953_s5 = inlined_call_operand.vmem [shape: bf16[128,128], index: 5, kind: input, shape index: {}]   ;;  %s4954_s6 = inlined_call_operand.vmem [shape: f32[1,128], index: 6, kind: input, shape index: {}]   ;;  %s4955_s7 = inlined_call_operand.vmem [shape: bf16[128,128], index: 7, kind: input, shape index: {}]   ;;  %s4956_s8 = inlined_call_operand.vmem [shape: bf16[128,128], index: 8, kind: input, shape index: {}]   ;;  %s4957_s9 = inlined_call_operand.vmem [shape: f32[1,128], index: 9, kind: input, shape index: {}]   ;;  %s4958_s10 = inlined_call_operand.vmem [shape: bf16[512,128], index: 10, kind: output, shape index: {0}]   ;;  %s4959_s11 = inlined_call_operand.vmem [shape: f32[512,128], index: 11, kind: output, shape index: {1}]  }
   0x1   :  { %s4458_s19 = smov 0  }
   0x2 LB: > { %s34_s20 = sadd.s32 1, %s4387_s18  ;;  %p3334_p0 = scmp.ge.s32.totalorder %s4391_s19, 1  ;;  %s4391_s19 = sphi %s4458_s19, %s22_s19   ;;  %s4387_s18 = sphi %s4456_s18, %s4961_s18   ;;  %s4383_s17 = sphi %s4454_s17, %s4960_s17  }
   0x3   : > { %p36_p1 = scmp.ge.s32.totalorder %s34_s20, 2  ;;  %p394_p2 = scmp.lt.s32.totalorder %s4391_s19, 3 }
   0x5   : > { %s4963_s20 = smov (%p36_p1, %s34_s20), 0  ;;  %p395_p3 = pnand %p3334_p0, %p394_p2 }
   0x6   : > { %s3335_s23 = sshll.u32 (!%p395_p3), %s4383_s17, 5 }
   0x7   : > { %398 = sbr.rel (%p395_p3) target bundleno = 784 (0x310), region = 60  ;;  %p461_p4 = scmp.lt.s32.totalorder (!%p395_p3), %s3335_s23, 63 }
   0xc   : > { %v4193_v0 = vld [vmem:[%s4949_s1 + $0x78] sm:$0xff]   ;;  %v4393_v4 = vmov 0   ;;  %v4197_v5 = vld [vmem:[%s4949_s1 + $0x70] sm:$0xff]   ;;  %v4201_v9 = vld [vmem:[%s4949_s1 + $0x68] sm:$0xff]   ;;  %s4965_s23 = smov (!%p461_p4, %s3335_s23), 63 }
   0xd   : > { %v4194_v1 = vld [vmem:[%s4949_s1 + $0xf8] sm:$0xff]   ;;  %3654 = vmatprep.subr.bf16.mxu0 %v4193_v0  ;;  %4191 = vset.pattern.permute.xlu0 %v4393_v4  ;;  %v4198_v6 = vld [vmem:[%s4949_s1 + $0xf0] sm:$0xff]   ;;  %v4202_v10 = vld [vmem:[%s4949_s1 + $0xe8] sm:$0xff]   ;;  %s3526_s12 = sshll.u32 %s4965_s23, 4  ;;  %s3341_s30 = sshll.u32 %s4965_s23, 3 }
   0xe   : > { %v4195_v2 = vld [vmem:[%s4949_s1 + $0x38] sm:$0xff]   ;;  %3766 = vmatprep.subr.bf16.mxu1 %v4194_v1  ;;  %4192 = vset.pattern.permute.xlu1 %v4393_v4  ;;  %v4199_v7 = vld [vmem:[%s4949_s1 + $0x30] sm:$0xff]   ;;  %v4203_v11 = vld [vmem:[%s4949_s1 + $0x28] sm:$0xff]   ;;  %s4571_s25 = scalar_lea.vmem %s4948_s0, %s3526_s12  ;;  %s4600_s13 = scalar_lea.vmem %s4951_s3, %s3341_s30 }
   0xf   : > { %v4196_v3 = vld [vmem:[%s4949_s1 + $0xb8] sm:$0xff]   ;;  %3655 = vmatpush3.bf16.msra.mxu0 %v4195_v2  ;;  %v4200_v8 = vld [vmem:[%s4949_s1 + $0xb0] sm:$0xff]   ;;  %v4204_v12 = vld [vmem:[%s4949_s1 + $0xa8] sm:$0xff]   ;;  %s3339_s26 = sshll.u32 %s4965_s23, 2 }
  0x10   : > { %3767 = vmatpush3.bf16.msra.mxu1 %v4196_v3  ;;  %3656 = vmatprep.subr.bf16.mxu0 %v4197_v5  ;;  %v4205_v13 = vld [vmem:[%s4949_s1 + $0x60] sm:$0xff]   ;;  %v4209_v17 = vld [vmem:[%s4949_s1 + $0x58] sm:$0xff]   ;;  %v4213_v21 = vld [vmem:[%s4949_s1 + $0x50] sm:$0xff]   ;;  %s4721_s12 = scalar_lea.vmem %s4950_s2, %s3339_s26  ;;  %s4860_s14 = scalar_lea.vmem %s4958_s10, %s3339_s26 }
  0x11   : > { %3768 = vmatprep.subr.bf16.mxu1 %v4198_v6  ;;  %v4206_v14 = vld [vmem:[%s4949_s1 + $0xe0] sm:$0xff]   ;;  %v4210_v18 = vld [vmem:[%s4949_s1 + $0xd8] sm:$0xff]   ;;  %v4214_v22 = vld [vmem:[%s4949_s1 + $0xd0] sm:$0xff]  }
  0x12   : > { %v4207_v15 = vld [vmem:[%s4949_s1 + $0x20] sm:$0xff]   ;;  %v4211_v19 = vld [vmem:[%s4949_s1 + $0x18] sm:$0xff]   ;;  %v4215_v23 = vld [vmem:[%s4949_s1 + $0x10] sm:$0xff]  }
  0x13   : > { %3657 = vmatpush3.bf16.msra.mxu0 %v4199_v7  ;;  %v4208_v16 = vld [vmem:[%s4949_s1 + $0xa0] sm:$0xff]   ;;  %v4212_v20 = vld [vmem:[%s4949_s1 + $0x98] sm:$0xff]   ;;  %v4216_v24 = vld [vmem:[%s4949_s1 + $0x90] sm:$0xff]  }
  0x14   : > { %3769 = vmatpush3.bf16.msra.mxu1 %v4200_v8  ;;  %3658 = vmatprep.subr.bf16.mxu0 %v4201_v9  ;;  %v4217_v25 = vld [vmem:[%s4949_s1 + $0x48] sm:$0xff]   ;;  %v4221_v29 = vld [vmem:[%s4949_s1 + $0x40] sm:$0xff]   ;;  %v1633_v52 = vld [vmem:[%s4600_s13 + $0x10] sm:$0xff] }
  0x15   : > { %3770 = vmatprep.subr.bf16.mxu1 %v4202_v10  ;;  %v4218_v26 = vld [vmem:[%s4949_s1 + $0xc8] sm:$0xff]   ;;  %v4222_v30 = vld [vmem:[%s4949_s1 + $0xc0] sm:$0xff]   ;;  %1675 = vperm.xlu1 %4192, %v1633_v52   ;;  %v1634_v54 = vld [vmem:[%s4600_s13 + $0x18] sm:$0xff] }
  0x16   : > { %v4219_v27 = vld [vmem:[%s4949_s1 + $0x8] sm:$0xff]   ;;  %v4223_v31 = vld [vmem:[%s4949_s1] sm:$0xff]   ;;  %v1637_v61 = vld [vmem:[%s4600_s13 + $0x30] sm:$0xff] }
  0x17   : > { %3659 = vmatpush3.bf16.msra.mxu0 %v4203_v11  ;;  %v4220_v28 = vld [vmem:[%s4949_s1 + $0x88] sm:$0xff]   ;;  %v4224_v32 = vld [vmem:[%s4949_s1 + $0x80] sm:$0xff]   ;;  %v1638_v62 = vld [vmem:[%s4600_s13 + $0x38] sm:$0xff] }
  0x18   : > { %3771 = vmatpush3.bf16.msra.mxu1 %v4204_v12  ;;  %3660 = vmatprep.subr.bf16.mxu0 %v4205_v13  ;;  %v4225_v33 = vld [vmem:[%s4571_s25] ss:$16 sps:$4 sm:$0xff]   ;;  %v4227_v34 = vld [vmem:[%s4571_s25 + $0x4] ss:$16 sps:$4 sm:$0xff]   ;;  %v4228_v35 = vld [vmem:[%s4571_s25 + $0x8] ss:$16 sps:$4 sm:$0xff]  }
  0x19   : > { %3772 = vmatprep.subr.bf16.mxu1 %v4206_v14  ;;  %v4230_v36 = vld [vmem:[%s4571_s25 + $0xc] ss:$16 sps:$4 sm:$0xff]   ;;  %1242 = vmatprep.mubr.bf16.mxu0 %v4227_v34  ;;  %v4231_v37 = vld [vmem:[%s4571_s25 + $0x24] ss:$16 sps:$4 sm:$0xff]   ;;  %v4235_v39 = vld [vmem:[%s4571_s25 + $0x20] ss:$16 sps:$4 sm:$0xff]  }
  0x1a   : > { %1403 = vmatprep.mubr.bf16.mxu1 %v4230_v36  ;;  %v4233_v38 = vld [vmem:[%s4571_s25 + $0x2c] ss:$16 sps:$4 sm:$0xff]   ;;  %v4236_v40 = vld [vmem:[%s4571_s25 + $0x28] ss:$16 sps:$4 sm:$0xff]   ;;  %v4237_v41 = vld [vmem:[%s4571_s25 + $0x44] ss:$16 sps:$4 sm:$0xff]   ;;  %1680 = vperm.xlu1 %4192, %v1634_v54  }
  0x1b   : > { %3661 = vmatpush3.bf16.msra.mxu0 %v4207_v15  ;;  %v4239_v42 = vld [vmem:[%s4571_s25 + $0x4c] ss:$16 sps:$4 sm:$0xff]   ;;  %v4241_v43 = vld [vmem:[%s4571_s25 + $0x40] ss:$16 sps:$4 sm:$0xff]   ;;  %v4242_v44 = vld [vmem:[%s4571_s25 + $0x48] ss:$16 sps:$4 sm:$0xff]  }
  0x1c   : > { %3773 = vmatpush3.bf16.msra.mxu1 %v4208_v16  ;;  %3662 = vmatprep.subr.bf16.mxu0 %v4209_v17  ;;  %v4243_v45 = vld [vmem:[%s4571_s25 + $0x64] ss:$16 sps:$4 sm:$0xff]   ;;  %v4245_v46 = vld [vmem:[%s4571_s25 + $0x6c] ss:$16 sps:$4 sm:$0xff]   ;;  %v4247_v47 = vld [vmem:[%s4571_s25 + $0x60] ss:$16 sps:$4 sm:$0xff]  }
  0x1d   : > { %3774 = vmatprep.subr.bf16.mxu1 %v4210_v18  ;;  %v4248_v48 = vld [vmem:[%s4571_s25 + $0x68] ss:$16 sps:$4 sm:$0xff]   ;;  %v4249_v49 = vld [vmem:[%s4571_s25 + $0x84] ss:$16 sps:$4 sm:$0xff]   ;;  %v4251_v50 = vld [vmem:[%s4571_s25 + $0x8c] ss:$16 sps:$4 sm:$0xff]  }
  0x1e   : > { %v1631_v51 = vld [vmem:[%s4600_s13] sm:$0xff]  ;;  %v1632_v53 = vld [vmem:[%s4600_s13 + $0x8] sm:$0xff]  ;;  %v1641_v5 = vld [vmem:[%s4600_s13 + $0x50] sm:$0xff] }
  0x1f   : > { %3663 = vmatpush3.bf16.msra.mxu0 %v4211_v19  ;;  %1665 = vperm.xlu0 %4191, %v1631_v51   ;;  %v4253_v55 = vld [vmem:[%s4571_s25 + $0x80] ss:$16 sps:$4 sm:$0xff]   ;;  %v4254_v57 = vld [vmem:[%s4571_s25 + $0x88] ss:$16 sps:$4 sm:$0xff]   ;;  %v4255_v58 = vld [vmem:[%s4571_s25 + $0xa4] ss:$16 sps:$4 sm:$0xff]  }
  0x20   : > { %3775 = vmatpush3.bf16.msra.mxu1 %v4212_v20  ;;  %3664 = vmatprep.subr.bf16.mxu0 %v4213_v21  ;;  %v1635_v56 = vld [vmem:[%s4600_s13 + $0x20] sm:$0xff]  ;;  %v1636_v59 = vld [vmem:[%s4600_s13 + $0x28] sm:$0xff]  ;;  %v1642_v6 = vld [vmem:[%s4600_s13 + $0x58] sm:$0xff] }
  0x21   : > { %3776 = vmatprep.subr.bf16.mxu1 %v4214_v22  ;;  %v4257_v60 = vld [vmem:[%s4571_s25 + $0xac] ss:$16 sps:$4 sm:$0xff]   ;;  %1690 = vperm.xlu1 %4192, %v1636_v59   ;;  %v4259_v63 = vld [vmem:[%s4571_s25 + $0xa0] ss:$16 sps:$4 sm:$0xff]   ;;  %v4260_v1 = vld [vmem:[%s4571_s25 + $0xa8] ss:$16 sps:$4 sm:$0xff]  }
  0x22   : > { %v1639_v0 = vld [vmem:[%s4600_s13 + $0x40] sm:$0xff]  ;;  %v1640_v3 = vld [vmem:[%s4600_s13 + $0x48] sm:$0xff]  ;;  %v1645_v13 = vld [vmem:[%s4600_s13 + $0x70] sm:$0xff] }
  0x23   : > { %3665 = vmatpush3.bf16.msra.mxu0 %v4215_v23  ;;  %1670 = vperm.xlu0 %4191, %v1632_v53   ;;  %v4261_v2 = vld [vmem:[%s4571_s25 + $0xc4] ss:$16 sps:$4 sm:$0xff]   ;;  %v4263_v4 = vld [vmem:[%s4571_s25 + $0xcc] ss:$16 sps:$4 sm:$0xff]   ;;  %v4265_v7 = vld [vmem:[%s4571_s25 + $0xc0] ss:$16 sps:$4 sm:$0xff]  }
  0x24   : > { %3777 = vmatpush3.bf16.msra.mxu1 %v4216_v24  ;;  %3666 = vmatprep.subr.bf16.mxu0 %v4217_v25  ;;  %v1643_v8 = vld [vmem:[%s4600_s13 + $0x60] sm:$0xff]  ;;  %v4266_v9 = vld [vmem:[%s4571_s25 + $0xc8] ss:$16 sps:$4 sm:$0xff]   ;;  %v4269_v12 = vld [vmem:[%s4571_s25 + $0xec] ss:$16 sps:$4 sm:$0xff]  }
  0x25   : > { %3778 = vmatprep.subr.bf16.mxu1 %v4218_v26  ;;  %1700 = vperm.xlu1 %4192, %v1638_v62   ;;  %v4267_v10 = vld [vmem:[%s4571_s25 + $0xe4] ss:$16 sps:$4 sm:$0xff]   ;;  %v1644_v11 = vld [vmem:[%s4600_s13 + $0x68] sm:$0xff]  ;;  %v1646_v14 = vld [vmem:[%s4600_s13 + $0x78] sm:$0xff] }
  0x26   : > { %v4271_v15 = vld [vmem:[%s4571_s25 + $0xe0] ss:$16 sps:$4 sm:$0xff]   ;;  %v4321_v17 = vld [vmem:[%s4953_s5 + $0x38] sm:$0xff]   ;;  %v4273_v19 = vld [vmem:[%s4571_s25 + $0x104] ss:$16 sps:$4 sm:$0xff]  }
  0x27   : > { %3667 = vmatpush3.bf16.msra.mxu0 %v4219_v27  ;;  %1685 = vperm.xlu0 %4191, %v1635_v56   ;;  %v1647_v16 = vld [vmem:[%s4600_s13 + $0x80] sm:$0xff]  ;;  %v4272_v18 = vld [vmem:[%s4571_s25 + $0xe8] ss:$16 sps:$4 sm:$0xff]   ;;  %v4275_v22 = vld [vmem:[%s4571_s25 + $0x10c] ss:$16 sps:$4 sm:$0xff]  }
  0x28   : > { %3779 = vmatpush3.bf16.msra.mxu1 %v4220_v28  ;;  %3668 = vmatprep.subr.bf16.mxu0 %v4221_v29  ;;  %v1648_v20 = vld [vmem:[%s4600_s13 + $0x88] sm:$0xff]  ;;  %v4322_v21 = vld [vmem:[%s4952_s4 + $0x38] sm:$0xff]   ;;  %v4323_v23 = vld [vmem:[%s4953_s5 + $0x30] sm:$0xff]  }
  0x29   : > { %3780 = vmatprep.subr.bf16.mxu1 %v4222_v30  ;;  %1710 = vperm.xlu1 %4192, %v1640_v3   ;;  %v4324_v24 = vld [vmem:[%s4952_s4 + $0x30] sm:$0xff]   ;;  %v1650_v26 = vld [vmem:[%s4600_s13 + $0x98] sm:$0xff]  ;;  %v4325_v27 = vld [vmem:[%s4953_s5 + $0x28] sm:$0xff]  }
  0x2a   : > { %v1649_v25 = vld [vmem:[%s4600_s13 + $0x90] sm:$0xff]  ;;  %v4326_v28 = vld [vmem:[%s4952_s4 + $0x28] sm:$0xff]   ;;  %v1651_v30 = vld [vmem:[%s4600_s13 + $0xa0] sm:$0xff] }
  0x2b   : > { %3669 = vmatpush3.bf16.msra.mxu0 %v4223_v31  ;;  %1695 = vperm.xlu0 %4191, %v1637_v61   ;;  %v4277_v29 = vld [vmem:[%s4571_s25 + $0x100] ss:$16 sps:$4 sm:$0xff]   ;;  %v4278_v31 = vld [vmem:[%s4571_s25 + $0x108] ss:$16 sps:$4 sm:$0xff]   ;;  %v4281_v34 = vld [vmem:[%s4571_s25 + $0x12c] ss:$16 sps:$4 sm:$0xff]  }
  0x2c   : > { %3781 = vmatpush3.bf16.msra.mxu1 %v4224_v32  ;;  %3974 = vmatprep.subr.bf16.mxu0 %v4321_v17  ;;  %v4279_v32 = vld [vmem:[%s4571_s25 + $0x124] ss:$16 sps:$4 sm:$0xff]   ;;  %v4289_v51 = vld [vmem:[%s4571_s25 + $0x140] ss:$16 sps:$4 sm:$0xff]   ;;  %v4290_v53 = vld [vmem:[%s4571_s25 + $0x148] ss:$16 sps:$4 sm:$0xff]  }
  0x2d   : > { %1720 = vperm.xlu1 %4192, %v1642_v6   ;;  %4022 = vmatprep.subr.bf16.mxu1 %v4322_v21  ;;  %v4328_v36 = vld [vmem:[%s4952_s4 + $0x20] sm:$0xff]   ;;  %v4293_v56 = vld [vmem:[%s4571_s25 + $0x16c] ss:$16 sps:$4 sm:$0xff]  }
  0x2e   : > { %1243 = vmatmul.mubr.bf16.vlgmr.msra.gmra.mxu0 %v4225_v33  ;;  %v1652_v33 = vld [vmem:[%s4600_s13 + $0xa8] sm:$0xff]  ;;  %v1659_v52 = vld [vmem:[%s4600_s13 + $0xe0] sm:$0xff]  ;;  %v1662_v59 = vld [vmem:[%s4600_s13 + $0xf8] sm:$0xff] }
  0x2f   : > { %1404 = vmatmul.mubr.bf16.vlgmr.msra.gmra.mxu1 %v4228_v35  ;;  %1250 = vmatprep.mubr.bf16.mxu0 %v4231_v37  ;;  %v4327_v35 = vld [vmem:[%s4953_s5 + $0x20] sm:$0xff]   ;;  %v1653_v37 = vld [vmem:[%s4600_s13 + $0xb0] sm:$0xff]  ;;  %v4305_v6 = vld [vmem:[%s4571_s25 + $0x1ac] ss:$16 sps:$4 sm:$0xff]  }
  0x30   : > { %1411 = vmatprep.mubr.bf16.mxu1 %v4233_v38  ;;  %1705 = vperm.xlu0 %4191, %v1639_v0   ;;  %v1654_v38 = vld [vmem:[%s4600_s13 + $0xb8] sm:$0xff]  ;;  %v4291_v54 = vld [vmem:[%s4571_s25 + $0x164] ss:$16 sps:$4 sm:$0xff]   ;;  %v4295_v62 = vld [vmem:[%s4571_s25 + $0x160] ss:$16 sps:$4 sm:$0xff]  }
  0x31   : > { %1730 = vperm.xlu1 %4192, %v1644_v11   ;;  %3975 = vmatpush3.bf16.msra.mxu0 %v4321_v17  ;;  %v4335_v61 = vld [vmem:[%s4953_s5] sm:$0xff]  }
  0x32   : > { %4023 = vmatpush3.bf16.msra.mxu1 %v4322_v21  ;;  %3976 = vmatprep.subr.bf16.mxu0 %v4323_v23  ;;  %v4336_v0 = vld [vmem:[%s4952_s4] sm:$0xff]  }
  0x33   : > { %4024 = vmatprep.subr.bf16.mxu1 %v4324_v24  ;;  %v4301_v3 = vld [vmem:[%s4571_s25 + $0x180] ss:$16 sps:$4 sm:$0xff]  }
  0x34   : > { %1715 = vperm.xlu0 %4191, %v1641_v5   ;;  %v4303_v5 = vld [vmem:[%s4571_s25 + $0x1a4] ss:$16 sps:$4 sm:$0xff]   ;;  %v4313_v11 = vld [vmem:[%s4571_s25 + $0x1c0] ss:$16 sps:$4 sm:$0xff]  }
  0x35   : > { %1740 = vperm.xlu1 %4192, %v1646_v14   ;;  %3977 = vmatpush3.bf16.msra.mxu0 %v4323_v23  ;;  %v4317_v14 = vld [vmem:[%s4571_s25 + $0x1ec] ss:$16 sps:$4 sm:$0xff]   ;;  %v4337_v17 = vld [vmem:[%s4721_s12] sm:$0xff]   ;;  %v4343_v23 = vld [vmem:[%s4721_s12 + $0x30] sm:$0xff]  }
  0x36   : > { %1251 = vmatmul.mubr.bf16.gmra.mxu0 %v4235_v39  ;;  %4025 = vmatpush3.bf16.msra.mxu1 %v4324_v24  ;;  %v4283_v39 = vld [vmem:[%s4571_s25 + $0x120] ss:$16 sps:$4 sm:$0xff]   ;;  %v4344_v24 = vld [vmem:[%s4721_s12 + $0x38] sm:$0xff]  }
  0x37   : > { %1412 = vmatmul.mubr.bf16.gmra.mxu1 %v4236_v40  ;;  %1258 = vmatprep.mubr.bf16.mxu0 %v4237_v41  ;;  %v1655_v40 = vld [vmem:[%s4600_s13 + $0xc0] sm:$0xff]  ;;  %v4284_v41 = vld [vmem:[%s4571_s25 + $0x128] ss:$16 sps:$4 sm:$0xff]  }
  0x38   : > { %1419 = vmatprep.mubr.bf16.mxu1 %v4239_v42  ;;  %1725 = vperm.xlu0 %4191, %v1643_v8   ;;  %v4285_v42 = vld [vmem:[%s4571_s25 + $0x144] ss:$16 sps:$4 sm:$0xff]   ;;  %v4308_v8 = vld [vmem:[%s4571_s25 + $0x1a8] ss:$16 sps:$4 sm:$0xff]  }
  0x39   : > { %1750 = vperm.xlu1 %4192, %v1648_v20   ;;  %3978 = vmatprep.subr.bf16.mxu0 %v4325_v27  ;;  %v4340_v20 = vld [vmem:[%s4721_s12 + $0x18] sm:$0xff]   ;;  %v4341_v21 = vld [vmem:[%s4721_s12 + $0x20] sm:$0xff]  }
  0x3a   : > { %4026 = vmatprep.subr.bf16.mxu1 %v4326_v28  ;;  %3979 = vmatpush3.bf16.msra.mxu0 %v4325_v27  ;;  %v4347_v27 = vld [vmem:[%s4721_s12 + $0x50] sm:$0xff]  }
  0x3b   : > { %4027 = vmatpush3.bf16.msra.mxu1 %v4326_v28  ;;  %3980 = vmatprep.subr.bf16.mxu0 %v4327_v35  ;;  %v4348_v28 = vld [vmem:[%s4721_s12 + $0x58] sm:$0xff]  }
  0x3c   : > { %1735 = vperm.xlu0 %4191, %v1645_v13   ;;  %4028 = vmatprep.subr.bf16.mxu1 %v4328_v36  ;;  %v4315_v13 = vld [vmem:[%s4571_s25 + $0x1e4] ss:$16 sps:$4 sm:$0xff]  }
  0x3d   : > { %1760 = vperm.xlu1 %4192, %v1650_v26   ;;  %v4346_v26 = vld [vmem:[%s4721_s12 + $0x48] sm:$0xff]  }
  0x3e   : > { %1259 = vmatmul.mubr.bf16.gmra.mxu0 %v4241_v43  ;;  %v1656_v43 = vld [vmem:[%s4600_s13 + $0xc8] sm:$0xff] }
  0x3f   : > { %1420 = vmatmul.mubr.bf16.gmra.mxu1 %v4242_v44  ;;  %1266 = vmatprep.mubr.bf16.mxu0 %v4243_v45  ;;  %v4287_v44 = vld [vmem:[%s4571_s25 + $0x14c] ss:$16 sps:$4 sm:$0xff]   ;;  %v1657_v45 = vld [vmem:[%s4600_s13 + $0xd0] sm:$0xff] }
  0x40   : > { %1427 = vmatprep.mubr.bf16.mxu1 %v4245_v46  ;;  %1745 = vperm.xlu0 %4191, %v1647_v16   ;;  %v4329_v46 = vld [vmem:[%s4953_s5 + $0x18] sm:$0xff]  }
  0x41   : > { %1770 = vperm.xlu1 %4192, %v1652_v33   ;;  %3981 = vmatpush3.bf16.msra.mxu0 %v4327_v35  ;;  %v4320_v16 = vld [vmem:[%s4571_s25 + $0x1e8] ss:$16 sps:$4 sm:$0xff]  }
  0x42   : > { %4029 = vmatpush3.bf16.msra.mxu1 %v4328_v36  ;;  %3982 = vmatprep.subr.bf16.mxu0 %v4329_v46  ;;  %v4352_v33 = vld [vmem:[%s4721_s12 + $0x78] sm:$0xff]  }
  0x44   : > { %1755 = vperm.xlu0 %4191, %v1649_v25   ;;  %v4345_v25 = vld [vmem:[%s4721_s12 + $0x40] sm:$0xff]  }
  0x45   : > { %1780 = vperm.xlu1 %4192, %v1654_v38   ;;  %3983 = vmatpush3.bf16.msra.mxu0 %v4329_v46 }
  0x46   : > { %1267 = vmatmul.mubr.bf16.gmra.mxu0 %v4247_v47  ;;  %v4330_v47 = vld [vmem:[%s4952_s4 + $0x18] sm:$0xff]  }
  0x47   : > { %1428 = vmatmul.mubr.bf16.gmra.mxu1 %v4248_v48  ;;  %1274 = vmatprep.mubr.bf16.mxu0 %v4249_v49  ;;  %v1658_v48 = vld [vmem:[%s4600_s13 + $0xd8] sm:$0xff]  ;;  %v4331_v49 = vld [vmem:[%s4953_s5 + $0x10] sm:$0xff]  }
  0x48   : > { %1435 = vmatprep.mubr.bf16.mxu1 %v4251_v50  ;;  %1765 = vperm.xlu0 %4191, %v1651_v30   ;;  %v4332_v50 = vld [vmem:[%s4952_s4 + $0x10] sm:$0xff]   ;;  %v4350_v30 = vld [vmem:[%s4721_s12 + $0x68] sm:$0xff]  }
  0x49   : > { %1790 = vperm.xlu1 %4192, %v1656_v43   ;;  %4030 = vmatprep.subr.bf16.mxu1 %v4330_v47 }
  0x4a   : > { %4031 = vmatpush3.bf16.msra.mxu1 %v4330_v47  ;;  %3984 = vmatprep.subr.bf16.mxu0 %v4331_v49 }
  0x4b   : > { %4032 = vmatprep.subr.bf16.mxu1 %v4332_v50  ;;  %3985 = vmatpush3.bf16.msra.mxu0 %v4331_v49  ;;  %v4354_v49 = vld [vmem:[%s4956_s8 + $0x38] sm:$0xff]  }
  0x4c   : > { %1775 = vperm.xlu0 %4191, %v1653_v37  }
  0x4d   : > { %1800 = vperm.xlu1 %4192, %v1658_v48   ;;  %v4353_v48 = vld [vmem:[%s4955_s7 + $0x38] sm:$0xff]  }
  0x4e   : > { %1275 = vmatmul.mubr.bf16.gmra.mxu0 %v4253_v55  ;;  %v1660_v55 = vld [vmem:[%s4600_s13 + $0xe8] sm:$0xff]  ;;  %4033 = vmatpush3.bf16.msra.mxu1 %v4332_v50  ;;  %v4355_v50 = vld [vmem:[%s4955_s7 + $0x30] sm:$0xff]  }
  0x4f   : > { %1436 = vmatmul.mubr.bf16.gmra.mxu1 %v4254_v57  ;;  %1282 = vmatprep.mubr.bf16.mxu0 %v4255_v58  ;;  %v1661_v57 = vld [vmem:[%s4600_s13 + $0xf0] sm:$0xff]  ;;  %v4333_v58 = vld [vmem:[%s4953_s5 + $0x8] sm:$0xff]  }
  0x50   : > { %1443 = vmatprep.mubr.bf16.mxu1 %v4257_v60  ;;  %1785 = vperm.xlu0 %4191, %v1655_v40   ;;  %v4334_v60 = vld [vmem:[%s4952_s4 + $0x8] sm:$0xff]  }
  0x51   : > { %1810 = vperm.xlu1 %4192, %v1660_v55   ;;  %3986 = vmatprep.subr.bf16.mxu0 %v4333_v58 }
  0x52   : > { %4034 = vmatprep.subr.bf16.mxu1 %v4334_v60  ;;  %3987 = vmatpush3.bf16.msra.mxu0 %v4333_v58 }
  0x53   : > { %4035 = vmatpush3.bf16.msra.mxu1 %v4334_v60  ;;  %3988 = vmatprep.subr.bf16.mxu0 %v4335_v61 }
  0x54   : > { %1795 = vperm.xlu0 %4191, %v1657_v45   ;;  %4036 = vmatprep.subr.bf16.mxu1 %v4336_v0 }
  0x55   : > { %1820 = vperm.xlu1 %4192, %v1662_v59  }
  0x56   : > { %1283 = vmatmul.mubr.bf16.gmra.mxu0 %v4259_v63  ;;  %v4296_v63 = vld [vmem:[%s4571_s25 + $0x168] ss:$16 sps:$4 sm:$0xff]  }
  0x57   : > { %1444 = vmatmul.mubr.bf16.gmra.mxu1 %v4260_v1  ;;  %1290 = vmatprep.mubr.bf16.mxu0 %v4261_v2  ;;  %v4297_v1 = vld [vmem:[%s4571_s25 + $0x184] ss:$16 sps:$4 sm:$0xff]   ;;  %v4299_v2 = vld [vmem:[%s4571_s25 + $0x18c] ss:$16 sps:$4 sm:$0xff]  }
  0x58   : > { %1451 = vmatprep.mubr.bf16.mxu1 %v4263_v4  ;;  %1805 = vperm.xlu0 %4191, %v1659_v52   ;;  %v4302_v4 = vld [vmem:[%s4571_s25 + $0x188] ss:$16 sps:$4 sm:$0xff]  }
  0x59   : > { %3989 = vmatpush3.bf16.msra.mxu0 %v4335_v61  ;;  %4037 = vmatpush3.bf16.msra.mxu1 %v4336_v0  ;;  %v4357_v61 = vld [vmem:[%s4955_s7 + $0x28] sm:$0xff]  }
  0x5a   : > { %4070 = vmatprep.subr.bf16.mxu0 %v4353_v48  ;;  %4118 = vmatprep.subr.bf16.mxu1 %v4354_v49 }
  0x5c   : > { %1815 = vperm.xlu0 %4191, %v1661_v57  }
  0x5e   : > { %1291 = vmatmul.mubr.bf16.gmra.mxu0 %v4265_v7  ;;  %v4307_v7 = vld [vmem:[%s4571_s25 + $0x1a0] ss:$16 sps:$4 sm:$0xff]  }
  0x5f   : > { %1452 = vmatmul.mubr.bf16.gmra.mxu1 %v4266_v9  ;;  %1298 = vmatprep.mubr.bf16.mxu0 %v4267_v10  ;;  %v4309_v9 = vld [vmem:[%s4571_s25 + $0x1c4] ss:$16 sps:$4 sm:$0xff]   ;;  %v4311_v10 = vld [vmem:[%s4571_s25 + $0x1cc] ss:$16 sps:$4 sm:$0xff]  }
  0x60   : > { %1459 = vmatprep.mubr.bf16.mxu1 %v4269_v12  ;;  %v4314_v12 = vld [vmem:[%s4571_s25 + $0x1c8] ss:$16 sps:$4 sm:$0xff]  }
  0x66   : > { %1299 = vmatmul.mubr.bf16.gmra.mxu0 %v4271_v15  ;;  %v4319_v15 = vld [vmem:[%s4571_s25 + $0x1e0] ss:$16 sps:$4 sm:$0xff]  }
  0x67   : > { %1460 = vmatmul.mubr.bf16.gmra.mxu1 %v4272_v18  ;;  %1306 = vmatprep.mubr.bf16.mxu0 %v4273_v19  ;;  %v4338_v18 = vld [vmem:[%s4721_s12 + $0x8] sm:$0xff]   ;;  %v4339_v19 = vld [vmem:[%s4721_s12 + $0x10] sm:$0xff]  }
  0x68   : > { %1467 = vmatprep.mubr.bf16.mxu1 %v4275_v22  ;;  %v4342_v22 = vld [vmem:[%s4721_s12 + $0x28] sm:$0xff]  }
  0x6e   : > { %1307 = vmatmul.mubr.bf16.gmra.mxu0 %v4277_v29  ;;  %v4349_v29 = vld [vmem:[%s4721_s12 + $0x60] sm:$0xff]  }
  0x6f   : > { %1468 = vmatmul.mubr.bf16.gmra.mxu1 %v4278_v31  ;;  %1314 = vmatprep.mubr.bf16.mxu0 %v4279_v32  ;;  %v4351_v31 = vld [vmem:[%s4721_s12 + $0x70] sm:$0xff]   ;;  %s4850_s12 = scalar_lea.vmem %s4959_s11, %s3341_s30 }
  0x70   : > { %1475 = vmatprep.mubr.bf16.mxu1 %v4281_v34 }
  0x76   : > { %1315 = vmatmul.mubr.bf16.gmra.mxu0 %v4283_v39 }
  0x77   : > { %1476 = vmatmul.mubr.bf16.gmra.mxu1 %v4284_v41  ;;  %1322 = vmatprep.mubr.bf16.mxu0 %v4285_v42 }
  0x78   : > { %1483 = vmatprep.mubr.bf16.mxu1 %v4287_v44 }
  0x7e   : > { %1323 = vmatmul.mubr.bf16.gmra.mxu0 %v4289_v51 }
  0x7f   : > { %1484 = vmatmul.mubr.bf16.gmra.mxu1 %v4290_v53  ;;  %1330 = vmatprep.mubr.bf16.mxu0 %v4291_v54 }
  0x80   : > { %1491 = vmatprep.mubr.bf16.mxu1 %v4293_v56 }
  0x86   : > { %1331 = vmatmul.mubr.bf16.gmra.mxu0 %v4295_v62 }
  0x87   : > { %1492 = vmatmul.mubr.bf16.gmra.mxu1 %v4296_v63  ;;  %1338 = vmatprep.mubr.bf16.mxu0 %v4297_v1 }
  0x88   : > { %1499 = vmatprep.mubr.bf16.mxu1 %v4299_v2 }
  0x8e   : > { %1339 = vmatmul.mubr.bf16.gmra.mxu0 %v4301_v3 }
  0x8f   : > { %1500 = vmatmul.mubr.bf16.gmra.mxu1 %v4302_v4  ;;  %1346 = vmatprep.mubr.bf16.mxu0 %v4303_v5 }
  0x90   : > { %1507 = vmatprep.mubr.bf16.mxu1 %v4305_v6  ;;  %v1676_v62 = vpop.permute.xlu1 %1675 }
  0x96   : > { %1347 = vmatmul.mubr.bf16.gmra.mxu0 %v4307_v7  ;;  %v4359_v7 = vld [vmem:[%s4955_s7 + $0x20] sm:$0xff]  }
  0x97   : > { %1508 = vmatmul.mubr.bf16.gmra.mxu1 %v4308_v8  ;;  %1354 = vmatprep.mubr.bf16.mxu0 %v4309_v9 }
  0x98   : > { %1515 = vmatprep.mubr.bf16.mxu1 %v4311_v10 }
  0x9a   : > { %v1666_v37 = vpop.permute.xlu0 %1665 }
  0x9e   : > { %1355 = vmatmul.mubr.bf16.gmra.mxu0 %v4313_v11  ;;  %v1671_v52 = vpop.permute.xlu0 %1670  ;;  %v1681_v11 = vpop.permute.xlu1 %1680 }
  0x9f   : > { %1516 = vmatmul.mubr.bf16.gmra.mxu1 %v4314_v12  ;;  %1362 = vmatprep.mubr.bf16.mxu0 %v4315_v13 }
  0xa0   : > { %1523 = vmatprep.mubr.bf16.mxu1 %v4317_v14 }
  0xa6   : > { %1363 = vmatmul.mubr.bf16.gmra.mxu0 %v4319_v15 }
  0xa7   : > { %1524 = vmatmul.mubr.bf16.gmra.mxu1 %v4320_v16  ;;  %3990 = vmatprep.mubr.bf16.mxu0 %v4337_v17 }
  0xae   : > { %3991 = vmatmul.mubr.bf16.vlgmr.msra.gmra.mxu0 %v4338_v18 }
  0xaf   : > { %3994 = vmatprep.mubr.bf16.mxu0 %v4339_v19  ;;  %4071 = vmatpush3.bf16.msra.mxu0 %v4353_v48 }
  0xb0   : > { %4072 = vmatprep.subr.bf16.mxu0 %v4355_v50 }
  0xb3   : > { %4073 = vmatpush3.bf16.msra.mxu0 %v4355_v50 }
  0xb4   : > { %4074 = vmatprep.subr.bf16.mxu0 %v4357_v61 }
  0xb6   : > { %3995 = vmatmul.mubr.bf16.gmra.mxu0 %v4340_v20 }
  0xb7   : > { %3998 = vmatprep.mubr.bf16.mxu0 %v4341_v21  ;;  %4075 = vmatpush3.bf16.msra.mxu0 %v4357_v61  ;;  %v4356_v21 = vld [vmem:[%s4956_s8 + $0x30] sm:$0xff]  }
  0xb8   : > { %4076 = vmatprep.subr.bf16.mxu0 %v4359_v7 }
  0xbb   : > { %4077 = vmatpush3.bf16.msra.mxu0 %v4359_v7 }
  0xbe   : > { %3999 = vmatmul.mubr.bf16.gmra.mxu0 %v4342_v22 }
  0xbf   : > { %4002 = vmatprep.mubr.bf16.mxu0 %v4343_v23 }
  0xc6   : > { %4003 = vmatmul.mubr.bf16.gmra.mxu0 %v4344_v24 }
  0xc7   : > { %4006 = vmatprep.mubr.bf16.mxu0 %v4345_v25 }
  0xce   : > { %4007 = vmatmul.mubr.bf16.gmra.mxu0 %v4346_v26 }
  0xcf   : > { %4010 = vmatprep.mubr.bf16.mxu0 %v4347_v27 }
  0xd6   : > { %4011 = vmatmul.mubr.bf16.gmra.mxu0 %v4348_v28  ;;  %v1686_v28 = vpop.permute.xlu0 %1685 }
  0xd7   : > { %4014 = vmatprep.mubr.bf16.mxu0 %v4349_v29 }
  0xde   : > { %4015 = vmatmul.mubr.bf16.gmra.mxu0 %v4350_v30 }
  0xdf   : > { %4018 = vmatprep.mubr.bf16.mxu0 %v4351_v31  ;;  %v4358_v31 = vld [vmem:[%s4956_s8 + $0x28] sm:$0xff]  }
  0xe6   : > { %4019 = vmatmul.mubr.bf16.gmra.mxu0 %v4352_v33 }
  0xee   : > { %v3670_v32 = vpop.f32.mrf.mxu0 }
  0xef   : > { %v3782_v34 = vpop.f32.mrf.mxu1 }
  0xf0   : > { %v3671_v35 = vpop.f32.mrf.mxu0 }
  0xf1   : > { %v3783_v36 = vpop.f32.mrf.mxu1  ;;  %v3672_v38 = vadd.f32 %v3671_v35, %v3670_v32  ;;  %v1691_v32 = vpop.permute.xlu1 %1690 }
  0xf2   : > { %v3784_v39 = vadd.f32 %v3783_v36, %v3782_v34  ;;  %v3673_v40 = vpop.f32.mrf.mxu0 }
  0xf3   : > { %v3785_v41 = vpop.f32.mrf.mxu1 }
  0xf4   : > { %v3674_v42 = vpop.f32.mrf.mxu0  ;;  %v1406_v45 = vadd.f32 %v3784_v39, %v3672_v38 }
  0xf5   : > { %v3675_v43 = vadd.f32 %v3674_v42, %v3673_v40  ;;  %v3786_v44 = vpop.f32.mrf.mxu1  ;;  %v4360_v42 = vld [vmem:[%s4956_s8 + $0x20] sm:$0xff]  }
  0xf6   : > { %v3787_v46 = vadd.f32 %v3786_v44, %v3785_v41  ;;  %v3676_v47 = vpop.f32.mrf.mxu0  ;;  %v1823_v56 = vmul.f32 %v1666_v37, %v1406_v45 }
  0xf7   : > { %v3788_v51 = vpop.f32.mrf.mxu1 }
  0xf8   : > { %v1409_v53 = vadd.f32 %v3787_v46, %v3675_v43  ;;  %v3677_v54 = vpop.f32.mrf.mxu0 }
  0xf9   : > { %v3789_v55 = vpop.f32.mrf.mxu1  ;;  %v3678_v58 = vadd.f32 %v3677_v54, %v3676_v47 }
  0xfa   : > { %v1824_v57 = vmul.f32 %v1671_v52, %v1409_v53  ;;  %v3790_v59 = vadd.f32 %v3789_v55, %v3788_v51  ;;  %v3679_v60 = vpop.f32.mrf.mxu0  ;;  %v1701_v52 = vpop.permute.xlu1 %1700 }
  0xfb   : > { %v3791_v63 = vpop.f32.mrf.mxu1 }
  0xfc   : > { %v1855_v0 = vpack.c.bf16 %v1824_v57, %v1823_v56  ;;  %v3680_v1 = vpop.f32.mrf.mxu0  ;;  %v1414_v4 = vadd.f32 %v3790_v59, %v3678_v58 }
  0xfd   : > { %v3681_v2 = vadd.f32 %v3680_v1, %v3679_v60  ;;  %v3792_v3 = vpop.f32.mrf.mxu1 }
  0xfe   : > { %v3793_v5 = vadd.f32 %v3792_v3, %v3791_v63  ;;  %4038 = vmatprep.mubr.bf16.mxu1 %v1855_v0  ;;  %v3682_v6 = vpop.f32.mrf.mxu0  ;;  %v1825_v13 = vmul.f32 %v1676_v62, %v1414_v4  ;;  %v1711_v7 = vpop.permute.xlu1 %1710 }
  0xff   : > { %v3794_v8 = vpop.f32.mrf.mxu1 }
 0x100   : > { %v1417_v9 = vadd.f32 %v3793_v5, %v3681_v2  ;;  %v3683_v10 = vpop.f32.mrf.mxu0 }
 0x101   : > { %v3795_v12 = vpop.f32.mrf.mxu1  ;;  %v3684_v15 = vadd.f32 %v3683_v10, %v3682_v6 }
 0x102   : > { %v1826_v14 = vmul.f32 %v1681_v11, %v1417_v9  ;;  %v3796_v16 = vadd.f32 %v3795_v12, %v3794_v8  ;;  %v3685_v17 = vpop.f32.mrf.mxu0 }
 0x103   : > { %v3797_v18 = vpop.f32.mrf.mxu1 }
 0x104   : > { %v1856_v19 = vpack.c.bf16 %v1826_v14, %v1825_v13  ;;  %v3686_v20 = vpop.f32.mrf.mxu0  ;;  %v1422_v24 = vadd.f32 %v3796_v16, %v3684_v15 }
 0x105   : > { %v3687_v22 = vadd.f32 %v3686_v20, %v3685_v17  ;;  %v3798_v23 = vpop.f32.mrf.mxu1 }
 0x106   : > { %v3799_v25 = vadd.f32 %v3798_v23, %v3797_v18  ;;  %4039 = vmatmul.mubr.bf16.vlgmr.msra.gmra.mxu1 %v1856_v19  ;;  %v3688_v26 = vpop.f32.mrf.mxu0  ;;  %v1827_v34 = vmul.f32 %v1686_v28, %v1422_v24 }
 0x107   : > { %v3800_v27 = vpop.f32.mrf.mxu1  ;;  %4119 = vmatpush3.bf16.msra.mxu1 %v4354_v49  ;;  %v1696_v49 = vpop.permute.xlu0 %1695 }
 0x108   : > { %v1425_v29 = vadd.f32 %v3799_v25, %v3687_v22  ;;  %v3689_v30 = vpop.f32.mrf.mxu0  ;;  %4120 = vmatprep.subr.bf16.mxu1 %v4356_v21 }
 0x109   : > { %v3801_v33 = vpop.f32.mrf.mxu1  ;;  %v3690_v36 = vadd.f32 %v3689_v30, %v3688_v26  ;;  %v1721_v26 = vpop.permute.xlu1 %1720 }
 0x10a   : > { %v1828_v35 = vmul.f32 %v1691_v32, %v1425_v29  ;;  %v3802_v37 = vadd.f32 %v3801_v33, %v3800_v27  ;;  %v3691_v38 = vpop.f32.mrf.mxu0 }
 0x10b   : > { %v3803_v39 = vpop.f32.mrf.mxu1  ;;  %4121 = vmatpush3.bf16.msra.mxu1 %v4356_v21  ;;  %v1706_v4 = vpop.permute.xlu0 %1705 }
 0x10c   : > { %v3692_v40 = vpop.f32.mrf.mxu0  ;;  %v1857_v41 = vpack.c.bf16 %v1828_v35, %v1827_v34  ;;  %4122 = vmatprep.subr.bf16.mxu1 %v4358_v31  ;;  %v1430_v45 = vadd.f32 %v3802_v37, %v3690_v36 }
 0x10d   : > { %v3693_v43 = vadd.f32 %v3692_v40, %v3691_v38  ;;  %v3804_v44 = vpop.f32.mrf.mxu1 }
 0x10e   : > { %v3805_v46 = vadd.f32 %v3804_v44, %v3803_v39  ;;  %4042 = vmatprep.mubr.bf16.mxu1 %v1857_v41  ;;  %v3694_v47 = vpop.f32.mrf.mxu0  ;;  %v1829_v54 = vmul.f32 %v1696_v49, %v1430_v45  ;;  %v1731_v45 = vpop.permute.xlu1 %1730 }
 0x10f   : > { %v3806_v48 = vpop.f32.mrf.mxu1  ;;  %4123 = vmatpush3.bf16.msra.mxu1 %v4358_v31  ;;  %v1716_v23 = vpop.permute.xlu0 %1715 }
 0x110   : > { %v1433_v50 = vadd.f32 %v3805_v46, %v3693_v43  ;;  %v3695_v51 = vpop.f32.mrf.mxu0  ;;  %4124 = vmatprep.subr.bf16.mxu1 %v4360_v42 }
 0x111   : > { %v3807_v53 = vpop.f32.mrf.mxu1  ;;  %v3696_v56 = vadd.f32 %v3695_v51, %v3694_v47 }
 0x112   : > { %v1830_v55 = vmul.f32 %v1701_v52, %v1433_v50  ;;  %v3808_v57 = vadd.f32 %v3807_v53, %v3806_v48  ;;  %v3697_v58 = vpop.f32.mrf.mxu0 }
 0x113   : > { %v3809_v59 = vpop.f32.mrf.mxu1  ;;  %4125 = vmatpush3.bf16.msra.mxu1 %v4360_v42  ;;  %v1726_v42 = vpop.permute.xlu0 %1725 }
 0x114   : > { %v3698_v60 = vpop.f32.mrf.mxu0  ;;  %v1858_v61 = vpack.c.bf16 %v1830_v55, %v1829_v54  ;;  %v1438_v0 = vadd.f32 %v3808_v57, %v3696_v56 }
 0x115   : > { %v3699_v62 = vadd.f32 %v3698_v60, %v3697_v58  ;;  %v3810_v63 = vpop.f32.mrf.mxu1 }
 0x116   : > { %v3811_v1 = vadd.f32 %v3810_v63, %v3809_v59  ;;  %4043 = vmatmul.mubr.bf16.gmra.mxu1 %v1858_v61  ;;  %v3700_v2 = vpop.f32.mrf.mxu0  ;;  %v1831_v9 = vmul.f32 %v1706_v4, %v1438_v0  ;;  %v1741_v0 = vpop.permute.xlu1 %1740 }
 0x117   : > { %v3812_v3 = vpop.f32.mrf.mxu1  ;;  %v1736_v61 = vpop.permute.xlu0 %1735 }
 0x118   : > { %v1441_v5 = vadd.f32 %v3811_v1, %v3699_v62  ;;  %v3701_v6 = vpop.f32.mrf.mxu0 }
 0x119   : > { %v3813_v8 = vpop.f32.mrf.mxu1  ;;  %v3702_v11 = vadd.f32 %v3701_v6, %v3700_v2 }
 0x11a   : > { %v1832_v10 = vmul.f32 %v1711_v7, %v1441_v5  ;;  %v3814_v12 = vadd.f32 %v3813_v8, %v3812_v3  ;;  %v3703_v13 = vpop.f32.mrf.mxu0 }
 0x11b   : > { %v3815_v14 = vpop.f32.mrf.mxu1 }
 0x11c   : > { %v3704_v15 = vpop.f32.mrf.mxu0  ;;  %v1859_v16 = vpack.c.bf16 %v1832_v10, %v1831_v9  ;;  %v1446_v19 = vadd.f32 %v3814_v12, %v3702_v11 }
 0x11d   : > { %v3705_v17 = vadd.f32 %v3704_v15, %v3703_v13  ;;  %v3816_v18 = vpop.f32.mrf.mxu1 }
 0x11e   : > { %v3817_v20 = vadd.f32 %v3816_v18, %v3815_v14  ;;  %4046 = vmatprep.mubr.bf16.mxu1 %v1859_v16  ;;  %v3706_v21 = vpop.f32.mrf.mxu0  ;;  %v1833_v28 = vmul.f32 %v1716_v23, %v1446_v19  ;;  %v1746_v16 = vpop.permute.xlu0 %1745 }
 0x11f   : > { %v3818_v22 = vpop.f32.mrf.mxu1  ;;  %v1751_v19 = vpop.permute.xlu1 %1750 }
 0x120   : > { %v1449_v24 = vadd.f32 %v3817_v20, %v3705_v17  ;;  %v3707_v25 = vpop.f32.mrf.mxu0 }
 0x121   : > { %v3819_v27 = vpop.f32.mrf.mxu1  ;;  %v3708_v30 = vadd.f32 %v3707_v25, %v3706_v21 }
 0x122   : > { %v1834_v29 = vmul.f32 %v1721_v26, %v1449_v24  ;;  %v3820_v31 = vadd.f32 %v3819_v27, %v3818_v22  ;;  %v3709_v32 = vpop.f32.mrf.mxu0 }
 0x123   : > { %v3821_v33 = vpop.f32.mrf.mxu1 }
 0x124   : > { %v3710_v34 = vpop.f32.mrf.mxu0  ;;  %v1860_v35 = vpack.c.bf16 %v1834_v29, %v1833_v28  ;;  %v1454_v38 = vadd.f32 %v3820_v31, %v3708_v30 }
 0x125   : > { %v3711_v36 = vadd.f32 %v3710_v34, %v3709_v32  ;;  %v3822_v37 = vpop.f32.mrf.mxu1 }
 0x126   : > { %v3823_v39 = vadd.f32 %v3822_v37, %v3821_v33  ;;  %4047 = vmatmul.mubr.bf16.gmra.mxu1 %v1860_v35  ;;  %v3712_v40 = vpop.f32.mrf.mxu0  ;;  %v1835_v47 = vmul.f32 %v1726_v42, %v1454_v38  ;;  %v1756_v35 = vpop.permute.xlu0 %1755 }
 0x127   : > { %v3824_v41 = vpop.f32.mrf.mxu1  ;;  %v1761_v38 = vpop.permute.xlu1 %1760 }
 0x128   : > { %v1457_v43 = vadd.f32 %v3823_v39, %v3711_v36  ;;  %v3713_v44 = vpop.f32.mrf.mxu0 }
 0x129   : > { %v3825_v46 = vpop.f32.mrf.mxu1  ;;  %v3714_v49 = vadd.f32 %v3713_v44, %v3712_v40 }
 0x12a   : > { %v1836_v48 = vmul.f32 %v1731_v45, %v1457_v43  ;;  %v3826_v50 = vadd.f32 %v3825_v46, %v3824_v41  ;;  %v3715_v51 = vpop.f32.mrf.mxu0 }
 0x12b   : > { %v3827_v52 = vpop.f32.mrf.mxu1 }
 0x12c   : > { %v3716_v53 = vpop.f32.mrf.mxu0  ;;  %v1861_v54 = vpack.c.bf16 %v1836_v48, %v1835_v47  ;;  %v1462_v57 = vadd.f32 %v3826_v50, %v3714_v49  ;;  %v4361_v48 = vld [vmem:[%s4955_s7 + $0x18] sm:$0xff]  }
 0x12d   : > { %v3717_v55 = vadd.f32 %v3716_v53, %v3715_v51  ;;  %v3828_v56 = vpop.f32.mrf.mxu1  ;;  %v4362_v49 = vld [vmem:[%s4956_s8 + $0x18] sm:$0xff]   ;;  %4078 = vmatprep.subr.bf16.mxu0 %v4361_v48 }
 0x12e   : > { %v3829_v58 = vadd.f32 %v3828_v56, %v3827_v52  ;;  %4050 = vmatprep.mubr.bf16.mxu1 %v1861_v54  ;;  %v3718_v59 = vpop.f32.mrf.mxu0  ;;  %v1837_v2 = vmul.f32 %v1736_v61, %v1462_v57  ;;  %4126 = vmatprep.subr.bf16.mxu1 %v4362_v49  ;;  %v1766_v56 = vpop.permute.xlu0 %1765 }
 0x12f   : > { %v3830_v60 = vpop.f32.mrf.mxu1  ;;  %4079 = vmatpush3.bf16.msra.mxu0 %v4361_v48  ;;  %4127 = vmatpush3.bf16.msra.mxu1 %v4362_v49  ;;  %v1771_v61 = vpop.permute.xlu1 %1770 }
 0x130   : > { %v1465_v62 = vadd.f32 %v3829_v58, %v3717_v55  ;;  %v3719_v63 = vpop.f32.mrf.mxu0 }
 0x131   : > { %v3831_v1 = vpop.f32.mrf.mxu1  ;;  %v3720_v4 = vadd.f32 %v3719_v63, %v3718_v59  ;;  %v4363_v59 = vld [vmem:[%s4955_s7 + $0x10] sm:$0xff]  }
 0x132   : > { %v1838_v3 = vmul.f32 %v1741_v0, %v1465_v62  ;;  %v3832_v5 = vadd.f32 %v3831_v1, %v3830_v60  ;;  %v3721_v6 = vpop.f32.mrf.mxu0  ;;  %v4364_v60 = vld [vmem:[%s4956_s8 + $0x10] sm:$0xff]   ;;  %4080 = vmatprep.subr.bf16.mxu0 %v4363_v59 }
 0x133   : > { %v3833_v7 = vpop.f32.mrf.mxu1  ;;  %4128 = vmatprep.subr.bf16.mxu1 %v4364_v60  ;;  %4081 = vmatpush3.bf16.msra.mxu0 %v4363_v59 }
 0x134   : > { %v3722_v8 = vpop.f32.mrf.mxu0  ;;  %v1862_v9 = vpack.c.bf16 %v1838_v3, %v1837_v2  ;;  %v1470_v12 = vadd.f32 %v3832_v5, %v3720_v4  ;;  %4129 = vmatpush3.bf16.msra.mxu1 %v4364_v60 }
 0x135   : > { %v3723_v10 = vadd.f32 %v3722_v8, %v3721_v6  ;;  %v3834_v11 = vpop.f32.mrf.mxu1  ;;  %v4366_v8 = vld [vmem:[%s4956_s8 + $0x8] sm:$0xff]  }
 0x136   : > { %v3835_v13 = vadd.f32 %v3834_v11, %v3833_v7  ;;  %4051 = vmatmul.mubr.bf16.gmra.mxu1 %v1862_v9  ;;  %v3724_v14 = vpop.f32.mrf.mxu0  ;;  %v1839_v21 = vmul.f32 %v1746_v16, %v1470_v12  ;;  %v4365_v7 = vld [vmem:[%s4955_s7 + $0x8] sm:$0xff]   ;;  %4130 = vmatprep.subr.bf16.mxu1 %v4366_v8 }
 0x137   : > { %v3836_v15 = vpop.f32.mrf.mxu1  ;;  %4082 = vmatprep.subr.bf16.mxu0 %v4365_v7 }
 0x138   : > { %v1473_v17 = vadd.f32 %v3835_v13, %v3723_v10  ;;  %v3725_v18 = vpop.f32.mrf.mxu0  ;;  %4083 = vmatpush3.bf16.msra.mxu0 %v4365_v7  ;;  %4131 = vmatpush3.bf16.msra.mxu1 %v4366_v8 }
 0x139   : > { %v3837_v20 = vpop.f32.mrf.mxu1  ;;  %v3726_v23 = vadd.f32 %v3725_v18, %v3724_v14  ;;  %v4367_v18 = vld [vmem:[%s4955_s7] sm:$0xff]  }
 0x13a   : > { %v1840_v22 = vmul.f32 %v1751_v19, %v1473_v17  ;;  %v3838_v24 = vadd.f32 %v3837_v20, %v3836_v15  ;;  %v3727_v25 = vpop.f32.mrf.mxu0  ;;  %v1776_v15 = vpop.permute.xlu0 %1775  ;;  %v4368_v19 = vld [vmem:[%s4956_s8] sm:$0xff]   ;;  %4084 = vmatprep.subr.bf16.mxu0 %v4367_v18 }
 0x13b   : > { %v3839_v26 = vpop.f32.mrf.mxu1  ;;  %v1781_v20 = vpop.permute.xlu1 %1780  ;;  %4132 = vmatprep.subr.bf16.mxu1 %v4368_v19 }
 0x13c   : > { %v3728_v27 = vpop.f32.mrf.mxu0  ;;  %v1863_v28 = vpack.c.bf16 %v1840_v22, %v1839_v21  ;;  %v1478_v31 = vadd.f32 %v3838_v24, %v3726_v23  ;;  %4085 = vmatpush3.bf16.msra.mxu0 %v4367_v18  ;;  %4133 = vmatpush3.bf16.msra.mxu1 %v4368_v19 }
 0x13d   : > { %v3729_v29 = vadd.f32 %v3728_v27, %v3727_v25  ;;  %v3840_v30 = vpop.f32.mrf.mxu1 }
 0x13e   : > { %v3841_v32 = vadd.f32 %v3840_v30, %v3839_v26  ;;  %4054 = vmatprep.mubr.bf16.mxu1 %v1863_v28  ;;  %v3730_v33 = vpop.f32.mrf.mxu0  ;;  %v1841_v40 = vmul.f32 %v1756_v35, %v1478_v31 }
 0x13f   : > { %v3842_v34 = vpop.f32.mrf.mxu1 }
 0x140   : > { %v1481_v36 = vadd.f32 %v3841_v32, %v3729_v29  ;;  %v3731_v37 = vpop.f32.mrf.mxu0 }
 0x141   : > { %v3843_v39 = vpop.f32.mrf.mxu1  ;;  %v3732_v42 = vadd.f32 %v3731_v37, %v3730_v33 }
 0x142   : > { %v1842_v41 = vmul.f32 %v1761_v38, %v1481_v36  ;;  %v3844_v43 = vadd.f32 %v3843_v39, %v3842_v34  ;;  %v3733_v44 = vpop.f32.mrf.mxu0  ;;  %v1786_v36 = vpop.permute.xlu0 %1785 }
 0x143   : > { %v3845_v45 = vpop.f32.mrf.mxu1  ;;  %v1791_v39 = vpop.permute.xlu1 %1790 }
 0x144   : > { %v3734_v46 = vpop.f32.mrf.mxu0  ;;  %v1864_v47 = vpack.c.bf16 %v1842_v41, %v1841_v40  ;;  %v1486_v52 = vadd.f32 %v3844_v43, %v3732_v42 }
 0x145   : > { %v3735_v50 = vadd.f32 %v3734_v46, %v3733_v44  ;;  %v3846_v51 = vpop.f32.mrf.mxu1 }
 0x146   : > { %v3847_v53 = vadd.f32 %v3846_v51, %v3845_v45  ;;  %4055 = vmatmul.mubr.bf16.gmra.mxu1 %v1864_v47  ;;  %v3736_v54 = vpop.f32.mrf.mxu0  ;;  %v1843_v0 = vmul.f32 %v1766_v56, %v1486_v52 }
 0x147   : > { %v3848_v55 = vpop.f32.mrf.mxu1 }
 0x148   : > { %v1489_v57 = vadd.f32 %v3847_v53, %v3735_v50  ;;  %v3737_v58 = vpop.f32.mrf.mxu0 }
 0x149   : > { %v3738_v62 = vadd.f32 %v3737_v58, %v3736_v54  ;;  %v3849_v63 = vpop.f32.mrf.mxu1  ;;  %v1801_v58 = vpop.permute.xlu1 %1800 }
 0x14a   : > { %v1844_v1 = vmul.f32 %v1771_v61, %v1489_v57  ;;  %v3850_v2 = vadd.f32 %v3849_v63, %v3848_v55  ;;  %v3739_v3 = vpop.f32.mrf.mxu0  ;;  %v1796_v55 = vpop.permute.xlu0 %1795 }
 0x14b   : > { %v3851_v4 = vpop.f32.mrf.mxu1 }
 0x14c   : > { %v3740_v5 = vpop.f32.mrf.mxu0  ;;  %v1865_v6 = vpack.c.bf16 %v1844_v1, %v1843_v0  ;;  %v1494_v9 = vadd.f32 %v3850_v2, %v3738_v62 }
 0x14d   : > { %v3741_v10 = vadd.f32 %v3740_v5, %v3739_v3  ;;  %v3852_v11 = vpop.f32.mrf.mxu1 }
 0x14e   : > { %v3853_v12 = vadd.f32 %v3852_v11, %v3851_v4  ;;  %4058 = vmatprep.mubr.bf16.mxu1 %v1865_v6  ;;  %v3742_v13 = vpop.f32.mrf.mxu0  ;;  %v1845_v21 = vmul.f32 %v1776_v15, %v1494_v9 }
 0x14f   : > { %v3854_v14 = vpop.f32.mrf.mxu1 }
 0x150   : > { %v1497_v16 = vadd.f32 %v3853_v12, %v3741_v10  ;;  %v3743_v17 = vpop.f32.mrf.mxu0  ;;  %v1806_v10 = vpop.permute.xlu0 %1805 }
 0x151   : > { %v3855_v22 = vpop.f32.mrf.mxu1  ;;  %v3744_v24 = vadd.f32 %v3743_v17, %v3742_v13  ;;  %v1811_v13 = vpop.permute.xlu1 %1810 }
 0x152   : > { %v1846_v23 = vmul.f32 %v1781_v20, %v1497_v16  ;;  %v3856_v25 = vadd.f32 %v3855_v22, %v3854_v14  ;;  %v3745_v26 = vpop.f32.mrf.mxu0 }
 0x153   : > { %v3857_v27 = vpop.f32.mrf.mxu1 }
 0x154   : > { %v3746_v28 = vpop.f32.mrf.mxu0  ;;  %v1866_v29 = vpack.c.bf16 %v1846_v23, %v1845_v21  ;;  %v1502_v32 = vadd.f32 %v3856_v25, %v3744_v24 }
 0x155   : > { %v3747_v30 = vadd.f32 %v3746_v28, %v3745_v26  ;;  %v3858_v31 = vpop.f32.mrf.mxu1  ;;  %v1816_v28 = vpop.permute.xlu0 %1815 }
 0x156   : > { %v3859_v33 = vadd.f32 %v3858_v31, %v3857_v27  ;;  %4059 = vmatmul.mubr.bf16.gmra.mxu1 %v1866_v29  ;;  %v3748_v34 = vpop.f32.mrf.mxu0  ;;  %v1847_v41 = vmul.f32 %v1786_v36, %v1502_v32  ;;  %v1821_v29 = vpop.permute.xlu1 %1820 }
 0x157   : > { %v3860_v35 = vpop.f32.mrf.mxu1 }
 0x158   : > { %v1505_v37 = vadd.f32 %v3859_v33, %v3747_v30  ;;  %v3749_v38 = vpop.f32.mrf.mxu0 }
 0x159   : > { %v3861_v40 = vpop.f32.mrf.mxu1  ;;  %v3750_v43 = vadd.f32 %v3749_v38, %v3748_v34 }
 0x15a   : > { %v1848_v42 = vmul.f32 %v1791_v39, %v1505_v37  ;;  %v3862_v44 = vadd.f32 %v3861_v40, %v3860_v35  ;;  %v3751_v45 = vpop.f32.mrf.mxu0 }
 0x15b   : > { %v3863_v46 = vpop.f32.mrf.mxu1 }
 0x15c   : > { %v3752_v47 = vpop.f32.mrf.mxu0  ;;  %v1867_v48 = vpack.c.bf16 %v1848_v42, %v1847_v41  ;;  %v1510_v51 = vadd.f32 %v3862_v44, %v3750_v43  ;;  %v4806_v42 = vld [vmem:[%s4954_s6] ss:$0 sm:$0xff] }
 0x15d   : > { %v3753_v49 = vadd.f32 %v3752_v47, %v3751_v45  ;;  %v3864_v50 = vpop.f32.mrf.mxu1 }
 0x15e   : > { %v3865_v52 = vadd.f32 %v3864_v50, %v3863_v46  ;;  %4062 = vmatprep.mubr.bf16.mxu1 %v1867_v48  ;;  %v3754_v53 = vpop.f32.mrf.mxu0  ;;  %v1849_v60 = vmul.f32 %v1796_v55, %v1510_v51 }
 0x15f   : > { %v3866_v54 = vpop.f32.mrf.mxu1 }
 0x160   : > { %v1513_v56 = vadd.f32 %v3865_v52, %v3753_v49  ;;  %v3755_v57 = vpop.f32.mrf.mxu0 }
 0x161   : > { %v3867_v59 = vpop.f32.mrf.mxu1  ;;  %v3756_v62 = vadd.f32 %v3755_v57, %v3754_v53 }
 0x162   : > { %v1850_v61 = vmul.f32 %v1801_v58, %v1513_v56  ;;  %v3868_v63 = vadd.f32 %v3867_v59, %v3866_v54  ;;  %v3757_v0 = vpop.f32.mrf.mxu0 }
 0x163   : > { %v3869_v1 = vpop.f32.mrf.mxu1 }
 0x164   : > { %v3758_v2 = vpop.f32.mrf.mxu0  ;;  %v1868_v3 = vpack.c.bf16 %v1850_v61, %v1849_v60  ;;  %v1518_v6 = vadd.f32 %v3868_v63, %v3756_v62 }
 0x165   : > { %v3759_v4 = vadd.f32 %v3758_v2, %v3757_v0  ;;  %v3870_v5 = vpop.f32.mrf.mxu1 }
 0x166   : > { %v3871_v7 = vadd.f32 %v3870_v5, %v3869_v1  ;;  %4063 = vmatmul.mubr.bf16.gmra.mxu1 %v1868_v3  ;;  %v3760_v8 = vpop.f32.mrf.mxu0  ;;  %v1851_v15 = vmul.f32 %v1806_v10, %v1518_v6 }
 0x167   : > { %v3872_v9 = vpop.f32.mrf.mxu1 }
 0x168   : > { %v1521_v11 = vadd.f32 %v3871_v7, %v3759_v4  ;;  %v3761_v12 = vpop.f32.mrf.mxu0 }
 0x169   : > { %v3873_v14 = vpop.f32.mrf.mxu1  ;;  %v3762_v17 = vadd.f32 %v3761_v12, %v3760_v8 }
 0x16a   : > { %v1852_v16 = vmul.f32 %v1811_v13, %v1521_v11  ;;  %v3874_v18 = vadd.f32 %v3873_v14, %v3872_v9  ;;  %v3763_v19 = vpop.f32.mrf.mxu0 }
 0x16b   : > { %v3875_v20 = vpop.f32.mrf.mxu1 }
 0x16c   : > { %v3764_v21 = vpop.f32.mrf.mxu0  ;;  %v1869_v22 = vpack.c.bf16 %v1852_v16, %v1851_v15  ;;  %v1526_v25 = vadd.f32 %v3874_v18, %v3762_v17 }
 0x16d   : > { %v3765_v23 = vadd.f32 %v3764_v21, %v3763_v19  ;;  %v3876_v24 = vpop.f32.mrf.mxu1 }
 0x16e   : > { %v3877_v26 = vadd.f32 %v3876_v24, %v3875_v20  ;;  %4066 = vmatprep.mubr.bf16.mxu1 %v1869_v22  ;;  %v1853_v30 = vmul.f32 %v1816_v28, %v1526_v25  ;;  %v3992_v33 = vpop.f32.mrf.mxu0 }
 0x170   : > { %v1529_v27 = vadd.f32 %v3877_v26, %v3765_v23  ;;  %v2113_v34 = vpop.f32.mrf.mxu0 }
 0x172   : > { %v1854_v31 = vmul.f32 %v1821_v29, %v1529_v27  ;;  %v3993_v36 = vpop.f32.mrf.mxu0 }
 0x174   : > { %v1870_v32 = vpack.c.bf16 %v1854_v31, %v1853_v30  ;;  %v2116_v41 = vpop.f32.mrf.mxu0 }
 0x176   : > { %4067 = vmatmul.mubr.bf16.gmra.mxu1 %v1870_v32  ;;  %v3996_v49 = vpop.f32.mrf.mxu0 }
 0x178   : > { %v2129_v55 = vpop.f32.mrf.mxu0 }
 0x17a   : > { %v3997_v59 = vpop.f32.mrf.mxu0 }
 0x17c   : > { %v2132_v0 = vpop.f32.mrf.mxu0 }
 0x17e   : > { %v4000_v7 = vpop.f32.mrf.mxu0 }
 0x180   : > { %v2145_v13 = vpop.f32.mrf.mxu0 }
 0x182   : > { %v4001_v17 = vpop.f32.mrf.mxu0 }
 0x184   : > { %v2148_v22 = vpop.f32.mrf.mxu0 }
 0x186   : > { %v4004_v29 = vpop.f32.mrf.mxu0 }
 0x1c6   : > { %v4040_v35 = vpop.f32.mrf.mxu1 }
 0x1c7   : > { %v2331_v39 = vadd.f32 %v4040_v35, %v3992_v33  ;;  %v2161_v35 = vpop.f32.mrf.mxu0 }
 0x1c8   : > { %v2322_v37 = vpop.f32.mrf.mxu1 }
 0x1c9   : > { %v2323_v38 = vadd.f32 %v2322_v37, %v2113_v34  ;;  %v2458_v48 = vadd.f32 %v4806_v42, %v2331_v39  ;;  %v4005_v39 = vpop.f32.mrf.mxu0 }
 0x1ca   : > { %v4041_v40 = vpop.f32.mrf.mxu1 }
 0x1cb   : > { %v2334_v43 = vadd.f32 %v4041_v40, %v3993_v36  ;;  %v2456_v45 = vadd.f32 %v4806_v42, %v2323_v38  ;;  %v2490_v54 = vmax.f32 %v2458_v48, 0.0 }
 0x1cc   : > { %v2325_v44 = vpop.f32.mrf.mxu1 }
 0x1cd   : > { %v2459_v46 = vadd.f32 %v4806_v42, %v2334_v43  ;;  %v2326_v47 = vadd.f32 %v2325_v44, %v2116_v41  ;;  %v2488_v52 = vmax.f32 %v2456_v45, 0.0  ;;  %v2164_v45 = vpop.f32.mrf.mxu0 }
 0x1cf   : > { %v2457_v50 = vadd.f32 %v4806_v42, %v2326_v47  ;;  %v2491_v51 = vmax.f32 %v2459_v46, 0.0 }
 0x1d1   : > { %v2489_v53 = vmax.f32 %v2457_v50, 0.0  ;;  %v2521_v57 = vpack.c.bf16 %v2491_v51, %v2490_v54 }
 0x1d3   : > { %v2520_v56 = vpack.c.bf16 %v2489_v53, %v2488_v52  ;;  %v4008_v52 = vpop.f32.mrf.mxu0 }
 0x1d5   : > { %4086 = vmatprep.mubr.bf16.mxu0 %v2520_v56  ;;  %4134 = vmatprep.mubr.bf16.mxu1 %v2520_v56 }
 0x1d6   : > { %v4044_v58 = vpop.f32.mrf.mxu1  ;;  %4087 = vmatmul.mubr.bf16.vlgmr.msra.gmra.mxu0 %v2521_v57  ;;  %4135 = vmatmul.mubr.bf16.vlgmr.msra.gmra.mxu1 %v2521_v57 }
 0x1d7   : > { %v2347_v62 = vadd.f32 %v4044_v58, %v3996_v49  ;;  %v2177_v58 = vpop.f32.mrf.mxu0 }
 0x1d8   : > { %v2338_v60 = vpop.f32.mrf.mxu1 }
 0x1d9   : > { %v2339_v61 = vadd.f32 %v2338_v60, %v2129_v55  ;;  %v2462_v6 = vadd.f32 %v4806_v42, %v2347_v62  ;;  %v4009_v62 = vpop.f32.mrf.mxu0 }
 0x1da   : > { %v4045_v63 = vpop.f32.mrf.mxu1 }
 0x1db   : > { %v2350_v1 = vadd.f32 %v4045_v63, %v3997_v59  ;;  %v2460_v3 = vadd.f32 %v4806_v42, %v2339_v61  ;;  %v2494_v12 = vmax.f32 %v2462_v6, 0.0 }
 0x1dc   : > { %v2341_v2 = vpop.f32.mrf.mxu1 }
 0x1dd   : > { %v2463_v4 = vadd.f32 %v4806_v42, %v2350_v1  ;;  %v2342_v5 = vadd.f32 %v2341_v2, %v2132_v0  ;;  %v2492_v10 = vmax.f32 %v2460_v3, 0.0  ;;  %v2180_v3 = vpop.f32.mrf.mxu0 }
 0x1df   : > { %v2461_v8 = vadd.f32 %v4806_v42, %v2342_v5  ;;  %v2495_v9 = vmax.f32 %v2463_v4, 0.0 }
 0x1e1   : > { %v2493_v11 = vmax.f32 %v2461_v8, 0.0  ;;  %v2523_v15 = vpack.c.bf16 %v2495_v9, %v2494_v12 }
 0x1e3   : > { %v2522_v14 = vpack.c.bf16 %v2493_v11, %v2492_v10  ;;  %v4012_v10 = vpop.f32.mrf.mxu0 }
 0x1e5   : > { %4090 = vmatprep.mubr.bf16.mxu0 %v2522_v14  ;;  %4138 = vmatprep.mubr.bf16.mxu1 %v2522_v14 }
 0x1e6   : > { %v4048_v16 = vpop.f32.mrf.mxu1  ;;  %4091 = vmatmul.mubr.bf16.gmra.mxu0 %v2523_v15  ;;  %4139 = vmatmul.mubr.bf16.gmra.mxu1 %v2523_v15 }
 0x1e7   : > { %v2363_v20 = vadd.f32 %v4048_v16, %v4000_v7  ;;  %v2193_v16 = vpop.f32.mrf.mxu0 }
 0x1e8   : > { %v2354_v18 = vpop.f32.mrf.mxu1 }
 0x1e9   : > { %v2355_v19 = vadd.f32 %v2354_v18, %v2145_v13  ;;  %v2466_v28 = vadd.f32 %v4806_v42, %v2363_v20  ;;  %v4013_v20 = vpop.f32.mrf.mxu0 }
 0x1ea   : > { %v4049_v21 = vpop.f32.mrf.mxu1 }
 0x1eb   : > { %v2366_v23 = vadd.f32 %v4049_v21, %v4001_v17  ;;  %v2464_v25 = vadd.f32 %v4806_v42, %v2355_v19  ;;  %v2498_v34 = vmax.f32 %v2466_v28, 0.0 }
 0x1ec   : > { %v2357_v24 = vpop.f32.mrf.mxu1 }
 0x1ed   : > { %v2467_v26 = vadd.f32 %v4806_v42, %v2366_v23  ;;  %v2358_v27 = vadd.f32 %v2357_v24, %v2148_v22  ;;  %v2496_v32 = vmax.f32 %v2464_v25, 0.0  ;;  %v2196_v25 = vpop.f32.mrf.mxu0 }
 0x1ef   : > { %v2465_v30 = vadd.f32 %v4806_v42, %v2358_v27  ;;  %v2499_v31 = vmax.f32 %v2467_v26, 0.0 }
 0x1f1   : > { %v2497_v33 = vmax.f32 %v2465_v30, 0.0  ;;  %v2525_v37 = vpack.c.bf16 %v2499_v31, %v2498_v34 }
 0x1f3   : > { %v2524_v36 = vpack.c.bf16 %v2497_v33, %v2496_v32  ;;  %v4016_v32 = vpop.f32.mrf.mxu0 }
 0x1f5   : > { %4094 = vmatprep.mubr.bf16.mxu0 %v2524_v36  ;;  %4142 = vmatprep.mubr.bf16.mxu1 %v2524_v36 }
 0x1f6   : > { %v4052_v38 = vpop.f32.mrf.mxu1  ;;  %4095 = vmatmul.mubr.bf16.gmra.mxu0 %v2525_v37  ;;  %4143 = vmatmul.mubr.bf16.gmra.mxu1 %v2525_v37 }
 0x1f7   : > { %v2379_v43 = vadd.f32 %v4052_v38, %v4004_v29  ;;  %v2209_v38 = vpop.f32.mrf.mxu0 }
 0x1f8   : > { %v2370_v40 = vpop.f32.mrf.mxu1 }
 0x1f9   : > { %v2371_v41 = vadd.f32 %v2370_v40, %v2161_v35  ;;  %v2470_v51 = vadd.f32 %v4806_v42, %v2379_v43  ;;  %v4017_v43 = vpop.f32.mrf.mxu0 }
 0x1fa   : > { %v4053_v44 = vpop.f32.mrf.mxu1 }
 0x1fb   : > { %v2382_v46 = vadd.f32 %v4053_v44, %v4005_v39  ;;  %v2468_v48 = vadd.f32 %v4806_v42, %v2371_v41  ;;  %v2502_v57 = vmax.f32 %v2470_v51, 0.0 }
 0x1fc   : > { %v2373_v47 = vpop.f32.mrf.mxu1 }
 0x1fd   : > { %v2471_v49 = vadd.f32 %v4806_v42, %v2382_v46  ;;  %v2374_v50 = vadd.f32 %v2373_v47, %v2164_v45  ;;  %v2500_v55 = vmax.f32 %v2468_v48, 0.0  ;;  %v2212_v48 = vpop.f32.mrf.mxu0 }
 0x1ff   : > { %v2469_v53 = vadd.f32 %v4806_v42, %v2374_v50  ;;  %v2503_v54 = vmax.f32 %v2471_v49, 0.0 }
 0x201   : > { %v2501_v56 = vmax.f32 %v2469_v53, 0.0  ;;  %v2527_v60 = vpack.c.bf16 %v2503_v54, %v2502_v57  ;;  %v4020_v57 = vpop.f32.mrf.mxu0 }
 0x203   : > { %v2526_v59 = vpack.c.bf16 %v2501_v56, %v2500_v55 }
 0x205   : > { %4098 = vmatprep.mubr.bf16.mxu0 %v2526_v59  ;;  %4146 = vmatprep.mubr.bf16.mxu1 %v2526_v59 }
 0x206   : > { %v4056_v61 = vpop.f32.mrf.mxu1  ;;  %4099 = vmatmul.mubr.bf16.gmra.mxu0 %v2527_v60  ;;  %4147 = vmatmul.mubr.bf16.gmra.mxu1 %v2527_v60 }
 0x207   : > { %v2395_v1 = vadd.f32 %v4056_v61, %v4008_v52 }
 0x208   : > { %v2386_v63 = vpop.f32.mrf.mxu1 }
 0x209   : > { %v2387_v0 = vadd.f32 %v2386_v63, %v2177_v58  ;;  %v2474_v9 = vadd.f32 %v4806_v42, %v2395_v1  ;;  %v2225_v63 = vpop.f32.mrf.mxu0 }
 0x20a   : > { %v4057_v2 = vpop.f32.mrf.mxu1 }
 0x20b   : > { %v2398_v4 = vadd.f32 %v4057_v2, %v4009_v62  ;;  %v2472_v6 = vadd.f32 %v4806_v42, %v2387_v0  ;;  %v2506_v15 = vmax.f32 %v2474_v9, 0.0  ;;  %v4021_v1 = vpop.f32.mrf.mxu0 }
 0x20c   : > { %v2389_v5 = vpop.f32.mrf.mxu1 }
 0x20d   : > { %v2475_v7 = vadd.f32 %v4806_v42, %v2398_v4  ;;  %v2390_v8 = vadd.f32 %v2389_v5, %v2180_v3  ;;  %v2504_v13 = vmax.f32 %v2472_v6, 0.0 }
 0x20f   : > { %v2473_v11 = vadd.f32 %v4806_v42, %v2390_v8  ;;  %v2507_v12 = vmax.f32 %v2475_v7, 0.0  ;;  %v2228_v7 = vpop.f32.mrf.mxu0 }
 0x211   : > { %v2505_v14 = vmax.f32 %v2473_v11, 0.0  ;;  %v2529_v18 = vpack.c.bf16 %v2507_v12, %v2506_v15 }
 0x213   : > { %v2528_v17 = vpack.c.bf16 %v2505_v14, %v2504_v13 }
 0x215   : > { %4102 = vmatprep.mubr.bf16.mxu0 %v2528_v17  ;;  %4150 = vmatprep.mubr.bf16.mxu1 %v2528_v17 }
 0x216   : > { %v4060_v19 = vpop.f32.mrf.mxu1  ;;  %4103 = vmatmul.mubr.bf16.gmra.mxu0 %v2529_v18  ;;  %4151 = vmatmul.mubr.bf16.gmra.mxu1 %v2529_v18 }
 0x217   : > { %v2411_v23 = vadd.f32 %v4060_v19, %v4012_v10 }
 0x218   : > { %v2402_v21 = vpop.f32.mrf.mxu1 }
 0x219   : > { %v2403_v22 = vadd.f32 %v2402_v21, %v2193_v16  ;;  %v2478_v31 = vadd.f32 %v4806_v42, %v2411_v23 }
 0x21a   : > { %v4061_v24 = vpop.f32.mrf.mxu1 }
 0x21b   : > { %v2414_v26 = vadd.f32 %v4061_v24, %v4013_v20  ;;  %v2476_v28 = vadd.f32 %v4806_v42, %v2403_v22  ;;  %v2510_v37 = vmax.f32 %v2478_v31, 0.0  ;;  %v4843_v20 = vld [vmem:[%s4957_s9] ss:$0 sm:$0xff] }
 0x21c   : > { %v2405_v27 = vpop.f32.mrf.mxu1 }
 0x21d   : > { %v2479_v29 = vadd.f32 %v4806_v42, %v2414_v26  ;;  %v2406_v30 = vadd.f32 %v2405_v27, %v2196_v25  ;;  %v2508_v35 = vmax.f32 %v2476_v28, 0.0 }
 0x21f   : > { %v2477_v33 = vadd.f32 %v4806_v42, %v2406_v30  ;;  %v2511_v34 = vmax.f32 %v2479_v29, 0.0 }
 0x221   : > { %v2509_v36 = vmax.f32 %v2477_v33, 0.0  ;;  %v2531_v40 = vpack.c.bf16 %v2511_v34, %v2510_v37 }
 0x223   : > { %v2530_v39 = vpack.c.bf16 %v2509_v36, %v2508_v35 }
 0x225   : > { %4106 = vmatprep.mubr.bf16.mxu0 %v2530_v39  ;;  %4154 = vmatprep.mubr.bf16.mxu1 %v2530_v39 }
 0x226   : > { %v4064_v41 = vpop.f32.mrf.mxu1  ;;  %4107 = vmatmul.mubr.bf16.gmra.mxu0 %v2531_v40  ;;  %4155 = vmatmul.mubr.bf16.gmra.mxu1 %v2531_v40 }
 0x227   : > { %v2427_v46 = vadd.f32 %v4064_v41, %v4016_v32 }
 0x228   : > { %v2418_v44 = vpop.f32.mrf.mxu1 }
 0x229   : > { %v2419_v45 = vadd.f32 %v2418_v44, %v2209_v38  ;;  %v2482_v54 = vadd.f32 %v4806_v42, %v2427_v46 }
 0x22a   : > { %v4065_v47 = vpop.f32.mrf.mxu1 }
 0x22b   : > { %v2430_v49 = vadd.f32 %v4065_v47, %v4017_v43  ;;  %v2480_v51 = vadd.f32 %v4806_v42, %v2419_v45  ;;  %v2514_v60 = vmax.f32 %v2482_v54, 0.0 }
 0x22c   : > { %v2421_v50 = vpop.f32.mrf.mxu1 }
 0x22d   : > { %v2483_v52 = vadd.f32 %v4806_v42, %v2430_v49  ;;  %v2422_v53 = vadd.f32 %v2421_v50, %v2212_v48  ;;  %v2512_v58 = vmax.f32 %v2480_v51, 0.0 }
 0x22f   : > { %v2481_v55 = vadd.f32 %v4806_v42, %v2422_v53  ;;  %v2515_v56 = vmax.f32 %v2483_v52, 0.0 }
 0x231   : > { %v2513_v59 = vmax.f32 %v2481_v55, 0.0  ;;  %v2533_v62 = vpack.c.bf16 %v2515_v56, %v2514_v60 }
 0x233   : > { %v2532_v61 = vpack.c.bf16 %v2513_v59, %v2512_v58 }
 0x235   : > { %4110 = vmatprep.mubr.bf16.mxu0 %v2532_v61  ;;  %4158 = vmatprep.mubr.bf16.mxu1 %v2532_v61 }
 0x236   : > { %v4068_v0 = vpop.f32.mrf.mxu1  ;;  %4111 = vmatmul.mubr.bf16.gmra.mxu0 %v2533_v62  ;;  %4159 = vmatmul.mubr.bf16.gmra.mxu1 %v2533_v62 }
 0x237   : > { %v2443_v4 = vadd.f32 %v4068_v0, %v4020_v57 }
 0x238   : > { %v2434_v2 = vpop.f32.mrf.mxu1 }
 0x239   : > { %v2435_v3 = vadd.f32 %v2434_v2, %v2225_v63  ;;  %v2486_v12 = vadd.f32 %v4806_v42, %v2443_v4 }
 0x23a   : > { %v4069_v5 = vpop.f32.mrf.mxu1 }
 0x23b   : > { %v2446_v6 = vadd.f32 %v4069_v5, %v4021_v1  ;;  %v2484_v9 = vadd.f32 %v4806_v42, %v2435_v3  ;;  %v2518_v17 = vmax.f32 %v2486_v12, 0.0 }
 0x23c   : > { %v2437_v8 = vpop.f32.mrf.mxu1 }
 0x23d   : > { %v2487_v10 = vadd.f32 %v4806_v42, %v2446_v6  ;;  %v2438_v11 = vadd.f32 %v2437_v8, %v2228_v7  ;;  %v2516_v15 = vmax.f32 %v2484_v9, 0.0 }
 0x23f   : > { %v2485_v13 = vadd.f32 %v4806_v42, %v2438_v11  ;;  %v2519_v14 = vmax.f32 %v2487_v10, 0.0 }
 0x241   : > { %v2517_v16 = vmax.f32 %v2485_v13, 0.0  ;;  %v2535_v19 = vpack.c.bf16 %v2519_v14, %v2518_v17 }
 0x243   : > { %v2534_v18 = vpack.c.bf16 %v2517_v16, %v2516_v15 }
 0x245   : > { %4114 = vmatprep.mubr.bf16.mxu0 %v2534_v18  ;;  %4162 = vmatprep.mubr.bf16.mxu1 %v2534_v18 }
 0x246   : > { %4115 = vmatmul.mubr.bf16.gmra.mxu0 %v2535_v19  ;;  %4163 = vmatmul.mubr.bf16.gmra.mxu1 %v2535_v19 }
 0x296   : > { %v4088_v21 = vpop.f32.mrf.mxu0  ;;  %v4136_v42 = vpop.f32.mrf.mxu1 }
 0x297   : > { %v3035_v22 = vadd.f32 %v4136_v42, %v4843_v20 }
 0x298   : > { %v2634_v23 = vpop.f32.mrf.mxu0  ;;  %v3026_v24 = vpop.f32.mrf.mxu1 }
 0x299   : > { %3155 = vst [vmem:[%s4850_s12 + $0x10] sm:$0xff] %v3035_v22  ;;  %v3027_v25 = vadd.f32 %v4843_v20, %v3026_v24 }
 0x29a   : > { %v4089_v26 = vpop.f32.mrf.mxu0  ;;  %v4137_v27 = vpop.f32.mrf.mxu1 }
 0x29b   : > { %3153 = vst [vmem:[%s4850_s12] sm:$0xff] %v3027_v25  ;;  %v3567_v28 = vpack.c.bf16 %v4089_v26, %v4088_v21  ;;  %v3038_v29 = vadd.f32 %v4137_v27, %v4843_v20 }
 0x29c   : > { %v2637_v30 = vpop.f32.mrf.mxu0  ;;  %v3029_v31 = vpop.f32.mrf.mxu1 }
 0x29d   : > { %3639 = vst [vmem:[%s4860_s14 + $0x8] sm:$0xff] %v3567_v28   ;;  %3156 = vst [vmem:[%s4850_s12 + $0x18] sm:$0xff] %v3038_v29  ;;  %v3562_v32 = vpack.c.bf16 %v2637_v30, %v2634_v23  ;;  %v3030_v33 = vadd.f32 %v4843_v20, %v3029_v31 }
 0x29f   : > { %3563 = vst [vmem:[%s4860_s14] sm:$0xff] %v3562_v32   ;;  %3154 = vst [vmem:[%s4850_s12 + $0x8] sm:$0xff] %v3030_v33 }
 0x2a6   : > { %v4092_v34 = vpop.f32.mrf.mxu0  ;;  %v4140_v35 = vpop.f32.mrf.mxu1 }
 0x2a7   : > { %v3051_v36 = vadd.f32 %v4140_v35, %v4843_v20 }
 0x2a8   : > { %v2650_v37 = vpop.f32.mrf.mxu0  ;;  %v3042_v38 = vpop.f32.mrf.mxu1 }
 0x2a9   : > { %3159 = vst [vmem:[%s4850_s12 + $0x30] sm:$0xff] %v3051_v36  ;;  %v3043_v39 = vadd.f32 %v4843_v20, %v3042_v38 }
 0x2aa   : > { %v4093_v40 = vpop.f32.mrf.mxu0  ;;  %v4141_v41 = vpop.f32.mrf.mxu1 }
 0x2ab   : > { %3157 = vst [vmem:[%s4850_s12 + $0x20] sm:$0xff] %v3043_v39  ;;  %v3577_v43 = vpack.c.bf16 %v4093_v40, %v4092_v34  ;;  %v3054_v44 = vadd.f32 %v4141_v41, %v4843_v20 }
 0x2ac   : > { %v2653_v45 = vpop.f32.mrf.mxu0  ;;  %v3045_v46 = vpop.f32.mrf.mxu1 }
 0x2ad   : > { %3641 = vst [vmem:[%s4860_s14 + $0x18] sm:$0xff] %v3577_v43   ;;  %3160 = vst [vmem:[%s4850_s12 + $0x38] sm:$0xff] %v3054_v44  ;;  %v3572_v47 = vpack.c.bf16 %v2653_v45, %v2650_v37  ;;  %v3046_v48 = vadd.f32 %v4843_v20, %v3045_v46 }
 0x2af   : > { %3640 = vst [vmem:[%s4860_s14 + $0x10] sm:$0xff] %v3572_v47   ;;  %3158 = vst [vmem:[%s4850_s12 + $0x28] sm:$0xff] %v3046_v48 }
 0x2b6   : > { %v4096_v49 = vpop.f32.mrf.mxu0  ;;  %v4144_v50 = vpop.f32.mrf.mxu1 }
 0x2b7   : > { %v3067_v51 = vadd.f32 %v4144_v50, %v4843_v20 }
 0x2b8   : > { %v2666_v52 = vpop.f32.mrf.mxu0  ;;  %v3058_v53 = vpop.f32.mrf.mxu1 }
 0x2b9   : > { %3163 = vst [vmem:[%s4850_s12 + $0x50] sm:$0xff] %v3067_v51  ;;  %v3059_v54 = vadd.f32 %v4843_v20, %v3058_v53 }
 0x2ba   : > { %v4097_v55 = vpop.f32.mrf.mxu0  ;;  %v4145_v56 = vpop.f32.mrf.mxu1 }
 0x2bb   : > { %3161 = vst [vmem:[%s4850_s12 + $0x40] sm:$0xff] %v3059_v54  ;;  %v3587_v57 = vpack.c.bf16 %v4097_v55, %v4096_v49  ;;  %v3070_v58 = vadd.f32 %v4145_v56, %v4843_v20 }
 0x2bc   : > { %v2669_v59 = vpop.f32.mrf.mxu0  ;;  %v3061_v60 = vpop.f32.mrf.mxu1 }
 0x2bd   : > { %3643 = vst [vmem:[%s4860_s14 + $0x28] sm:$0xff] %v3587_v57   ;;  %3164 = vst [vmem:[%s4850_s12 + $0x58] sm:$0xff] %v3070_v58  ;;  %v3582_v61 = vpack.c.bf16 %v2669_v59, %v2666_v52  ;;  %v3062_v62 = vadd.f32 %v4843_v20, %v3061_v60 }
 0x2bf   : > { %3642 = vst [vmem:[%s4860_s14 + $0x20] sm:$0xff] %v3582_v61   ;;  %3162 = vst [vmem:[%s4850_s12 + $0x48] sm:$0xff] %v3062_v62 }
 0x2c6   : > { %v4100_v63 = vpop.f32.mrf.mxu0  ;;  %v4148_v0 = vpop.f32.mrf.mxu1 }
 0x2c7   : > { %v3083_v1 = vadd.f32 %v4148_v0, %v4843_v20 }
 0x2c8   : > { %v2682_v2 = vpop.f32.mrf.mxu0  ;;  %v3074_v3 = vpop.f32.mrf.mxu1 }
 0x2c9   : > { %3167 = vst [vmem:[%s4850_s12 + $0x70] sm:$0xff] %v3083_v1  ;;  %v3075_v4 = vadd.f32 %v4843_v20, %v3074_v3 }
 0x2ca   : > { %v4101_v5 = vpop.f32.mrf.mxu0  ;;  %v4149_v6 = vpop.f32.mrf.mxu1 }
 0x2cb   : > { %3165 = vst [vmem:[%s4850_s12 + $0x60] sm:$0xff] %v3075_v4  ;;  %v3597_v7 = vpack.c.bf16 %v4101_v5, %v4100_v63  ;;  %v3086_v8 = vadd.f32 %v4149_v6, %v4843_v20 }
 0x2cc   : > { %v2685_v9 = vpop.f32.mrf.mxu0  ;;  %v3077_v10 = vpop.f32.mrf.mxu1 }
 0x2cd   : > { %3645 = vst [vmem:[%s4860_s14 + $0x38] sm:$0xff] %v3597_v7   ;;  %3168 = vst [vmem:[%s4850_s12 + $0x78] sm:$0xff] %v3086_v8  ;;  %v3592_v11 = vpack.c.bf16 %v2685_v9, %v2682_v2  ;;  %v3078_v12 = vadd.f32 %v4843_v20, %v3077_v10 }
 0x2cf   : > { %3644 = vst [vmem:[%s4860_s14 + $0x30] sm:$0xff] %v3592_v11   ;;  %3166 = vst [vmem:[%s4850_s12 + $0x68] sm:$0xff] %v3078_v12 }
 0x2d6   : > { %v4104_v13 = vpop.f32.mrf.mxu0  ;;  %v4152_v14 = vpop.f32.mrf.mxu1 }
 0x2d7   : > { %v3099_v15 = vadd.f32 %v4152_v14, %v4843_v20 }
 0x2d8   : > { %v2698_v16 = vpop.f32.mrf.mxu0  ;;  %v3090_v17 = vpop.f32.mrf.mxu1 }
 0x2d9   : > { %3171 = vst [vmem:[%s4850_s12 + $0x90] sm:$0xff] %v3099_v15  ;;  %v3091_v18 = vadd.f32 %v4843_v20, %v3090_v17 }
 0x2da   : > { %v4105_v19 = vpop.f32.mrf.mxu0  ;;  %v4153_v21 = vpop.f32.mrf.mxu1 }
 0x2db   : > { %3169 = vst [vmem:[%s4850_s12 + $0x80] sm:$0xff] %v3091_v18  ;;  %v3607_v42 = vpack.c.bf16 %v4105_v19, %v4104_v13  ;;  %v3102_v22 = vadd.f32 %v4153_v21, %v4843_v20 }
 0x2dc   : > { %v2701_v23 = vpop.f32.mrf.mxu0  ;;  %v3093_v24 = vpop.f32.mrf.mxu1 }
 0x2dd   : > { %3647 = vst [vmem:[%s4860_s14 + $0x48] sm:$0xff] %v3607_v42   ;;  %3172 = vst [vmem:[%s4850_s12 + $0x98] sm:$0xff] %v3102_v22  ;;  %v3602_v25 = vpack.c.bf16 %v2701_v23, %v2698_v16  ;;  %v3094_v26 = vadd.f32 %v4843_v20, %v3093_v24 }
 0x2df   : > { %3646 = vst [vmem:[%s4860_s14 + $0x40] sm:$0xff] %v3602_v25   ;;  %3170 = vst [vmem:[%s4850_s12 + $0x88] sm:$0xff] %v3094_v26 }
 0x2e6   : > { %v4108_v27 = vpop.f32.mrf.mxu0  ;;  %v4156_v28 = vpop.f32.mrf.mxu1 }
 0x2e7   : > { %v3115_v29 = vadd.f32 %v4156_v28, %v4843_v20 }
 0x2e8   : > { %v2714_v30 = vpop.f32.mrf.mxu0  ;;  %v3106_v31 = vpop.f32.mrf.mxu1 }
 0x2e9   : > { %3175 = vst [vmem:[%s4850_s12 + $0xb0] sm:$0xff] %v3115_v29  ;;  %v3107_v32 = vadd.f32 %v4843_v20, %v3106_v31 }
 0x2ea   : > { %v4109_v33 = vpop.f32.mrf.mxu0  ;;  %v4157_v34 = vpop.f32.mrf.mxu1 }
 0x2eb   : > { %3173 = vst [vmem:[%s4850_s12 + $0xa0] sm:$0xff] %v3107_v32  ;;  %v3617_v35 = vpack.c.bf16 %v4109_v33, %v4108_v27  ;;  %v3118_v36 = vadd.f32 %v4157_v34, %v4843_v20 }
 0x2ec   : > { %v2717_v37 = vpop.f32.mrf.mxu0  ;;  %v3109_v38 = vpop.f32.mrf.mxu1 }
 0x2ed   : > { %3649 = vst [vmem:[%s4860_s14 + $0x58] sm:$0xff] %v3617_v35   ;;  %3176 = vst [vmem:[%s4850_s12 + $0xb8] sm:$0xff] %v3118_v36  ;;  %v3612_v39 = vpack.c.bf16 %v2717_v37, %v2714_v30  ;;  %v3110_v40 = vadd.f32 %v4843_v20, %v3109_v38 }
 0x2ef   : > { %3648 = vst [vmem:[%s4860_s14 + $0x50] sm:$0xff] %v3612_v39   ;;  %3174 = vst [vmem:[%s4850_s12 + $0xa8] sm:$0xff] %v3110_v40 }
 0x2f6   : > { %v4112_v41 = vpop.f32.mrf.mxu0  ;;  %v4160_v43 = vpop.f32.mrf.mxu1 }
 0x2f7   : > { %v3131_v44 = vadd.f32 %v4160_v43, %v4843_v20 }
 0x2f8   : > { %v2730_v45 = vpop.f32.mrf.mxu0  ;;  %v3122_v46 = vpop.f32.mrf.mxu1 }
 0x2f9   : > { %3179 = vst [vmem:[%s4850_s12 + $0xd0] sm:$0xff] %v3131_v44  ;;  %v3123_v47 = vadd.f32 %v4843_v20, %v3122_v46 }
 0x2fa   : > { %v4113_v48 = vpop.f32.mrf.mxu0  ;;  %v4161_v49 = vpop.f32.mrf.mxu1 }
 0x2fb   : > { %3177 = vst [vmem:[%s4850_s12 + $0xc0] sm:$0xff] %v3123_v47  ;;  %v3627_v50 = vpack.c.bf16 %v4113_v48, %v4112_v41  ;;  %v3134_v51 = vadd.f32 %v4161_v49, %v4843_v20 }
 0x2fc   : > { %v2733_v52 = vpop.f32.mrf.mxu0  ;;  %v3125_v53 = vpop.f32.mrf.mxu1 }
 0x2fd   : > { %3651 = vst [vmem:[%s4860_s14 + $0x68] sm:$0xff] %v3627_v50   ;;  %3180 = vst [vmem:[%s4850_s12 + $0xd8] sm:$0xff] %v3134_v51  ;;  %v3622_v54 = vpack.c.bf16 %v2733_v52, %v2730_v45  ;;  %v3126_v55 = vadd.f32 %v4843_v20, %v3125_v53 }
 0x2ff   : > { %3650 = vst [vmem:[%s4860_s14 + $0x60] sm:$0xff] %v3622_v54   ;;  %3178 = vst [vmem:[%s4850_s12 + $0xc8] sm:$0xff] %v3126_v55 }
 0x306   : > { %v4116_v56 = vpop.f32.mrf.mxu0  ;;  %v4164_v57 = vpop.f32.mrf.mxu1 }
 0x307   : > { %v3147_v58 = vadd.f32 %v4164_v57, %v4843_v20 }
 0x308   : > { %v2746_v59 = vpop.f32.mrf.mxu0  ;;  %v3138_v60 = vpop.f32.mrf.mxu1 }
 0x309   : > { %3183 = vst [vmem:[%s4850_s12 + $0xf0] sm:$0xff] %v3147_v58  ;;  %v3139_v61 = vadd.f32 %v4843_v20, %v3138_v60 }
 0x30a   : > { %v4117_v62 = vpop.f32.mrf.mxu0  ;;  %v4165_v63 = vpop.f32.mrf.mxu1 }
 0x30b   : > { %3181 = vst [vmem:[%s4850_s12 + $0xe0] sm:$0xff] %v3139_v61  ;;  %v3637_v0 = vpack.c.bf16 %v4117_v62, %v4116_v56  ;;  %v3150_v1 = vadd.f32 %v4165_v63, %v4843_v20 }
 0x30c   : > { %v2749_v2 = vpop.f32.mrf.mxu0  ;;  %v3141_v3 = vpop.f32.mrf.mxu1 }
 0x30d   : > { %3653 = vst [vmem:[%s4860_s14 + $0x78] sm:$0xff] %v3637_v0   ;;  %3184 = vst [vmem:[%s4850_s12 + $0xf8] sm:$0xff] %v3150_v1  ;;  %v3632_v4 = vpack.c.bf16 %v2749_v2, %v2746_v59  ;;  %v3142_v5 = vadd.f32 %v4843_v20, %v3141_v3 }
 0x30f   : > { %3652 = vst [vmem:[%s4860_s14 + $0x70] sm:$0xff] %v3632_v4   ;;  %3182 = vst [vmem:[%s4850_s12 + $0xe8] sm:$0xff] %v3142_v5 }
 0x310 PF: > { %s22_s19 = sadd.s32 1, %s4391_s19   ;;  %s4960_s17 = smov %s4387_s18 }
 0x311   : > { %p19_p5 = scmp.ge.s32.totalorder %s22_s19, 4   ;;  %s4961_s18 = smov %s4963_s20 }
 0x313   :  { %21 = sbr.rel (!%p19_p5) target bundleno = 2 (0x2), region = 119 }

</bundles_post_ra>
